<compile_context>
chip_gen: v7x
topology: tpu7x:2x2x1
jax: 0.10.0
libtpu: 0.0.40
codegen_flags: <defaults>
</compile_context>

<pallas_src>
import functools

import jax
import jax.numpy as jnp
from jax.experimental import pallas as pl
from jax.experimental.pallas import tpu as pltpu


# ----------------------------------------------------------------------------
# Pallas kernel: fused matmul + bias + optional ReLU, tiled over M.
# Operands bf16 (or f32), accumulation + epilogue in f32.
# ----------------------------------------------------------------------------
def _linear_kernel(x_ref, w_ref, b_ref, o_ref, *, relu: bool):
    acc = jnp.dot(x_ref[...], w_ref[...], preferred_element_type=jnp.float32)
    acc = acc + b_ref[...]
    if relu:
        acc = jnp.maximum(acc, 0.0)
    o_ref[...] = acc.astype(o_ref.dtype)


def pallas_linear(x, w, b, *, relu: bool, out_dtype=None, tile_m: int = 512):
    """x: (M, K), w: (K, N), b: (1, N) f32 -> (M, N)."""
    M, K = x.shape
    K2, N = w.shape
    assert K == K2
    out_dtype = out_dtype if out_dtype is not None else x.dtype

    tm = M if M <= tile_m else tile_m           # full-dim block when M is small
    grid_m = pl.cdiv(M, tm)

    cost = pl.CostEstimate(
        flops=2 * M * K * N,
        transcendentals=0,
        bytes_accessed=(M * K * x.dtype.itemsize
                        + K * N * w.dtype.itemsize
                        + N * 4
                        + M * N * jnp.dtype(out_dtype).itemsize),
    )

    return pl.pallas_call(
        functools.partial(_linear_kernel, relu=relu),
        out_shape=jax.ShapeDtypeStruct((M, N), out_dtype),
        grid=(grid_m,),
        in_specs=[
            pl.BlockSpec((tm, K), lambda i: (i, 0)),   # pipelined activations
            pl.BlockSpec((K, N), lambda i: (0, 0)),    # resident weights
            pl.BlockSpec((1, N), lambda i: (0, 0)),    # resident bias
        ],
        out_specs=pl.BlockSpec((tm, N), lambda i: (i, 0)),
        compiler_params=pltpu.CompilerParams(
            dimension_semantics=("parallel",),
            vmem_limit_bytes=32 * 1024 * 1024,
        ),
        cost_estimate=cost,
    )(x, w, b)


# ----------------------------------------------------------------------------
# Pallas kernel: fused FC head  (Linear 3136->512 + ReLU + Linear 512->out).
# Both weight matrices stay resident in VMEM; hidden never touches HBM.
# ----------------------------------------------------------------------------
def _mlp_head_kernel(x_ref, w1_ref, b1_ref, w2_ref, b2_ref, o_ref):
    h = jnp.dot(x_ref[...], w1_ref[...], preferred_element_type=jnp.float32)
    h = jnp.maximum(h + b1_ref[...], 0.0)
    acc = jnp.dot(h.astype(w2_ref.dtype), w2_ref[...],
                  preferred_element_type=jnp.float32)
    o_ref[...] = (acc + b2_ref[...]).astype(o_ref.dtype)


def pallas_mlp_head(x, w1, b1, w2, b2, *, tile_m: int = 512):
    M, K = x.shape
    _, H = w1.shape
    _, N = w2.shape

    tm = M if M <= tile_m else tile_m
    grid_m = pl.cdiv(M, tm)

    cost = pl.CostEstimate(
        flops=2 * M * K * H + 2 * M * H * N,
        transcendentals=0,
        bytes_accessed=(M * K * x.dtype.itemsize
                        + K * H * w1.dtype.itemsize + H * 4
                        + H * N * w2.dtype.itemsize + N * 4
                        + M * N * 4),
    )

    return pl.pallas_call(
        _mlp_head_kernel,
        out_shape=jax.ShapeDtypeStruct((M, N), jnp.float32),
        grid=(grid_m,),
        in_specs=[
            pl.BlockSpec((tm, K), lambda i: (i, 0)),
            pl.BlockSpec((K, H), lambda i: (0, 0)),    # wf1 resident (~3.2 MB bf16)
            pl.BlockSpec((1, H), lambda i: (0, 0)),
            pl.BlockSpec((H, N), lambda i: (0, 0)),    # wf2 resident
            pl.BlockSpec((1, N), lambda i: (0, 0)),
        ],
        out_specs=pl.BlockSpec((tm, N), lambda i: (i, 0)),
        compiler_params=pltpu.CompilerParams(
            dimension_semantics=("parallel",),
            vmem_limit_bytes=32 * 1024 * 1024,
        ),
        cost_estimate=cost,
    )(x, w1, b1, w2, b2)


# ----------------------------------------------------------------------------
# Conv2d (valid padding, stride s) = channels-last im2col + Pallas matmul.
# ----------------------------------------------------------------------------
def _im2col_nhwc(x, k, s):
    """x: (N, H, W, C) -> patches (N*Ho*Wo, k*k*C) flattened in (kh, kw, C)."""
    n, h, w, c = x.shape
    ho = (h - k) // s + 1
    wo = (w - k) // s + 1
    cols = [x[:, kh:kh + s * ho:s, kw:kw + s * wo:s, :]
            for kh in range(k) for kw in range(k)]
    cols = jnp.stack(cols, axis=3)               # (N, Ho, Wo, k*k, C) — no transpose
    return cols.reshape(n * ho * wo, k * k * c), ho, wo


def conv2d_nhwc(x, w_mat, b, k, stride, *, relu: bool):
    """x NHWC, w_mat (k*k*C, O) flattened in (kh, kw, C) order, b (1, O)."""
    n = x.shape[0]
    patches, ho, wo = _im2col_nhwc(x, k, stride)
    out = pallas_linear(patches, w_mat, b, relu=relu, out_dtype=x.dtype)
    return out.reshape(n, ho, wo, w_mat.shape[1])


# ----------------------------------------------------------------------------
# MarioNet forward (NCHW input, PyTorch semantics)
# ----------------------------------------------------------------------------
def mario_net_forward(x_nchw, kp):
    # Single entry transpose to channels-last + bf16; everything after stays NHWC.
    x = x_nchw.transpose(0, 2, 3, 1).astype(jnp.bfloat16)
    x = conv2d_nhwc(x, kp["w1"], kp["b1"], 8, 4, relu=True)   # (N, 20, 20, 32)
    x = conv2d_nhwc(x, kp["w2"], kp["b2"], 4, 2, relu=True)   # (N, 9, 9, 64)
    x = conv2d_nhwc(x, kp["w3"], kp["b3"], 3, 1, relu=True)   # (N, 7, 7, 64)
    n = x.shape[0]
    x = x.reshape(n, 7 * 7 * 64)   # NHWC flatten; wf1 rows pre-permuted to match
    return pallas_mlp_head(x, kp["wf1"], kp["bf1"], kp["wf2"], kp["bf2"])


# ----------------------------------------------------------------------------
# Parameters: PyTorch layout at init (for the reference), converted once to the
# kernel layout (channels-last flattening, (K, N) matmul orientation, bf16).
# ----------------------------------------------------------------------------
def init_params(key, in_channels, output_dim):
    ks = jax.random.split(key, 10)

    def dense(k, shape, fan_in):
        return jax.random.normal(k, shape, jnp.float32) / jnp.sqrt(fan_in)

    return {
        "w1": dense(ks[0], (32, in_channels, 8, 8), in_channels * 8 * 8),
        "b1": dense(ks[1], (32,), in_channels * 8 * 8),
        "w2": dense(ks[2], (64, 32, 4, 4), 32 * 4 * 4),
        "b2": dense(ks[3], (64,), 32 * 4 * 4),
        "w3": dense(ks[4], (64, 64, 3, 3), 64 * 3 * 3),
        "b3": dense(ks[5], (64,), 64 * 3 * 3),
        "wf1": dense(ks[6], (512, 3136), 3136),    # PyTorch Linear: (out, in)
        "bf1": dense(ks[7], (512,), 3136),
        "wf2": dense(ks[8], (output_dim, 512), 512),
        "bf2": dense(ks[9], (output_dim,), 512),
    }


def prepare_params(p, compute_dtype=jnp.bfloat16):
    """Convert PyTorch-layout params into the layout the Pallas kernels consume."""
    def conv_w(w):  # OIHW -> (kh*kw*C, O), rows in (kh, kw, C) order (matches im2col)
        o, c, kh, kw = w.shape
        return w.transpose(2, 3, 1, 0).reshape(kh * kw * c, o).astype(compute_dtype)

    # FC1 rows index the flatten of conv3: PyTorch order is (c, h, w); our NHWC
    # flatten is (h, w, c) -> permute rows accordingly (exact, no numeric change).
    wf1 = p["wf1"].reshape(-1, 64, 7, 7).transpose(2, 3, 1, 0).reshape(7 * 7 * 64, -1)

    return {
        "w1": conv_w(p["w1"]), "b1": p["b1"].reshape(1, -1),
        "w2": conv_w(p["w2"]), "b2": p["b2"].reshape(1, -1),
        "w3": conv_w(p["w3"]), "b3": p["b3"].reshape(1, -1),
        "wf1": wf1.astype(compute_dtype), "bf1": p["bf1"].reshape(1, -1),
        "wf2": p["wf2"].T.astype(compute_dtype), "bf2": p["bf2"].reshape(1, -1),
    }


def _reference_forward(x, p):
    """Pure-JAX f32 reference (lax.conv, PyTorch layout) for validation."""
    def conv(x, w, b, s):
        y = jax.lax.conv_general_dilated(
            x, w, (s, s), "VALID", dimension_numbers=("NCHW", "OIHW", "NCHW"))
        return jax.nn.relu(y + b.reshape(1, -1, 1, 1))
    x = conv(x, p["w1"], p["b1"], 4)
    x = conv(x, p["w2"], p["b2"], 2)
    x = conv(x, p["w3"], p["b3"], 1)
    x = x.reshape(x.shape[0], -1)
    x = jax.nn.relu(x @ p["wf1"].T + p["bf1"])
    return x @ p["wf2"].T + p["bf2"]


if __name__ == "__main__":
    key = jax.random.PRNGKey(0)
    k_x, k_p = jax.random.split(key)

    batch, in_channels, output_dim = 2, 4, 12   # MarioNet requires 84x84 input
    x = jax.random.normal(k_x, (batch, in_channels, 84, 84), jnp.float32)

    params = init_params(k_p, in_channels, output_dim)     # PyTorch layout, f32
    kparams = prepare_params(params)                        # kernel layout, bf16

    fwd = jax.jit(mario_net_forward)
    out = jax.block_until_ready(fwd(x, kparams))
    assert out.shape == (batch, output_dim), out.shape

    ref = jax.block_until_ready(_reference_forward(x, params))
    # bf16 operands with f32 accumulation: loosen tolerance vs the f32 reference.
    assert jnp.allclose(out, ref, rtol=5e-2, atol=5e-2), (
        "mismatch vs JAX reference: max abs err = "
        f"{float(jnp.max(jnp.abs(out - ref)))}")

    print("KERNEL_OK")
</pallas_src>

<mosaic_0001>
module attributes {stable_mosaic.version = 11 : i64} {
  func.func @_linear_kernel(%arg0: i32, %arg1: memref<512x256xbf16, #tpu.memory_space<vmem>>, %arg2: memref<256x32xbf16, #tpu.memory_space<vmem>>, %arg3: memref<1x32xf32, #tpu.memory_space<vmem>>, %arg4: memref<512x32xbf16, #tpu.memory_space<vmem>>) attributes {dimension_semantics = [#tpu.dimension_semantics<parallel>], iteration_bounds = array<i64: 2>, scalar_prefetch = 0 : i64, scratch_operands = 0 : i64, tpu.core_type = #tpu.core_type<tc>, window_params = [{transform_indices = @transform_0, window_bounds = array<i64: 512, 256>}, {pipeline_mode = #tpu.pipeline_mode<synchronous>, transform_indices = @transform_1, window_bounds = array<i64: 256, 32>}, {pipeline_mode = #tpu.pipeline_mode<synchronous>, transform_indices = @transform_2, window_bounds = array<i64: 1, 32>}, {transform_indices = @transform_3, window_bounds = array<i64: 512, 32>}]} {
    %c0 = arith.constant 0 : index
    %c0_0 = arith.constant 0 : index
    %0 = vector.load %arg1[%c0, %c0_0] : memref<512x256xbf16, #tpu.memory_space<vmem>>, vector<512x256xbf16>
    %c0_1 = arith.constant 0 : index
    %c0_2 = arith.constant 0 : index
    %1 = vector.load %arg2[%c0_1, %c0_2] : memref<256x32xbf16, #tpu.memory_space<vmem>>, vector<256x32xbf16>
    %cst = arith.constant dense<0.000000e+00> : vector<512x32xf32>
    %2 = tpu.matmul %0, %1, %cst {dimension_numbers = #tpu.dot_dimension_numbers<[1], [0], [0], [1], [0, 0, 1, 1], [], []>} : vector<512x256xbf16>, vector<256x32xbf16>, vector<512x32xf32> -> vector<512x32xf32>
    %c0_3 = arith.constant 0 : index
    %c0_4 = arith.constant 0 : index
    %3 = vector.load %arg3[%c0_3, %c0_4] : memref<1x32xf32, #tpu.memory_space<vmem>>, vector<1x32xf32>
    %4 = vector.broadcast %3 : vector<1x32xf32> to vector<512x32xf32>
    %5 = arith.addf %2, %4 : vector<512x32xf32>
    %cst_5 = arith.constant 0.000000e+00 : f32
    %6 = vector.broadcast %cst_5 : f32 to vector<512x32xf32>
    %7 = arith.maximumf %5, %6 : vector<512x32xf32>
    %8 = arith.truncf %7 : vector<512x32xf32> to vector<512x32xbf16>
    %c0_6 = arith.constant 0 : index
    %c0_7 = arith.constant 0 : index
    %9 = vector.load %arg4[%c0_6, %c0_7] : memref<512x32xbf16, #tpu.memory_space<vmem>>, vector<512x32xbf16>
    tpu.vector_store %arg4[%c0_6, %c0_7], %8 {strides = array<i32>} : memref<512x32xbf16, #tpu.memory_space<vmem>>, vector<512x32xbf16>,
    return
  }
  func.func @transform_0(%arg0: i32) -> (i32, i32) {
    %c0_i32 = arith.constant 0 : i32
    %c0_i32_0 = arith.constant 0 : i32
    return %arg0, %c0_i32 : i32, i32
  }
  func.func @transform_1(%arg0: i32) -> (i32, i32) {
    %c0_i32 = arith.constant 0 : i32
    %c0_i32_0 = arith.constant 0 : i32
    %c0_i32_1 = arith.constant 0 : i32
    return %c0_i32, %c0_i32_0 : i32, i32
  }
  func.func @transform_2(%arg0: i32) -> (i32, i32) {
    %c0_i32 = arith.constant 0 : i32
    %c0_i32_0 = arith.constant 0 : i32
    %c0_i32_1 = arith.constant 0 : i32
    return %c0_i32, %c0_i32_0 : i32, i32
  }
  func.func @transform_3(%arg0: i32) -> (i32, i32) {
    %c0_i32 = arith.constant 0 : i32
    %c0_i32_0 = arith.constant 0 : i32
    return %arg0, %c0_i32 : i32, i32
  }
}

module attributes {stable_mosaic.version = 11 : i64} {
  func.func @_linear_kernel(%arg0: i32, %arg1: memref<162x512xbf16, #tpu.memory_space<vmem>>, %arg2: memref<512x64xbf16, #tpu.memory_space<vmem>>, %arg3: memref<1x64xf32, #tpu.memory_space<vmem>>, %arg4: memref<162x64xbf16, #tpu.memory_space<vmem>>) attributes {dimension_semantics = [#tpu.dimension_semantics<parallel>], iteration_bounds = array<i64: 1>, scalar_prefetch = 0 : i64, scratch_operands = 0 : i64, tpu.core_type = #tpu.core_type<tc>, window_params = [{transform_indices = @transform_0, window_bounds = array<i64: 162, 512>}, {pipeline_mode = #tpu.pipeline_mode<synchronous>, transform_indices = @transform_1, window_bounds = array<i64: 512, 64>}, {pipeline_mode = #tpu.pipeline_mode<synchronous>, transform_indices = @transform_2, window_bounds = array<i64: 1, 64>}, {transform_indices = @transform_3, window_bounds = array<i64: 162, 64>}]} {
    %c0 = arith.constant 0 : index
    %c0_0 = arith.constant 0 : index
    %0 = vector.load %arg1[%c0, %c0_0] : memref<162x512xbf16, #tpu.memory_space<vmem>>, vector<162x512xbf16>
    %c0_1 = arith.constant 0 : index
    %c0_2 = arith.constant 0 : index
    %1 = vector.load %arg2[%c0_1, %c0_2] : memref<512x64xbf16, #tpu.memory_space<vmem>>, vector<512x64xbf16>
    %cst = arith.constant dense<0.000000e+00> : vector<162x64xf32>
    %2 = tpu.matmul %0, %1, %cst {dimension_numbers = #tpu.dot_dimension_numbers<[1], [0], [0], [1], [0, 0, 1, 1], [], []>} : vector<162x512xbf16>, vector<512x64xbf16>, vector<162x64xf32> -> vector<162x64xf32>
    %c0_3 = arith.constant 0 : index
    %c0_4 = arith.constant 0 : index
    %3 = vector.load %arg3[%c0_3, %c0_4] : memref<1x64xf32, #tpu.memory_space<vmem>>, vector<1x64xf32>
    %4 = vector.broadcast %3 : vector<1x64xf32> to vector<162x64xf32>
    %5 = arith.addf %2, %4 : vector<162x64xf32>
    %cst_5 = arith.constant 0.000000e+00 : f32
    %6 = vector.broadcast %cst_5 : f32 to vector<162x64xf32>
    %7 = arith.maximumf %5, %6 : vector<162x64xf32>
    %8 = arith.truncf %7 : vector<162x64xf32> to vector<162x64xbf16>
    %c0_6 = arith.constant 0 : index
    %c0_7 = arith.constant 0 : index
    %9 = vector.load %arg4[%c0_6, %c0_7] : memref<162x64xbf16, #tpu.memory_space<vmem>>, vector<162x64xbf16>
    tpu.vector_store %arg4[%c0_6, %c0_7], %8 {strides = array<i32>} : memref<162x64xbf16, #tpu.memory_space<vmem>>, vector<162x64xbf16>,
    return
  }
  func.func @transform_0(%arg0: i32) -> (i32, i32) {
    %c0_i32 = arith.constant 0 : i32
    %c0_i32_0 = arith.constant 0 : i32
    return %arg0, %c0_i32 : i32, i32
  }
  func.func @transform_1(%arg0: i32) -> (i32, i32) {
    %c0_i32 = arith.constant 0 : i32
    %c0_i32_0 = arith.constant 0 : i32
    %c0_i32_1 = arith.constant 0 : i32
    return %c0_i32, %c0_i32_0 : i32, i32
  }
  func.func @transform_2(%arg0: i32) -> (i32, i32) {
    %c0_i32 = arith.constant 0 : i32
    %c0_i32_0 = arith.constant 0 : i32
    %c0_i32_1 = arith.constant 0 : i32
    return %c0_i32, %c0_i32_0 : i32, i32
  }
  func.func @transform_3(%arg0: i32) -> (i32, i32) {
    %c0_i32 = arith.constant 0 : i32
    %c0_i32_0 = arith.constant 0 : i32
    return %arg0, %c0_i32 : i32, i32
  }
}

module attributes {stable_mosaic.version = 11 : i64} {
  func.func @_linear_kernel(%arg0: i32, %arg1: memref<98x576xbf16, #tpu.memory_space<vmem>>, %arg2: memref<576x64xbf16, #tpu.memory_space<vmem>>, %arg3: memref<1x64xf32, #tpu.memory_space<vmem>>, %arg4: memref<98x64xbf16, #tpu.memory_space<vmem>>) attributes {dimension_semantics = [#tpu.dimension_semantics<parallel>], iteration_bounds = array<i64: 1>, scalar_prefetch = 0 : i64, scratch_operands = 0 : i64, tpu.core_type = #tpu.core_type<tc>, window_params = [{transform_indices = @transform_0, window_bounds = array<i64: 98, 576>}, {pipeline_mode = #tpu.pipeline_mode<synchronous>, transform_indices = @transform_1, window_bounds = array<i64: 576, 64>}, {pipeline_mode = #tpu.pipeline_mode<synchronous>, transform_indices = @transform_2, window_bounds = array<i64: 1, 64>}, {transform_indices = @transform_3, window_bounds = array<i64: 98, 64>}]} {
    %c0 = arith.constant 0 : index
    %c0_0 = arith.constant 0 : index
    %0 = vector.load %arg1[%c0, %c0_0] : memref<98x576xbf16, #tpu.memory_space<vmem>>, vector<98x576xbf16>
    %c0_1 = arith.constant 0 : index
    %c0_2 = arith.constant 0 : index
    %1 = vector.load %arg2[%c0_1, %c0_2] : memref<576x64xbf16, #tpu.memory_space<vmem>>, vector<576x64xbf16>
    %cst = arith.constant dense<0.000000e+00> : vector<98x64xf32>
    %2 = tpu.matmul %0, %1, %cst {dimension_numbers = #tpu.dot_dimension_numbers<[1], [0], [0], [1], [0, 0, 1, 1], [], []>} : vector<98x576xbf16>, vector<576x64xbf16>, vector<98x64xf32> -> vector<98x64xf32>
    %c0_3 = arith.constant 0 : index
    %c0_4 = arith.constant 0 : index
    %3 = vector.load %arg3[%c0_3, %c0_4] : memref<1x64xf32, #tpu.memory_space<vmem>>, vector<1x64xf32>
    %4 = vector.broadcast %3 : vector<1x64xf32> to vector<98x64xf32>
    %5 = arith.addf %2, %4 : vector<98x64xf32>
    %cst_5 = arith.constant 0.000000e+00 : f32
    %6 = vector.broadcast %cst_5 : f32 to vector<98x64xf32>
    %7 = arith.maximumf %5, %6 : vector<98x64xf32>
    %8 = arith.truncf %7 : vector<98x64xf32> to vector<98x64xbf16>
    %c0_6 = arith.constant 0 : index
    %c0_7 = arith.constant 0 : index
    %9 = vector.load %arg4[%c0_6, %c0_7] : memref<98x64xbf16, #tpu.memory_space<vmem>>, vector<98x64xbf16>
    tpu.vector_store %arg4[%c0_6, %c0_7], %8 {strides = array<i32>} : memref<98x64xbf16, #tpu.memory_space<vmem>>, vector<98x64xbf16>,
    return
  }
  func.func @transform_0(%arg0: i32) -> (i32, i32) {
    %c0_i32 = arith.constant 0 : i32
    %c0_i32_0 = arith.constant 0 : i32
    return %arg0, %c0_i32 : i32, i32
  }
  func.func @transform_1(%arg0: i32) -> (i32, i32) {
    %c0_i32 = arith.constant 0 : i32
    %c0_i32_0 = arith.constant 0 : i32
    %c0_i32_1 = arith.constant 0 : i32
    return %c0_i32, %c0_i32_0 : i32, i32
  }
  func.func @transform_2(%arg0: i32) -> (i32, i32) {
    %c0_i32 = arith.constant 0 : i32
    %c0_i32_0 = arith.constant 0 : i32
    %c0_i32_1 = arith.constant 0 : i32
    return %c0_i32, %c0_i32_0 : i32, i32
  }
  func.func @transform_3(%arg0: i32) -> (i32, i32) {
    %c0_i32 = arith.constant 0 : i32
    %c0_i32_0 = arith.constant 0 : i32
    return %arg0, %c0_i32 : i32, i32
  }
}

module attributes {stable_mosaic.version = 11 : i64} {
  func.func @_mlp_head_kernel(%arg0: i32, %arg1: memref<2x3136xbf16, #tpu.memory_space<vmem>>, %arg2: memref<3136x512xbf16, #tpu.memory_space<vmem>>, %arg3: memref<1x512xf32, #tpu.memory_space<vmem>>, %arg4: memref<512x12xbf16, #tpu.memory_space<vmem>>, %arg5: memref<1x12xf32, #tpu.memory_space<vmem>>, %arg6: memref<2x12xf32, #tpu.memory_space<vmem>>) attributes {dimension_semantics = [#tpu.dimension_semantics<parallel>], iteration_bounds = array<i64: 1>, scalar_prefetch = 0 : i64, scratch_operands = 0 : i64, tpu.core_type = #tpu.core_type<tc>, window_params = [{transform_indices = @transform_0, window_bounds = array<i64: 2, 3136>}, {pipeline_mode = #tpu.pipeline_mode<synchronous>, transform_indices = @transform_1, window_bounds = array<i64: 3136, 512>}, {pipeline_mode = #tpu.pipeline_mode<synchronous>, transform_indices = @transform_2, window_bounds = array<i64: 1, 512>}, {pipeline_mode = #tpu.pipeline_mode<synchronous>, transform_indices = @transform_3, window_bounds = array<i64: 512, 12>}, {pipeline_mode = #tpu.pipeline_mode<synchronous>, transform_indices = @transform_4, window_bounds = array<i64: 1, 12>}, {transform_indices = @transform_5, window_bounds = array<i64: 2, 12>}]} {
    %c0 = arith.constant 0 : index
    %c0_0 = arith.constant 0 : index
    %0 = vector.load %arg1[%c0, %c0_0] : memref<2x3136xbf16, #tpu.memory_space<vmem>>, vector<2x3136xbf16>
    %c0_1 = arith.constant 0 : index
    %c0_2 = arith.constant 0 : index
    %1 = vector.load %arg2[%c0_1, %c0_2] : memref<3136x512xbf16, #tpu.memory_space<vmem>>, vector<3136x512xbf16>
    %cst = arith.constant dense<0.000000e+00> : vector<2x512xf32>
    %2 = tpu.matmul %0, %1, %cst {dimension_numbers = #tpu.dot_dimension_numbers<[1], [0], [0], [1], [0, 0, 1, 1], [], []>} : vector<2x3136xbf16>, vector<3136x512xbf16>, vector<2x512xf32> -> vector<2x512xf32>
    %c0_3 = arith.constant 0 : index
    %c0_4 = arith.constant 0 : index
    %3 = vector.load %arg3[%c0_3, %c0_4] : memref<1x512xf32, #tpu.memory_space<vmem>>, vector<1x512xf32>
    %4 = vector.broadcast %3 : vector<1x512xf32> to vector<2x512xf32>
    %5 = arith.addf %2, %4 : vector<2x512xf32>
    %cst_5 = arith.constant 0.000000e+00 : f32
    %6 = vector.broadcast %cst_5 : f32 to vector<2x512xf32>
    %7 = arith.maximumf %5, %6 : vector<2x512xf32>
    %8 = arith.truncf %7 : vector<2x512xf32> to vector<2x512xbf16>
    %c0_6 = arith.constant 0 : index
    %c0_7 = arith.constant 0 : index
    %9 = vector.load %arg4[%c0_6, %c0_7] : memref<512x12xbf16, #tpu.memory_space<vmem>>, vector<512x12xbf16>
    %cst_8 = arith.constant dense<0.000000e+00> : vector<2x12xf32>
    %10 = tpu.matmul %8, %9, %cst_8 {dimension_numbers = #tpu.dot_dimension_numbers<[1], [0], [0], [1], [0, 0, 1, 1], [], []>} : vector<2x512xbf16>, vector<512x12xbf16>, vector<2x12xf32> -> vector<2x12xf32>
    %c0_9 = arith.constant 0 : index
    %c0_10 = arith.constant 0 : index
    %11 = vector.load %arg5[%c0_9, %c0_10] : memref<1x12xf32, #tpu.memory_space<vmem>>, vector<1x12xf32>
    %12 = vector.broadcast %11 : vector<1x12xf32> to vector<2x12xf32>
    %13 = arith.addf %10, %12 : vector<2x12xf32>
    %c0_11 = arith.constant 0 : index
    %c0_12 = arith.constant 0 : index
    %14 = vector.load %arg6[%c0_11, %c0_12] : memref<2x12xf32, #tpu.memory_space<vmem>>, vector<2x12xf32>
    tpu.vector_store %arg6[%c0_11, %c0_12], %13 {strides = array<i32>} : memref<2x12xf32, #tpu.memory_space<vmem>>, vector<2x12xf32>,
    return
  }
  func.func @transform_0(%arg0: i32) -> (i32, i32) {
    %c0_i32 = arith.constant 0 : i32
    %c0_i32_0 = arith.constant 0 : i32
    return %arg0, %c0_i32 : i32, i32
  }
  func.func @transform_1(%arg0: i32) -> (i32, i32) {
    %c0_i32 = arith.constant 0 : i32
    %c0_i32_0 = arith.constant 0 : i32
    %c0_i32_1 = arith.constant 0 : i32
    return %c0_i32, %c0_i32_0 : i32, i32
  }
  func.func @transform_2(%arg0: i32) -> (i32, i32) {
    %c0_i32 = arith.constant 0 : i32
    %c0_i32_0 = arith.constant 0 : i32
    %c0_i32_1 = arith.constant 0 : i32
    return %c0_i32, %c0_i32_0 : i32, i32
  }
  func.func @transform_3(%arg0: i32) -> (i32, i32) {
    %c0_i32 = arith.constant 0 : i32
    %c0_i32_0 = arith.constant 0 : i32
    %c0_i32_1 = arith.constant 0 : i32
    return %c0_i32, %c0_i32_0 : i32, i32
  }
  func.func @transform_4(%arg0: i32) -> (i32, i32) {
    %c0_i32 = arith.constant 0 : i32
    %c0_i32_0 = arith.constant 0 : i32
    %c0_i32_1 = arith.constant 0 : i32
    return %c0_i32, %c0_i32_0 : i32, i32
  }
  func.func @transform_5(%arg0: i32) -> (i32, i32) {
    %c0_i32 = arith.constant 0 : i32
    %c0_i32_0 = arith.constant 0 : i32
    return %arg0, %c0_i32 : i32, i32
  }
}

</mosaic_0001>

<bundles_post_ra>
// kernel: mario_net_forward.4
= control target key start
LH: loop header
LB: loop body
LE: loop exit
PB: predicated region body
PF: predicated region fallthrough
CT: control target
= control target key end

     0   :  { %s2440_s12 = smov 0   ;;  %s2442_s13 = smov 0   ;;  %s3022_s0 = inlined_call_operand.vmem [shape: bf16[800,256], index: 0, kind: input, shape index: {}]   ;;  %s3023_s1 = inlined_call_operand.vmem [shape: bf16[256,32], index: 1, kind: input, shape index: {}]   ;;  %s3024_s2 = inlined_call_operand.vmem [shape: f32[1,32], index: 2, kind: input, shape index: {}]   ;;  %s3025_s3 = inlined_call_operand.vmem [shape: bf16[800,32], index: 3, kind: output, shape index: {}]  }
   0x1   :  { %s2444_s14 = smov 0  }
   0x2 LB: > { %s2453_s15 = sadd.s32 4294967295, %s2385_s14   ;;  %s2455_s16 = sadd.s32 1, %s2385_s14   ;;  %s2385_s14 = sphi %s2444_s14, %s3032_s14   ;;  %s2381_s13 = sphi %s2442_s13, %s3031_s13   ;;  %s2377_s12 = sphi %s2440_s12, %s3030_s12  }
   0x3   : > { %s85_s17 = ssub.s32 %s2385_s14, %s2455_s16  ;;  %s88_s18 = sadd.s32 1, %s2381_s13 }
   0x4   : > { %p86_p0 = scmp.eq.s32.totalorder %s85_s17, 0  ;;  %p98_p1 = scmp.ne.s32.totalorder %s2381_s13, %s2377_s12 }
   0x5   : > { %p99_p2 = scmp.eq.s32.totalorder %s2453_s15, 1  ;;  %p1863_p3 = scmp.ge.s32.totalorder %s2385_s14, 1 }
   0x6   : > { %s2463_s19 = scalar_select %p86_p0, %s2381_s13, %s88_s18  }
   0x7   : > { %p2465_p4 = por %p99_p2, %p98_p1  ;;  %p149_p5 = scmp.lt.s32.totalorder %s2385_s14, 3 }
   0x9   : > { %p150_p6 = pnand %p1863_p3, %p149_p5 }
   0xa   : > { %v2219_v0 = vld [vmem:[%s3023_s1] sm:$0xff] (!%p150_p6)   ;;  %v2419_v1 = vmov (!%p150_p6), 0   ;;  %s2475_s23 = sshll.u32 (!%p150_p6), %s2453_s15, 6  ;;  %v2220_v2 = vld [vmem:[%s3023_s1 + $0x8] sm:$0xff] (!%p150_p6)   ;;  %v2221_v3 = vld [vmem:[%s3023_s1 + $0x10] sm:$0xff] (!%p150_p6)   ;;  %s175_s17 = sand.u32 (!%p150_p6), 1, %s2377_s12  }
   0xb   : > { %153 = sbr.rel (%p150_p6) target bundleno = 507 (0x1fb), region = 32  ;;  %720 = vmatprep.subr.bf16.mxu0 (!%p150_p6), %v2419_v1  ;;  %2098 = vmatprep.subr.bf16.mxu1 (!%p150_p6), %v2419_v1  ;;  %p184_p7 = scmp.lt.s32.totalorder (!%p150_p6), %s2475_s23, 99  ;;  %v2222_v4 = vld [vmem:[%s3023_s1 + $0x18] sm:$0xff] (!%p150_p6)   ;;  %v2223_v5 = vld [vmem:[%s3023_s1 + $0x20] sm:$0xff] (!%p150_p6)   ;;  %v2224_v7 = vld [vmem:[%s3023_s1 + $0x28] sm:$0xff] (!%p150_p6)   ;;  %vm1329_vm0 = vcmask (!%p150_p6), 257024  }
   0xc   : > { %721 = vmatpush1.bf16.msra.mxu0 (!%p150_p6), %v2219_v0  ;;  %2114 = vmatpush1.bf16.msra.mxu1 (!%p150_p6), %v2219_v0  ;;  %v2225_v9 = vld [vmem:[%s3023_s1 + $0x30] sm:$0xff] (!%p150_p6)   ;;  %v2226_v10 = vld [vmem:[%s3023_s1 + $0x38] sm:$0xff] (!%p150_p6)   ;;  %v2227_v11 = vld [vmem:[%s3023_s1 + $0x40] sm:$0xff] (!%p150_p6)   ;;  %s1864_s22 = sshll.u32 (!%p150_p6), %s175_s17, 8 }
   0xd   : > { %722 = vmatprep.subr.bf16.mxu0 (!%p150_p6), %v2419_v1  ;;  %2099 = vmatprep.subr.bf16.mxu1 (!%p150_p6), %v2419_v1  ;;  %v2228_v12 = vld [vmem:[%s3023_s1 + $0x48] sm:$0xff] (!%p150_p6)   ;;  %v2229_v13 = vld [vmem:[%s3023_s1 + $0x50] sm:$0xff] (!%p150_p6)   ;;  %v2230_v14 = vld [vmem:[%s3023_s1 + $0x58] sm:$0xff] (!%p150_p6)   ;;  %s2633_s12 = scalar_lea.vmem (!%p150_p6), [#allocation2], %s1864_s22  }
   0xe   : > { %v2231_v15 = vld [vmem:[%s3023_s1 + $0x60] sm:$0xff] (!%p150_p6)   ;;  %v2232_v16 = vld [vmem:[%s3023_s1 + $0x68] sm:$0xff] (!%p150_p6)   ;;  %v2233_v17 = vld [vmem:[%s3023_s1 + $0x70] sm:$0xff] (!%p150_p6)  }
   0xf   : > { %v2234_v18 = vld [vmem:[%s3023_s1 + $0x78] sm:$0xff] (!%p150_p6)  }
  0x10   : > { %723 = vmatpush1.bf16.msra.mxu0 (!%p150_p6), %v2220_v2  ;;  %2115 = vmatpush1.bf16.msra.mxu1 (!%p150_p6), %v2220_v2 }
  0x11   : > { %724 = vmatprep.subr.bf16.mxu0 (!%p150_p6), %v2419_v1  ;;  %2100 = vmatprep.subr.bf16.mxu1 (!%p150_p6), %v2419_v1 }
  0x12   : > { %s185_s28 = scalar_select %p184_p7, %s2475_s23, 99 }
  0x13   : > { %s2095_s24 = sshll.u32 (%p2465_p4), %s2453_s15, 8 }
  0x14   : > { %725 = vmatpush1.bf16.msra.mxu0 %v2221_v3  ;;  %2116 = vmatpush1.bf16.msra.mxu1 %v2221_v3  ;;  %s2030_s4 = sshll.u32 %s185_s28, 3  ;;  %s2830_s27 = scalar_lea.vmem (%p2465_p4), %s3025_s3, %s2095_s24  }
  0x15   : > { %726 = vmatprep.subr.bf16.mxu0 %v2419_v1  ;;  %2101 = vmatprep.subr.bf16.mxu1 %v2419_v1  ;;  %s2500_s9 = scalar_lea.vmem %s3022_s0, %s2030_s4 }
  0x16   : > { %v2237_v6 = vld [vmem:[%s2500_s9 + $0x4] ss:$8 sps:$4 sm:$0xff]   ;;  %v2235_v19 = vld [vmem:[%s2500_s9] ss:$8 sps:$4 sm:$0xff]   ;;  %v2241_v21 = vld [vmem:[%s2500_s9 + $0x14] ss:$8 sps:$4 sm:$0xff]  }
  0x17   : > { %v2240_v8 = vld [vmem:[%s2500_s9 + $0x104] ss:$8 sps:$4 sm:$0xff]   ;;  %752 = vmatprep.mubr.bf16.mxu0 %v2237_v6  ;;  %v2238_v20 = vld [vmem:[%s2500_s9 + $0x100] ss:$8 sps:$4 sm:$0xff]   ;;  %v2243_v22 = vld [vmem:[%s2500_s9 + $0x114] ss:$8 sps:$4 sm:$0xff]  }
  0x18   : > { %727 = vmatpush1.bf16.msra.mxu0 %v2222_v4  ;;  %2117 = vmatpush1.bf16.msra.mxu1 %v2222_v4  ;;  %v2245_v23 = vld [vmem:[%s2500_s9 + $0x10] ss:$8 sps:$4 sm:$0xff]   ;;  %v2247_v25 = vld [vmem:[%s2500_s9 + $0x24] ss:$8 sps:$4 sm:$0xff]   ;;  %v2251_v27 = vld [vmem:[%s2500_s9 + $0x20] ss:$8 sps:$4 sm:$0xff]  }
  0x19   : > { %728 = vmatprep.subr.bf16.mxu0 %v2419_v1  ;;  %2102 = vmatprep.subr.bf16.mxu1 %v2419_v1  ;;  %v2246_v24 = vld [vmem:[%s2500_s9 + $0x110] ss:$8 sps:$4 sm:$0xff]   ;;  %v2249_v26 = vld [vmem:[%s2500_s9 + $0x124] ss:$8 sps:$4 sm:$0xff]   ;;  %v2252_v28 = vld [vmem:[%s2500_s9 + $0x120] ss:$8 sps:$4 sm:$0xff]  }
  0x1a   : > { %880 = vmatprep.mubr.bf16.mxu1 %v2240_v8  ;;  %v2253_v29 = vld [vmem:[%s2500_s9 + $0x34] ss:$8 sps:$4 sm:$0xff]   ;;  %v2257_v31 = vld [vmem:[%s2500_s9 + $0x30] ss:$8 sps:$4 sm:$0xff]   ;;  %v2259_v33 = vld [vmem:[%s2500_s9 + $0x44] ss:$8 sps:$4 sm:$0xff]  }
  0x1b   : > { %v2255_v30 = vld [vmem:[%s2500_s9 + $0x134] ss:$8 sps:$4 sm:$0xff]   ;;  %v2258_v32 = vld [vmem:[%s2500_s9 + $0x130] ss:$8 sps:$4 sm:$0xff]   ;;  %v2261_v34 = vld [vmem:[%s2500_s9 + $0x144] ss:$8 sps:$4 sm:$0xff]  }
  0x1c   : > { %729 = vmatpush1.bf16.msra.mxu0 %v2223_v5  ;;  %2118 = vmatpush1.bf16.msra.mxu1 %v2223_v5  ;;  %v2263_v35 = vld [vmem:[%s2500_s9 + $0x40] ss:$8 sps:$4 sm:$0xff]   ;;  %v2265_v37 = vld [vmem:[%s2500_s9 + $0x54] ss:$8 sps:$4 sm:$0xff]   ;;  %v2269_v39 = vld [vmem:[%s2500_s9 + $0x50] ss:$8 sps:$4 sm:$0xff]  }
  0x1d   : > { %730 = vmatprep.subr.bf16.mxu0 %v2419_v1  ;;  %2103 = vmatprep.subr.bf16.mxu1 %v2419_v1  ;;  %v2264_v36 = vld [vmem:[%s2500_s9 + $0x140] ss:$8 sps:$4 sm:$0xff]   ;;  %v2267_v38 = vld [vmem:[%s2500_s9 + $0x154] ss:$8 sps:$4 sm:$0xff]   ;;  %v2270_v40 = vld [vmem:[%s2500_s9 + $0x150] ss:$8 sps:$4 sm:$0xff]  }
  0x1e   : > { %v2271_v41 = vld [vmem:[%s2500_s9 + $0x64] ss:$8 sps:$4 sm:$0xff]   ;;  %v2275_v43 = vld [vmem:[%s2500_s9 + $0x60] ss:$8 sps:$4 sm:$0xff]   ;;  %v2277_v45 = vld [vmem:[%s2500_s9 + $0x74] ss:$8 sps:$4 sm:$0xff]  }
  0x1f   : > { %v2273_v42 = vld [vmem:[%s2500_s9 + $0x164] ss:$8 sps:$4 sm:$0xff]   ;;  %v2276_v44 = vld [vmem:[%s2500_s9 + $0x160] ss:$8 sps:$4 sm:$0xff]   ;;  %v2279_v46 = vld [vmem:[%s2500_s9 + $0x174] ss:$8 sps:$4 sm:$0xff]  }
  0x20   : > { %731 = vmatpush1.bf16.msra.mxu0 %v2224_v7  ;;  %2119 = vmatpush1.bf16.msra.mxu1 %v2224_v7  ;;  %v2281_v47 = vld [vmem:[%s2500_s9 + $0x70] ss:$8 sps:$4 sm:$0xff]   ;;  %v2283_v49 = vld [vmem:[%s2500_s9 + $0x84] ss:$8 sps:$4 sm:$0xff]   ;;  %v2287_v51 = vld [vmem:[%s2500_s9 + $0x80] ss:$8 sps:$4 sm:$0xff]  }
  0x21   : > { %732 = vmatprep.subr.bf16.mxu0 %v2419_v1  ;;  %2104 = vmatprep.subr.bf16.mxu1 %v2419_v1  ;;  %v2282_v48 = vld [vmem:[%s2500_s9 + $0x170] ss:$8 sps:$4 sm:$0xff]   ;;  %v2285_v50 = vld [vmem:[%s2500_s9 + $0x184] ss:$8 sps:$4 sm:$0xff]   ;;  %v2288_v52 = vld [vmem:[%s2500_s9 + $0x180] ss:$8 sps:$4 sm:$0xff]  }
  0x22   : > { %v2289_v53 = vld [vmem:[%s2500_s9 + $0x94] ss:$8 sps:$4 sm:$0xff]   ;;  %v2293_v55 = vld [vmem:[%s2500_s9 + $0x90] ss:$8 sps:$4 sm:$0xff]   ;;  %v2295_v57 = vld [vmem:[%s2500_s9 + $0xa4] ss:$8 sps:$4 sm:$0xff]  }
  0x23   : > { %v2291_v54 = vld [vmem:[%s2500_s9 + $0x194] ss:$8 sps:$4 sm:$0xff]   ;;  %v2294_v56 = vld [vmem:[%s2500_s9 + $0x190] ss:$8 sps:$4 sm:$0xff]   ;;  %v2297_v58 = vld [vmem:[%s2500_s9 + $0x1a4] ss:$8 sps:$4 sm:$0xff]  }
  0x24   : > { %733 = vmatpush1.bf16.msra.mxu0 %v2225_v9  ;;  %2120 = vmatpush1.bf16.msra.mxu1 %v2225_v9  ;;  %v2299_v59 = vld [vmem:[%s2500_s9 + $0xa0] ss:$8 sps:$4 sm:$0xff]   ;;  %v2301_v61 = vld [vmem:[%s2500_s9 + $0xb4] ss:$8 sps:$4 sm:$0xff]   ;;  %v2305_v63 = vld [vmem:[%s2500_s9 + $0xb0] ss:$8 sps:$4 sm:$0xff]  }
  0x25   : > { %734 = vmatprep.subr.bf16.mxu0 %v2419_v1  ;;  %2105 = vmatprep.subr.bf16.mxu1 %v2419_v1  ;;  %v2300_v60 = vld [vmem:[%s2500_s9 + $0x1a0] ss:$8 sps:$4 sm:$0xff]   ;;  %v2303_v62 = vld [vmem:[%s2500_s9 + $0x1b4] ss:$8 sps:$4 sm:$0xff]   ;;  %v2306_v0 = vld [vmem:[%s2500_s9 + $0x1b0] ss:$8 sps:$4 sm:$0xff]  }
  0x26   : > { %v2309_v2 = vld [vmem:[%s2500_s9 + $0x1c4] ss:$8 sps:$4 sm:$0xff]   ;;  %v2311_v3 = vld [vmem:[%s2500_s9 + $0xc0] ss:$8 sps:$4 sm:$0xff]   ;;  %v2313_v5 = vld [vmem:[%s2500_s9 + $0xd4] ss:$8 sps:$4 sm:$0xff]  }
  0x27   : > { %v2312_v4 = vld [vmem:[%s2500_s9 + $0x1c0] ss:$8 sps:$4 sm:$0xff]   ;;  %v2315_v6 = vld [vmem:[%s2500_s9 + $0x1d4] ss:$8 sps:$4 sm:$0xff]   ;;  %v2317_v7 = vld [vmem:[%s2500_s9 + $0xd0] ss:$8 sps:$4 sm:$0xff]  }
  0x28   : > { %735 = vmatpush1.bf16.msra.mxu0 %v2226_v10  ;;  %2121 = vmatpush1.bf16.msra.mxu1 %v2226_v10  ;;  %v2318_v8 = vld [vmem:[%s2500_s9 + $0x1d0] ss:$8 sps:$4 sm:$0xff]   ;;  %v2319_v9 = vld [vmem:[%s2500_s9 + $0xe4] ss:$8 sps:$4 sm:$0xff]  }
  0x29   : > { %736 = vmatprep.subr.bf16.mxu0 %v2419_v1  ;;  %2106 = vmatprep.subr.bf16.mxu1 %v2419_v1  ;;  %v2321_v10 = vld [vmem:[%s2500_s9 + $0x1e4] ss:$8 sps:$4 sm:$0xff]  }
  0x2c   : > { %737 = vmatpush1.bf16.msra.mxu0 %v2227_v11  ;;  %2122 = vmatpush1.bf16.msra.mxu1 %v2227_v11  ;;  %v2323_v11 = vld [vmem:[%s2500_s9 + $0xe0] ss:$8 sps:$4 sm:$0xff]  }
  0x2d   : > { %738 = vmatprep.subr.bf16.mxu0 %v2419_v1  ;;  %2107 = vmatprep.subr.bf16.mxu1 %v2419_v1 }
  0x30   : > { %739 = vmatpush1.bf16.msra.mxu0 %v2228_v12  ;;  %2123 = vmatpush1.bf16.msra.mxu1 %v2228_v12  ;;  %v2324_v12 = vld [vmem:[%s2500_s9 + $0x1e0] ss:$8 sps:$4 sm:$0xff]  }
  0x31   : > { %740 = vmatprep.subr.bf16.mxu0 %v2419_v1  ;;  %2108 = vmatprep.subr.bf16.mxu1 %v2419_v1 }
  0x34   : > { %741 = vmatpush1.bf16.msra.mxu0 %v2229_v13  ;;  %2124 = vmatpush1.bf16.msra.mxu1 %v2229_v13  ;;  %v2325_v13 = vld [vmem:[%s2500_s9 + $0xf4] ss:$8 sps:$4 sm:$0xff]  }
  0x35   : > { %742 = vmatprep.subr.bf16.mxu0 %v2419_v1  ;;  %2109 = vmatprep.subr.bf16.mxu1 %v2419_v1 }
  0x38   : > { %743 = vmatpush1.bf16.msra.mxu0 %v2230_v14  ;;  %2125 = vmatpush1.bf16.msra.mxu1 %v2230_v14  ;;  %v2327_v14 = vld [vmem:[%s2500_s9 + $0x1f4] ss:$8 sps:$4 sm:$0xff]  }
  0x39   : > { %744 = vmatprep.subr.bf16.mxu0 %v2419_v1  ;;  %2110 = vmatprep.subr.bf16.mxu1 %v2419_v1 }
  0x3c   : > { %745 = vmatpush1.bf16.msra.mxu0 %v2231_v15  ;;  %2126 = vmatpush1.bf16.msra.mxu1 %v2231_v15  ;;  %v2329_v15 = vld [vmem:[%s2500_s9 + $0xf0] ss:$8 sps:$4 sm:$0xff]  }
  0x3d   : > { %746 = vmatprep.subr.bf16.mxu0 %v2419_v1  ;;  %2111 = vmatprep.subr.bf16.mxu1 %v2419_v1 }
  0x40   : > { %747 = vmatpush1.bf16.msra.mxu0 %v2232_v16  ;;  %2127 = vmatpush1.bf16.msra.mxu1 %v2232_v16  ;;  %v2330_v16 = vld [vmem:[%s2500_s9 + $0x1f0] ss:$8 sps:$4 sm:$0xff]  }
  0x41   : > { %748 = vmatprep.subr.bf16.mxu0 %v2419_v1  ;;  %2112 = vmatprep.subr.bf16.mxu1 %v2419_v1 }
  0x44   : > { %749 = vmatpush1.bf16.msra.mxu0 %v2233_v17  ;;  %2128 = vmatpush1.bf16.msra.mxu1 %v2233_v17  ;;  %v2627_v17 = vld [vmem:[%s3024_s2] ss:$0 sm:$0xff] }
  0x45   : > { %750 = vmatprep.subr.bf16.mxu0 %v2419_v1  ;;  %2113 = vmatprep.subr.bf16.mxu1 %v2419_v1  ;;  %v2307_v1 = vld [vmem:[%s2500_s9 + $0xc4] ss:$8 sps:$4 sm:$0xff]   ;;  %s1402_s9 = ssub.s32 (%p2465_p4), 100, %s2475_s23 }
  0x46   : > { %p1403_p8 = scmp.lt.s32.totalorder (%p2465_p4), %s1402_s9, 64 }
  0x48   : > { %751 = vmatpush1.bf16.msra.mxu0 %v2234_v18  ;;  %2129 = vmatpush1.bf16.msra.mxu1 %v2234_v18 }
  0x4b   : > { %753 = vmatmul.mubr.bf16.vlgmr.msra.gmra.mrb[0].mxu0 %v2235_v19  ;;  %881 = vmatmul.mubr.bf16.vlgmr.msra.gmra.mrb[0].mxu1 %v2238_v20 }
  0x4c   : > { %760 = vmatprep.mubr.bf16.mxu0 %v2241_v21  ;;  %888 = vmatprep.mubr.bf16.mxu1 %v2243_v22 }
  0x53   : > { %761 = vmatmul.mubr.bf16.gmra.mrb[4].mxu0 %v2245_v23  ;;  %889 = vmatmul.mubr.bf16.gmra.mrb[4].mxu1 %v2246_v24 }
  0x54   : > { %768 = vmatprep.mubr.bf16.mxu0 %v2247_v25  ;;  %896 = vmatprep.mubr.bf16.mxu1 %v2249_v26 }
  0x5b   : > { %769 = vmatmul.mubr.bf16.gmra.mrb[8].mxu0 %v2251_v27  ;;  %897 = vmatmul.mubr.bf16.gmra.mrb[8].mxu1 %v2252_v28 }
  0x5c   : > { %776 = vmatprep.mubr.bf16.mxu0 %v2253_v29  ;;  %904 = vmatprep.mubr.bf16.mxu1 %v2255_v30 }
  0x63   : > { %777 = vmatmul.mubr.bf16.gmra.mrb[12].mxu0 %v2257_v31  ;;  %905 = vmatmul.mubr.bf16.gmra.mrb[12].mxu1 %v2258_v32 }
  0x64   : > { %784 = vmatprep.mubr.bf16.mxu0 %v2259_v33  ;;  %912 = vmatprep.mubr.bf16.mxu1 %v2261_v34 }
  0x6b   : > { %785 = vmatmul.mubr.bf16.gmra.mrb[16].mxu0 %v2263_v35  ;;  %913 = vmatmul.mubr.bf16.gmra.mrb[16].mxu1 %v2264_v36 }
  0x6c   : > { %792 = vmatprep.mubr.bf16.mxu0 %v2265_v37  ;;  %920 = vmatprep.mubr.bf16.mxu1 %v2267_v38 }
  0x73   : > { %793 = vmatmul.mubr.bf16.gmra.mrb[20].mxu0 %v2269_v39  ;;  %921 = vmatmul.mubr.bf16.gmra.mrb[20].mxu1 %v2270_v40 }
  0x74   : > { %800 = vmatprep.mubr.bf16.mxu0 %v2271_v41  ;;  %928 = vmatprep.mubr.bf16.mxu1 %v2273_v42 }
  0x7b   : > { %801 = vmatmul.mubr.bf16.gmra.mrb[24].mxu0 %v2275_v43  ;;  %929 = vmatmul.mubr.bf16.gmra.mrb[24].mxu1 %v2276_v44 }
  0x7c   : > { %808 = vmatprep.mubr.bf16.mxu0 %v2277_v45  ;;  %936 = vmatprep.mubr.bf16.mxu1 %v2279_v46 }
  0x83   : > { %809 = vmatmul.mubr.bf16.gmra.mrb[28].mxu0 %v2281_v47  ;;  %937 = vmatmul.mubr.bf16.gmra.mrb[28].mxu1 %v2282_v48 }
  0x84   : > { %816 = vmatprep.mubr.bf16.mxu0 %v2283_v49  ;;  %944 = vmatprep.mubr.bf16.mxu1 %v2285_v50 }
  0x8b   : > { %817 = vmatmul.mubr.bf16.gmra.mrb[32].mxu0 %v2287_v51  ;;  %945 = vmatmul.mubr.bf16.gmra.mrb[32].mxu1 %v2288_v52 }
  0x8c   : > { %824 = vmatprep.mubr.bf16.mxu0 %v2289_v53  ;;  %952 = vmatprep.mubr.bf16.mxu1 %v2291_v54 }
  0x93   : > { %825 = vmatmul.mubr.bf16.gmra.mrb[36].mxu0 %v2293_v55  ;;  %953 = vmatmul.mubr.bf16.gmra.mrb[36].mxu1 %v2294_v56 }
  0x94   : > { %832 = vmatprep.mubr.bf16.mxu0 %v2295_v57  ;;  %960 = vmatprep.mubr.bf16.mxu1 %v2297_v58 }
  0x9b   : > { %833 = vmatmul.mubr.bf16.gmra.mrb[40].mxu0 %v2299_v59  ;;  %961 = vmatmul.mubr.bf16.gmra.mrb[40].mxu1 %v2300_v60 }
  0x9c   : > { %840 = vmatprep.mubr.bf16.mxu0 %v2301_v61  ;;  %968 = vmatprep.mubr.bf16.mxu1 %v2303_v62 }
  0xa3   : > { %841 = vmatmul.mubr.bf16.gmra.mrb[44].mxu0 %v2305_v63  ;;  %969 = vmatmul.mubr.bf16.gmra.mrb[44].mxu1 %v2306_v0 }
  0xa4   : > { %848 = vmatprep.mubr.bf16.mxu0 %v2307_v1  ;;  %976 = vmatprep.mubr.bf16.mxu1 %v2309_v2 }
  0xab   : > { %849 = vmatmul.mubr.bf16.gmra.mrb[48].mxu0 %v2311_v3  ;;  %977 = vmatmul.mubr.bf16.gmra.mrb[48].mxu1 %v2312_v4 }
  0xac   : > { %856 = vmatprep.mubr.bf16.mxu0 %v2313_v5  ;;  %984 = vmatprep.mubr.bf16.mxu1 %v2315_v6 }
  0xb3   : > { %857 = vmatmul.mubr.bf16.gmra.mrb[52].mxu0 %v2317_v7  ;;  %985 = vmatmul.mubr.bf16.gmra.mrb[52].mxu1 %v2318_v8 }
  0xb4   : > { %864 = vmatprep.mubr.bf16.mxu0 %v2319_v9  ;;  %992 = vmatprep.mubr.bf16.mxu1 %v2321_v10 }
  0xbb   : > { %865 = vmatmul.mubr.bf16.gmra.mrb[56].mxu0 %v2323_v11  ;;  %993 = vmatmul.mubr.bf16.gmra.mrb[56].mxu1 %v2324_v12 }
  0xbc   : > { %872 = vmatprep.mubr.bf16.mxu0 %v2325_v13  ;;  %1000 = vmatprep.mubr.bf16.mxu1 %v2327_v14 }
  0xc3   : > { %873 = vmatmul.mubr.bf16.gmra.mrb[60].mxu0 %v2329_v15  ;;  %1001 = vmatmul.mubr.bf16.gmra.mrb[60].mxu1 %v2330_v16 }
 0x11e   : > { %v754_v18 = vpop.f32.mrb[0].mxu0  ;;  %v882_v19 = vpop.f32.mrb[0].mxu1 }
 0x11f   : > { %v755_v20 = vadd.f32 %v2627_v17, %v754_v18  ;;  %v883_v21 = vadd.f32 %v2627_v17, %v882_v19  ;;  %v756_v22 = vpop.f32.mrb[1].mxu0  ;;  %v884_v23 = vpop.f32.mrb[1].mxu1 }
 0x120   : > { %v757_v24 = vpop.f32.mrb[2].mxu0  ;;  %v885_v25 = vpop.f32.mrb[2].mxu1 }
 0x121   : > { %v1009_v26 = vmax.f32 %v755_v20, 0.0  ;;  %v1041_v27 = vmax.f32 %v883_v21, 0.0  ;;  %v758_v28 = vadd.f32 %v2627_v17, %v757_v24  ;;  %v886_v29 = vadd.f32 %v2627_v17, %v885_v25  ;;  %v759_v30 = vpop.f32.mrb[3].mxu0  ;;  %v887_v31 = vpop.f32.mrb[3].mxu1 }
 0x123   : > { %v2031_v32 = vpack.c.bf16 %v1009_v26, %v1009_v26  ;;  %v2063_v33 = vpack.c.bf16 %v1041_v27, %v1041_v27  ;;  %v1010_v34 = vmax.f32 %v758_v28, 0.0  ;;  %v1042_v35 = vmax.f32 %v886_v29, 0.0 }
 0x125   : > { %1330 = vst.msk [vmem:[%s2633_s12] sm:$0xf] %vm1329_vm0, %v2031_v32  ;;  %1362 = vst.msk [vmem:[%s2633_s12 + $0x80] sm:$0xf] %vm1329_vm0, %v2063_v33  ;;  %v2032_v36 = vpack.c.bf16 %v1010_v34, %v1010_v34  ;;  %v2064_v37 = vpack.c.bf16 %v1042_v35, %v1042_v35 }
 0x126   : > { %v762_v38 = vpop.f32.mrb[4].mxu0  ;;  %v890_v39 = vpop.f32.mrb[4].mxu1 }
 0x127   : > { %1331 = vst.msk [vmem:[%s2633_s12 + $0x4] sm:$0xf] %vm1329_vm0, %v2032_v36  ;;  %1363 = vst.msk [vmem:[%s2633_s12 + $0x84] sm:$0xf] %vm1329_vm0, %v2064_v37  ;;  %v763_v40 = vadd.f32 %v2627_v17, %v762_v38  ;;  %v891_v41 = vadd.f32 %v2627_v17, %v890_v39  ;;  %v764_v42 = vpop.f32.mrb[5].mxu0  ;;  %v892_v43 = vpop.f32.mrb[5].mxu1 }
 0x128   : > { %v765_v44 = vpop.f32.mrb[6].mxu0  ;;  %v893_v45 = vpop.f32.mrb[6].mxu1 }
 0x129   : > { %v1011_v46 = vmax.f32 %v763_v40, 0.0  ;;  %v1043_v47 = vmax.f32 %v891_v41, 0.0  ;;  %v766_v48 = vadd.f32 %v2627_v17, %v765_v44  ;;  %v894_v49 = vadd.f32 %v2627_v17, %v893_v45  ;;  %v767_v50 = vpop.f32.mrb[7].mxu0  ;;  %v895_v51 = vpop.f32.mrb[7].mxu1 }
 0x12b   : > { %v2033_v52 = vpack.c.bf16 %v1011_v46, %v1011_v46  ;;  %v2065_v53 = vpack.c.bf16 %v1043_v47, %v1043_v47  ;;  %v1012_v54 = vmax.f32 %v766_v48, 0.0  ;;  %v1044_v55 = vmax.f32 %v894_v49, 0.0 }
 0x12d   : > { %1332 = vst.msk [vmem:[%s2633_s12 + $0x8] sm:$0xf] %vm1329_vm0, %v2033_v52  ;;  %1364 = vst.msk [vmem:[%s2633_s12 + $0x88] sm:$0xf] %vm1329_vm0, %v2065_v53  ;;  %v2034_v56 = vpack.c.bf16 %v1012_v54, %v1012_v54  ;;  %v2066_v57 = vpack.c.bf16 %v1044_v55, %v1044_v55 }
 0x12e   : > { %v770_v58 = vpop.f32.mrb[8].mxu0  ;;  %v898_v59 = vpop.f32.mrb[8].mxu1 }
 0x12f   : > { %1333 = vst.msk [vmem:[%s2633_s12 + $0xc] sm:$0xf] %vm1329_vm0, %v2034_v56  ;;  %1365 = vst.msk [vmem:[%s2633_s12 + $0x8c] sm:$0xf] %vm1329_vm0, %v2066_v57  ;;  %v771_v60 = vadd.f32 %v2627_v17, %v770_v58  ;;  %v899_v61 = vadd.f32 %v2627_v17, %v898_v59  ;;  %v772_v62 = vpop.f32.mrb[9].mxu0  ;;  %v900_v63 = vpop.f32.mrb[9].mxu1 }
 0x130   : > { %v773_v0 = vpop.f32.mrb[10].mxu0  ;;  %v901_v1 = vpop.f32.mrb[10].mxu1 }
 0x131   : > { %v1013_v2 = vmax.f32 %v771_v60, 0.0  ;;  %v1045_v3 = vmax.f32 %v899_v61, 0.0  ;;  %v774_v4 = vadd.f32 %v2627_v17, %v773_v0  ;;  %v902_v5 = vadd.f32 %v2627_v17, %v901_v1  ;;  %v775_v6 = vpop.f32.mrb[11].mxu0  ;;  %v903_v7 = vpop.f32.mrb[11].mxu1 }
 0x133   : > { %v2035_v8 = vpack.c.bf16 %v1013_v2, %v1013_v2  ;;  %v2067_v9 = vpack.c.bf16 %v1045_v3, %v1045_v3  ;;  %v1014_v10 = vmax.f32 %v774_v4, 0.0  ;;  %v1046_v11 = vmax.f32 %v902_v5, 0.0 }
 0x135   : > { %1334 = vst.msk [vmem:[%s2633_s12 + $0x10] sm:$0xf] %vm1329_vm0, %v2035_v8  ;;  %1366 = vst.msk [vmem:[%s2633_s12 + $0x90] sm:$0xf] %vm1329_vm0, %v2067_v9  ;;  %v2036_v12 = vpack.c.bf16 %v1014_v10, %v1014_v10  ;;  %v2068_v13 = vpack.c.bf16 %v1046_v11, %v1046_v11 }
 0x136   : > { %v778_v14 = vpop.f32.mrb[12].mxu0  ;;  %v906_v15 = vpop.f32.mrb[12].mxu1 }
 0x137   : > { %1335 = vst.msk [vmem:[%s2633_s12 + $0x14] sm:$0xf] %vm1329_vm0, %v2036_v12  ;;  %1367 = vst.msk [vmem:[%s2633_s12 + $0x94] sm:$0xf] %vm1329_vm0, %v2068_v13  ;;  %v779_v16 = vadd.f32 %v2627_v17, %v778_v14  ;;  %v907_v18 = vadd.f32 %v2627_v17, %v906_v15  ;;  %v780_v19 = vpop.f32.mrb[13].mxu0  ;;  %v908_v20 = vpop.f32.mrb[13].mxu1 }
 0x138   : > { %v781_v21 = vpop.f32.mrb[14].mxu0  ;;  %v909_v22 = vpop.f32.mrb[14].mxu1 }
 0x139   : > { %v1015_v23 = vmax.f32 %v779_v16, 0.0  ;;  %v1047_v24 = vmax.f32 %v907_v18, 0.0  ;;  %v782_v25 = vadd.f32 %v2627_v17, %v781_v21  ;;  %v910_v26 = vadd.f32 %v2627_v17, %v909_v22  ;;  %v783_v27 = vpop.f32.mrb[15].mxu0  ;;  %v911_v28 = vpop.f32.mrb[15].mxu1 }
 0x13b   : > { %v2037_v29 = vpack.c.bf16 %v1015_v23, %v1015_v23  ;;  %v2069_v30 = vpack.c.bf16 %v1047_v24, %v1047_v24  ;;  %v1016_v31 = vmax.f32 %v782_v25, 0.0  ;;  %v1048_v32 = vmax.f32 %v910_v26, 0.0 }
 0x13d   : > { %1336 = vst.msk [vmem:[%s2633_s12 + $0x18] sm:$0xf] %vm1329_vm0, %v2037_v29  ;;  %1368 = vst.msk [vmem:[%s2633_s12 + $0x98] sm:$0xf] %vm1329_vm0, %v2069_v30  ;;  %v2038_v33 = vpack.c.bf16 %v1016_v31, %v1016_v31  ;;  %v2070_v34 = vpack.c.bf16 %v1048_v32, %v1048_v32 }
 0x13e   : > { %v786_v35 = vpop.f32.mrb[16].mxu0  ;;  %v914_v36 = vpop.f32.mrb[16].mxu1 }
 0x13f   : > { %1337 = vst.msk [vmem:[%s2633_s12 + $0x1c] sm:$0xf] %vm1329_vm0, %v2038_v33  ;;  %1369 = vst.msk [vmem:[%s2633_s12 + $0x9c] sm:$0xf] %vm1329_vm0, %v2070_v34  ;;  %v787_v37 = vadd.f32 %v2627_v17, %v786_v35  ;;  %v915_v38 = vadd.f32 %v2627_v17, %v914_v36  ;;  %v788_v39 = vpop.f32.mrb[17].mxu0  ;;  %v916_v40 = vpop.f32.mrb[17].mxu1 }
 0x140   : > { %v789_v41 = vpop.f32.mrb[18].mxu0  ;;  %v917_v42 = vpop.f32.mrb[18].mxu1 }
 0x141   : > { %v1017_v43 = vmax.f32 %v787_v37, 0.0  ;;  %v1049_v44 = vmax.f32 %v915_v38, 0.0  ;;  %v790_v45 = vadd.f32 %v2627_v17, %v789_v41  ;;  %v918_v46 = vadd.f32 %v2627_v17, %v917_v42  ;;  %v791_v47 = vpop.f32.mrb[19].mxu0  ;;  %v919_v48 = vpop.f32.mrb[19].mxu1 }
 0x143   : > { %v2039_v49 = vpack.c.bf16 %v1017_v43, %v1017_v43  ;;  %v2071_v50 = vpack.c.bf16 %v1049_v44, %v1049_v44  ;;  %v1018_v51 = vmax.f32 %v790_v45, 0.0  ;;  %v1050_v52 = vmax.f32 %v918_v46, 0.0 }
 0x145   : > { %1338 = vst.msk [vmem:[%s2633_s12 + $0x20] sm:$0xf] %vm1329_vm0, %v2039_v49  ;;  %1370 = vst.msk [vmem:[%s2633_s12 + $0xa0] sm:$0xf] %vm1329_vm0, %v2071_v50  ;;  %v2040_v53 = vpack.c.bf16 %v1018_v51, %v1018_v51  ;;  %v2072_v54 = vpack.c.bf16 %v1050_v52, %v1050_v52 }
 0x146   : > { %v794_v55 = vpop.f32.mrb[20].mxu0  ;;  %v922_v56 = vpop.f32.mrb[20].mxu1 }
 0x147   : > { %1339 = vst.msk [vmem:[%s2633_s12 + $0x24] sm:$0xf] %vm1329_vm0, %v2040_v53  ;;  %1371 = vst.msk [vmem:[%s2633_s12 + $0xa4] sm:$0xf] %vm1329_vm0, %v2072_v54  ;;  %v795_v57 = vadd.f32 %v2627_v17, %v794_v55  ;;  %v923_v58 = vadd.f32 %v2627_v17, %v922_v56  ;;  %v796_v59 = vpop.f32.mrb[21].mxu0  ;;  %v924_v60 = vpop.f32.mrb[21].mxu1 }
 0x148   : > { %v797_v61 = vpop.f32.mrb[22].mxu0  ;;  %v925_v62 = vpop.f32.mrb[22].mxu1 }
 0x149   : > { %v1019_v63 = vmax.f32 %v795_v57, 0.0  ;;  %v1051_v0 = vmax.f32 %v923_v58, 0.0  ;;  %v798_v1 = vadd.f32 %v2627_v17, %v797_v61  ;;  %v926_v2 = vadd.f32 %v2627_v17, %v925_v62  ;;  %v799_v3 = vpop.f32.mrb[23].mxu0  ;;  %v927_v4 = vpop.f32.mrb[23].mxu1 }
 0x14b   : > { %v2041_v5 = vpack.c.bf16 %v1019_v63, %v1019_v63  ;;  %v2073_v6 = vpack.c.bf16 %v1051_v0, %v1051_v0  ;;  %v1020_v7 = vmax.f32 %v798_v1, 0.0  ;;  %v1052_v8 = vmax.f32 %v926_v2, 0.0 }
 0x14d   : > { %1340 = vst.msk [vmem:[%s2633_s12 + $0x28] sm:$0xf] %vm1329_vm0, %v2041_v5  ;;  %1372 = vst.msk [vmem:[%s2633_s12 + $0xa8] sm:$0xf] %vm1329_vm0, %v2073_v6  ;;  %v2042_v9 = vpack.c.bf16 %v1020_v7, %v1020_v7  ;;  %v2074_v10 = vpack.c.bf16 %v1052_v8, %v1052_v8 }
 0x14e   : > { %v802_v11 = vpop.f32.mrb[24].mxu0  ;;  %v930_v12 = vpop.f32.mrb[24].mxu1 }
 0x14f   : > { %1341 = vst.msk [vmem:[%s2633_s12 + $0x2c] sm:$0xf] %vm1329_vm0, %v2042_v9  ;;  %1373 = vst.msk [vmem:[%s2633_s12 + $0xac] sm:$0xf] %vm1329_vm0, %v2074_v10  ;;  %v803_v13 = vadd.f32 %v2627_v17, %v802_v11  ;;  %v931_v14 = vadd.f32 %v2627_v17, %v930_v12  ;;  %v804_v15 = vpop.f32.mrb[25].mxu0  ;;  %v932_v16 = vpop.f32.mrb[25].mxu1 }
 0x150   : > { %v805_v18 = vpop.f32.mrb[26].mxu0  ;;  %v933_v19 = vpop.f32.mrb[26].mxu1 }
 0x151   : > { %v1021_v20 = vmax.f32 %v803_v13, 0.0  ;;  %v1053_v21 = vmax.f32 %v931_v14, 0.0  ;;  %v806_v22 = vadd.f32 %v2627_v17, %v805_v18  ;;  %v934_v23 = vadd.f32 %v2627_v17, %v933_v19  ;;  %v807_v24 = vpop.f32.mrb[27].mxu0  ;;  %v935_v25 = vpop.f32.mrb[27].mxu1 }
 0x153   : > { %v2043_v26 = vpack.c.bf16 %v1021_v20, %v1021_v20  ;;  %v2075_v27 = vpack.c.bf16 %v1053_v21, %v1053_v21  ;;  %v1022_v28 = vmax.f32 %v806_v22, 0.0  ;;  %v1054_v29 = vmax.f32 %v934_v23, 0.0 }
 0x155   : > { %1342 = vst.msk [vmem:[%s2633_s12 + $0x30] sm:$0xf] %vm1329_vm0, %v2043_v26  ;;  %1374 = vst.msk [vmem:[%s2633_s12 + $0xb0] sm:$0xf] %vm1329_vm0, %v2075_v27  ;;  %v2044_v30 = vpack.c.bf16 %v1022_v28, %v1022_v28  ;;  %v2076_v31 = vpack.c.bf16 %v1054_v29, %v1054_v29 }
 0x156   : > { %v810_v32 = vpop.f32.mrb[28].mxu0  ;;  %v938_v33 = vpop.f32.mrb[28].mxu1 }
 0x157   : > { %1343 = vst.msk [vmem:[%s2633_s12 + $0x34] sm:$0xf] %vm1329_vm0, %v2044_v30  ;;  %1375 = vst.msk [vmem:[%s2633_s12 + $0xb4] sm:$0xf] %vm1329_vm0, %v2076_v31  ;;  %v811_v34 = vadd.f32 %v2627_v17, %v810_v32  ;;  %v939_v35 = vadd.f32 %v2627_v17, %v938_v33  ;;  %v812_v36 = vpop.f32.mrb[29].mxu0  ;;  %v940_v37 = vpop.f32.mrb[29].mxu1 }
 0x158   : > { %v813_v38 = vpop.f32.mrb[30].mxu0  ;;  %v941_v39 = vpop.f32.mrb[30].mxu1 }
 0x159   : > { %v1023_v40 = vmax.f32 %v811_v34, 0.0  ;;  %v1055_v41 = vmax.f32 %v939_v35, 0.0  ;;  %v814_v42 = vadd.f32 %v2627_v17, %v813_v38  ;;  %v942_v43 = vadd.f32 %v2627_v17, %v941_v39  ;;  %v815_v44 = vpop.f32.mrb[31].mxu0  ;;  %v943_v45 = vpop.f32.mrb[31].mxu1 }
 0x15b   : > { %v2045_v46 = vpack.c.bf16 %v1023_v40, %v1023_v40  ;;  %v2077_v47 = vpack.c.bf16 %v1055_v41, %v1055_v41  ;;  %v1024_v48 = vmax.f32 %v814_v42, 0.0  ;;  %v1056_v49 = vmax.f32 %v942_v43, 0.0 }
 0x15d   : > { %1344 = vst.msk [vmem:[%s2633_s12 + $0x38] sm:$0xf] %vm1329_vm0, %v2045_v46  ;;  %1376 = vst.msk [vmem:[%s2633_s12 + $0xb8] sm:$0xf] %vm1329_vm0, %v2077_v47  ;;  %v2046_v50 = vpack.c.bf16 %v1024_v48, %v1024_v48  ;;  %v2078_v51 = vpack.c.bf16 %v1056_v49, %v1056_v49 }
 0x15e   : > { %v818_v52 = vpop.f32.mrb[32].mxu0  ;;  %v946_v53 = vpop.f32.mrb[32].mxu1 }
 0x15f   : > { %1345 = vst.msk [vmem:[%s2633_s12 + $0x3c] sm:$0xf] %vm1329_vm0, %v2046_v50  ;;  %1377 = vst.msk [vmem:[%s2633_s12 + $0xbc] sm:$0xf] %vm1329_vm0, %v2078_v51  ;;  %v819_v54 = vadd.f32 %v2627_v17, %v818_v52  ;;  %v947_v55 = vadd.f32 %v2627_v17, %v946_v53  ;;  %v820_v56 = vpop.f32.mrb[33].mxu0  ;;  %v948_v57 = vpop.f32.mrb[33].mxu1 }
 0x160   : > { %v821_v58 = vpop.f32.mrb[34].mxu0  ;;  %v949_v59 = vpop.f32.mrb[34].mxu1 }
 0x161   : > { %v1025_v60 = vmax.f32 %v819_v54, 0.0  ;;  %v1057_v61 = vmax.f32 %v947_v55, 0.0  ;;  %v822_v62 = vadd.f32 %v2627_v17, %v821_v58  ;;  %v950_v63 = vadd.f32 %v2627_v17, %v949_v59  ;;  %v823_v0 = vpop.f32.mrb[35].mxu0  ;;  %v951_v1 = vpop.f32.mrb[35].mxu1 }
 0x163   : > { %v2047_v2 = vpack.c.bf16 %v1025_v60, %v1025_v60  ;;  %v2079_v3 = vpack.c.bf16 %v1057_v61, %v1057_v61  ;;  %v1026_v4 = vmax.f32 %v822_v62, 0.0  ;;  %v1058_v5 = vmax.f32 %v950_v63, 0.0 }
 0x165   : > { %1346 = vst.msk [vmem:[%s2633_s12 + $0x40] sm:$0xf] %vm1329_vm0, %v2047_v2  ;;  %1378 = vst.msk [vmem:[%s2633_s12 + $0xc0] sm:$0xf] %vm1329_vm0, %v2079_v3  ;;  %v2048_v6 = vpack.c.bf16 %v1026_v4, %v1026_v4  ;;  %v2080_v7 = vpack.c.bf16 %v1058_v5, %v1058_v5 }
 0x166   : > { %v826_v8 = vpop.f32.mrb[36].mxu0  ;;  %v954_v9 = vpop.f32.mrb[36].mxu1 }
 0x167   : > { %1347 = vst.msk [vmem:[%s2633_s12 + $0x44] sm:$0xf] %vm1329_vm0, %v2048_v6  ;;  %1379 = vst.msk [vmem:[%s2633_s12 + $0xc4] sm:$0xf] %vm1329_vm0, %v2080_v7  ;;  %v827_v10 = vadd.f32 %v2627_v17, %v826_v8  ;;  %v955_v11 = vadd.f32 %v2627_v17, %v954_v9  ;;  %v828_v12 = vpop.f32.mrb[37].mxu0  ;;  %v956_v13 = vpop.f32.mrb[37].mxu1 }
 0x168   : > { %v829_v14 = vpop.f32.mrb[38].mxu0  ;;  %v957_v15 = vpop.f32.mrb[38].mxu1 }
 0x169   : > { %v1027_v16 = vmax.f32 %v827_v10, 0.0  ;;  %v1059_v18 = vmax.f32 %v955_v11, 0.0  ;;  %v830_v19 = vadd.f32 %v2627_v17, %v829_v14  ;;  %v958_v20 = vadd.f32 %v2627_v17, %v957_v15  ;;  %v831_v21 = vpop.f32.mrb[39].mxu0  ;;  %v959_v22 = vpop.f32.mrb[39].mxu1 }
 0x16b   : > { %v2049_v23 = vpack.c.bf16 %v1027_v16, %v1027_v16  ;;  %v2081_v24 = vpack.c.bf16 %v1059_v18, %v1059_v18  ;;  %v1028_v25 = vmax.f32 %v830_v19, 0.0  ;;  %v1060_v26 = vmax.f32 %v958_v20, 0.0 }
 0x16d   : > { %1348 = vst.msk [vmem:[%s2633_s12 + $0x48] sm:$0xf] %vm1329_vm0, %v2049_v23  ;;  %1380 = vst.msk [vmem:[%s2633_s12 + $0xc8] sm:$0xf] %vm1329_vm0, %v2081_v24  ;;  %v2050_v27 = vpack.c.bf16 %v1028_v25, %v1028_v25  ;;  %v2082_v28 = vpack.c.bf16 %v1060_v26, %v1060_v26 }
 0x16e   : > { %v834_v29 = vpop.f32.mrb[40].mxu0  ;;  %v962_v30 = vpop.f32.mrb[40].mxu1 }
 0x16f   : > { %1349 = vst.msk [vmem:[%s2633_s12 + $0x4c] sm:$0xf] %vm1329_vm0, %v2050_v27  ;;  %1381 = vst.msk [vmem:[%s2633_s12 + $0xcc] sm:$0xf] %vm1329_vm0, %v2082_v28  ;;  %v835_v31 = vadd.f32 %v2627_v17, %v834_v29  ;;  %v963_v32 = vadd.f32 %v2627_v17, %v962_v30  ;;  %v836_v33 = vpop.f32.mrb[41].mxu0  ;;  %v964_v34 = vpop.f32.mrb[41].mxu1 }
 0x170   : > { %v837_v35 = vpop.f32.mrb[42].mxu0  ;;  %v965_v36 = vpop.f32.mrb[42].mxu1 }
 0x171   : > { %v1029_v37 = vmax.f32 %v835_v31, 0.0  ;;  %v1061_v38 = vmax.f32 %v963_v32, 0.0  ;;  %v838_v39 = vadd.f32 %v2627_v17, %v837_v35  ;;  %v966_v40 = vadd.f32 %v2627_v17, %v965_v36  ;;  %v839_v41 = vpop.f32.mrb[43].mxu0  ;;  %v967_v42 = vpop.f32.mrb[43].mxu1 }
 0x173   : > { %v2051_v43 = vpack.c.bf16 %v1029_v37, %v1029_v37  ;;  %v2083_v44 = vpack.c.bf16 %v1061_v38, %v1061_v38  ;;  %v1030_v45 = vmax.f32 %v838_v39, 0.0  ;;  %v1062_v46 = vmax.f32 %v966_v40, 0.0 }
 0x175   : > { %1350 = vst.msk [vmem:[%s2633_s12 + $0x50] sm:$0xf] %vm1329_vm0, %v2051_v43  ;;  %1382 = vst.msk [vmem:[%s2633_s12 + $0xd0] sm:$0xf] %vm1329_vm0, %v2083_v44  ;;  %v2052_v47 = vpack.c.bf16 %v1030_v45, %v1030_v45  ;;  %v2084_v48 = vpack.c.bf16 %v1062_v46, %v1062_v46 }
 0x176   : > { %v842_v49 = vpop.f32.mrb[44].mxu0  ;;  %v970_v50 = vpop.f32.mrb[44].mxu1 }
 0x177   : > { %1351 = vst.msk [vmem:[%s2633_s12 + $0x54] sm:$0xf] %vm1329_vm0, %v2052_v47  ;;  %1383 = vst.msk [vmem:[%s2633_s12 + $0xd4] sm:$0xf] %vm1329_vm0, %v2084_v48  ;;  %v843_v51 = vadd.f32 %v2627_v17, %v842_v49  ;;  %v971_v52 = vadd.f32 %v2627_v17, %v970_v50  ;;  %v844_v53 = vpop.f32.mrb[45].mxu0  ;;  %v972_v54 = vpop.f32.mrb[45].mxu1 }
 0x178   : > { %v845_v55 = vpop.f32.mrb[46].mxu0  ;;  %v973_v56 = vpop.f32.mrb[46].mxu1 }
 0x179   : > { %v1031_v57 = vmax.f32 %v843_v51, 0.0  ;;  %v1063_v58 = vmax.f32 %v971_v52, 0.0  ;;  %v846_v59 = vadd.f32 %v2627_v17, %v845_v55  ;;  %v974_v60 = vadd.f32 %v2627_v17, %v973_v56  ;;  %v847_v61 = vpop.f32.mrb[47].mxu0  ;;  %v975_v62 = vpop.f32.mrb[47].mxu1 }
 0x17b   : > { %v2053_v63 = vpack.c.bf16 %v1031_v57, %v1031_v57  ;;  %v2085_v0 = vpack.c.bf16 %v1063_v58, %v1063_v58  ;;  %v1032_v1 = vmax.f32 %v846_v59, 0.0  ;;  %v1064_v2 = vmax.f32 %v974_v60, 0.0 }
 0x17d   : > { %1352 = vst.msk [vmem:[%s2633_s12 + $0x58] sm:$0xf] %vm1329_vm0, %v2053_v63  ;;  %1384 = vst.msk [vmem:[%s2633_s12 + $0xd8] sm:$0xf] %vm1329_vm0, %v2085_v0  ;;  %v2054_v3 = vpack.c.bf16 %v1032_v1, %v1032_v1  ;;  %v2086_v4 = vpack.c.bf16 %v1064_v2, %v1064_v2 }
 0x17e   : > { %v850_v5 = vpop.f32.mrb[48].mxu0  ;;  %v978_v6 = vpop.f32.mrb[48].mxu1 }
 0x17f   : > { %1353 = vst.msk [vmem:[%s2633_s12 + $0x5c] sm:$0xf] %vm1329_vm0, %v2054_v3  ;;  %1385 = vst.msk [vmem:[%s2633_s12 + $0xdc] sm:$0xf] %vm1329_vm0, %v2086_v4  ;;  %v851_v7 = vadd.f32 %v2627_v17, %v850_v5  ;;  %v979_v8 = vadd.f32 %v2627_v17, %v978_v6  ;;  %v852_v9 = vpop.f32.mrb[49].mxu0  ;;  %v980_v10 = vpop.f32.mrb[49].mxu1 }
 0x180   : > { %v853_v11 = vpop.f32.mrb[50].mxu0  ;;  %v981_v12 = vpop.f32.mrb[50].mxu1 }
 0x181   : > { %v1033_v13 = vmax.f32 %v851_v7, 0.0  ;;  %v1065_v14 = vmax.f32 %v979_v8, 0.0  ;;  %v854_v15 = vadd.f32 %v2627_v17, %v853_v11  ;;  %v982_v16 = vadd.f32 %v2627_v17, %v981_v12  ;;  %v855_v18 = vpop.f32.mrb[51].mxu0  ;;  %v983_v19 = vpop.f32.mrb[51].mxu1 }
 0x183   : > { %v2055_v20 = vpack.c.bf16 %v1033_v13, %v1033_v13  ;;  %v2087_v21 = vpack.c.bf16 %v1065_v14, %v1065_v14  ;;  %v1034_v22 = vmax.f32 %v854_v15, 0.0  ;;  %v1066_v23 = vmax.f32 %v982_v16, 0.0 }
 0x185   : > { %1354 = vst.msk [vmem:[%s2633_s12 + $0x60] sm:$0xf] %vm1329_vm0, %v2055_v20  ;;  %1386 = vst.msk [vmem:[%s2633_s12 + $0xe0] sm:$0xf] %vm1329_vm0, %v2087_v21  ;;  %v2056_v24 = vpack.c.bf16 %v1034_v22, %v1034_v22  ;;  %v2088_v25 = vpack.c.bf16 %v1066_v23, %v1066_v23 }
 0x186   : > { %v858_v26 = vpop.f32.mrb[52].mxu0  ;;  %v986_v27 = vpop.f32.mrb[52].mxu1 }
 0x187   : > { %1355 = vst.msk [vmem:[%s2633_s12 + $0x64] sm:$0xf] %vm1329_vm0, %v2056_v24  ;;  %1387 = vst.msk [vmem:[%s2633_s12 + $0xe4] sm:$0xf] %vm1329_vm0, %v2088_v25  ;;  %v859_v28 = vadd.f32 %v2627_v17, %v858_v26  ;;  %v987_v29 = vadd.f32 %v2627_v17, %v986_v27  ;;  %v860_v30 = vpop.f32.mrb[53].mxu0  ;;  %v988_v31 = vpop.f32.mrb[53].mxu1 }
 0x188   : > { %v861_v32 = vpop.f32.mrb[54].mxu0  ;;  %v989_v33 = vpop.f32.mrb[54].mxu1 }
 0x189   : > { %v1035_v34 = vmax.f32 %v859_v28, 0.0  ;;  %v1067_v35 = vmax.f32 %v987_v29, 0.0  ;;  %v862_v36 = vadd.f32 %v2627_v17, %v861_v32  ;;  %v990_v37 = vadd.f32 %v2627_v17, %v989_v33  ;;  %v863_v38 = vpop.f32.mrb[55].mxu0  ;;  %v991_v39 = vpop.f32.mrb[55].mxu1 }
 0x18b   : > { %v2057_v40 = vpack.c.bf16 %v1035_v34, %v1035_v34  ;;  %v2089_v41 = vpack.c.bf16 %v1067_v35, %v1067_v35  ;;  %v1036_v42 = vmax.f32 %v862_v36, 0.0  ;;  %v1068_v43 = vmax.f32 %v990_v37, 0.0 }
 0x18d   : > { %1356 = vst.msk [vmem:[%s2633_s12 + $0x68] sm:$0xf] %vm1329_vm0, %v2057_v40  ;;  %1388 = vst.msk [vmem:[%s2633_s12 + $0xe8] sm:$0xf] %vm1329_vm0, %v2089_v41  ;;  %v2058_v44 = vpack.c.bf16 %v1036_v42, %v1036_v42  ;;  %v2090_v45 = vpack.c.bf16 %v1068_v43, %v1068_v43 }
 0x18e   : > { %v866_v46 = vpop.f32.mrb[56].mxu0  ;;  %v994_v47 = vpop.f32.mrb[56].mxu1 }
 0x18f   : > { %1357 = vst.msk [vmem:[%s2633_s12 + $0x6c] sm:$0xf] %vm1329_vm0, %v2058_v44  ;;  %1389 = vst.msk [vmem:[%s2633_s12 + $0xec] sm:$0xf] %vm1329_vm0, %v2090_v45  ;;  %v867_v48 = vadd.f32 %v2627_v17, %v866_v46  ;;  %v995_v49 = vadd.f32 %v2627_v17, %v994_v47  ;;  %v868_v50 = vpop.f32.mrb[57].mxu0  ;;  %v996_v51 = vpop.f32.mrb[57].mxu1 }
 0x190   : > { %v869_v52 = vpop.f32.mrb[58].mxu0  ;;  %v997_v53 = vpop.f32.mrb[58].mxu1 }
 0x191   : > { %v1037_v54 = vmax.f32 %v867_v48, 0.0  ;;  %v1069_v55 = vmax.f32 %v995_v49, 0.0  ;;  %v870_v56 = vadd.f32 %v2627_v17, %v869_v52  ;;  %v998_v57 = vadd.f32 %v2627_v17, %v997_v53  ;;  %v871_v58 = vpop.f32.mrb[59].mxu0  ;;  %v999_v59 = vpop.f32.mrb[59].mxu1 }
 0x193   : > { %v2059_v60 = vpack.c.bf16 %v1037_v54, %v1037_v54  ;;  %v2091_v61 = vpack.c.bf16 %v1069_v55, %v1069_v55  ;;  %v1038_v62 = vmax.f32 %v870_v56, 0.0  ;;  %v1070_v63 = vmax.f32 %v998_v57, 0.0 }
 0x195   : > { %1358 = vst.msk [vmem:[%s2633_s12 + $0x70] sm:$0xf] %vm1329_vm0, %v2059_v60  ;;  %1390 = vst.msk [vmem:[%s2633_s12 + $0xf0] sm:$0xf] %vm1329_vm0, %v2091_v61  ;;  %v2060_v0 = vpack.c.bf16 %v1038_v62, %v1038_v62  ;;  %v2092_v1 = vpack.c.bf16 %v1070_v63, %v1070_v63 }
 0x196   : > { %v874_v2 = vpop.f32.mrb[60].mxu0  ;;  %v1002_v3 = vpop.f32.mrb[60].mxu1 }
 0x197   : > { %1359 = vst.msk [vmem:[%s2633_s12 + $0x74] sm:$0xf] %vm1329_vm0, %v2060_v0  ;;  %1391 = vst.msk [vmem:[%s2633_s12 + $0xf4] sm:$0xf] %vm1329_vm0, %v2092_v1  ;;  %v875_v4 = vadd.f32 %v2627_v17, %v874_v2  ;;  %v1003_v5 = vadd.f32 %v2627_v17, %v1002_v3  ;;  %v876_v6 = vpop.f32.mrb[61].mxu0  ;;  %v1004_v7 = vpop.f32.mrb[61].mxu1 }
 0x198   : > { %v877_v8 = vpop.f32.mrb[62].mxu0  ;;  %v1005_v9 = vpop.f32.mrb[62].mxu1 }
 0x199   : > { %v1039_v10 = vmax.f32 %v875_v4, 0.0  ;;  %v1071_v11 = vmax.f32 %v1003_v5, 0.0  ;;  %v878_v12 = vadd.f32 %v2627_v17, %v877_v8  ;;  %v1006_v13 = vadd.f32 %v2627_v17, %v1005_v9  ;;  %v879_v14 = vpop.f32.mrb[63].mxu0  ;;  %v1007_v15 = vpop.f32.mrb[63].mxu1  ;;  %1400 = sbr.rel (!%p2465_p4) target bundleno = 507 (0x1fb), region = 36 }
 0x19b   : > { %v2061_v16 = vpack.c.bf16 %v1039_v10, %v1039_v10  ;;  %v2093_v18 = vpack.c.bf16 %v1071_v11, %v1071_v11  ;;  %v1040_v19 = vmax.f32 %v878_v12, 0.0  ;;  %v1072_v20 = vmax.f32 %v1006_v13, 0.0 }
 0x19d   : > { %1360 = vst.msk [vmem:[%s2633_s12 + $0x78] sm:$0xf] %vm1329_vm0, %v2061_v16  ;;  %1392 = vst.msk [vmem:[%s2633_s12 + $0xf8] sm:$0xf] %vm1329_vm0, %v2093_v18  ;;  %v2062_v21 = vpack.c.bf16 %v1040_v19, %v1040_v19  ;;  %v2094_v22 = vpack.c.bf16 %v1072_v20, %v1072_v20 }
 0x19f   : > { %1361 = vst.msk [vmem:[%s2633_s12 + $0x7c] sm:$0xf] %vm1329_vm0, %v2062_v21  ;;  %1393 = vst.msk [vmem:[%s2633_s12 + $0xfc] sm:$0xf] %vm1329_vm0, %v2094_v22 }
 0x1a0   : > { %s3034_s9 = smov (!%p1403_p8, %s1402_s9), 64 }
 0x1a1   : > { %s2015_s28 = sshll.u32 %s3034_s9, 6 }
 0x1a2   : > { %p2018_p9 = scmp.eq.s32.totalorder %s2015_s28, 0 }
 0x1a3   : > { %s2836_s29 = sshrl.u32 (!%p2018_p9), %s3034_s9, 6 }
 0x1a4   : > { %1411 = sbr.rel (%p2018_p9) target bundleno = 507 (0x1fb), region = 40  ;;  %p2019_p10 = scmp.le.s32.totalorder (!%p2018_p9), %s2836_s29, 0 }
 0x1ab   : > { %1816 = sbr.rel (%p2019_p10) target bundleno = 486 (0x1e6), region = 112  ;;  %s3027_s15 = smov (!%p2019_p10), %s2830_s27 }
 0x1ac   : > { %s3028_s20 = smov (!%p2019_p10), %s2633_s12  ;;  %s2845_s23 = smov (!%p2019_p10), 0  }
 0x1ad   : > { %s2847_s30 = smov (!%p2019_p10), 0  }
 0x1b2 LB: >> { %v1427_v17 = vld [vmem:[%s2393_s20] sm:$0xf]  ;;  %v1429_v23 = vld [vmem:[%s2393_s20 + $0x4] sm:$0xf]  ;;  %v1431_v24 = vld [vmem:[%s2393_s20 + $0x8] sm:$0xf]  ;;  %s2401_s30 = sphi %s2847_s30, %s1421_s30   ;;  %s2397_s23 = sphi %s2845_s23, %s3029_s23   ;;  %s2393_s20 = sphi %s3028_s20, %s1560_s20   ;;  %s2389_s15 = sphi %s3027_s15, %s1561_s15  }
 0x1b3   : >> { %1428 = vst [vmem:[%s2389_s15] sm:$0xf] %v1427_v17  ;;  %1430 = vst [vmem:[%s2389_s15 + $0x4] sm:$0xf] %v1429_v23  ;;  %v1433_v25 = vld [vmem:[%s2393_s20 + $0xc] sm:$0xf]  ;;  %s1555_s4 = sadd.s32 1, %s2397_s23 }
 0x1b4   : >> { %1432 = vst [vmem:[%s2389_s15 + $0x8] sm:$0xf] %v1431_v24  ;;  %v1435_v26 = vld [vmem:[%s2393_s20 + $0x10] sm:$0xf]  ;;  %v1437_v27 = vld [vmem:[%s2393_s20 + $0x14] sm:$0xf]  ;;  %p1556_p11 = scmp.ge.s32.totalorder %s1555_s4, %s2836_s29 }
 0x1b5   : >> { %1434 = vst [vmem:[%s2389_s15 + $0xc] sm:$0xf] %v1433_v25  ;;  %1436 = vst [vmem:[%s2389_s15 + $0x10] sm:$0xf] %v1435_v26  ;;  %v1439_v28 = vld [vmem:[%s2393_s20 + $0x18] sm:$0xf] }
 0x1b6   : >> { %1438 = vst [vmem:[%s2389_s15 + $0x14] sm:$0xf] %v1437_v27  ;;  %v1441_v29 = vld [vmem:[%s2393_s20 + $0x1c] sm:$0xf]  ;;  %v1443_v30 = vld [vmem:[%s2393_s20 + $0x20] sm:$0xf] }
 0x1b7   : >> { %1440 = vst [vmem:[%s2389_s15 + $0x18] sm:$0xf] %v1439_v28  ;;  %1442 = vst [vmem:[%s2389_s15 + $0x1c] sm:$0xf] %v1441_v29  ;;  %v1445_v31 = vld [vmem:[%s2393_s20 + $0x24] sm:$0xf] }
 0x1b8   : >> { %1444 = vst [vmem:[%s2389_s15 + $0x20] sm:$0xf] %v1443_v30  ;;  %v1447_v32 = vld [vmem:[%s2393_s20 + $0x28] sm:$0xf]  ;;  %v1449_v33 = vld [vmem:[%s2393_s20 + $0x2c] sm:$0xf] }
 0x1b9   : >> { %1446 = vst [vmem:[%s2389_s15 + $0x24] sm:$0xf] %v1445_v31  ;;  %1448 = vst [vmem:[%s2389_s15 + $0x28] sm:$0xf] %v1447_v32  ;;  %v1451_v34 = vld [vmem:[%s2393_s20 + $0x30] sm:$0xf] }
 0x1ba   : >> { %1450 = vst [vmem:[%s2389_s15 + $0x2c] sm:$0xf] %v1449_v33  ;;  %v1453_v35 = vld [vmem:[%s2393_s20 + $0x34] sm:$0xf]  ;;  %v1455_v36 = vld [vmem:[%s2393_s20 + $0x38] sm:$0xf] }
 0x1bb   : >> { %1452 = vst [vmem:[%s2389_s15 + $0x30] sm:$0xf] %v1451_v34  ;;  %1454 = vst [vmem:[%s2389_s15 + $0x34] sm:$0xf] %v1453_v35  ;;  %v1457_v37 = vld [vmem:[%s2393_s20 + $0x3c] sm:$0xf] }
 0x1bc   : >> { %1456 = vst [vmem:[%s2389_s15 + $0x38] sm:$0xf] %v1455_v36  ;;  %v1459_v38 = vld [vmem:[%s2393_s20 + $0x40] sm:$0xf]  ;;  %v1461_v39 = vld [vmem:[%s2393_s20 + $0x44] sm:$0xf] }
 0x1bd   : >> { %1458 = vst [vmem:[%s2389_s15 + $0x3c] sm:$0xf] %v1457_v37  ;;  %1460 = vst [vmem:[%s2389_s15 + $0x40] sm:$0xf] %v1459_v38  ;;  %v1463_v40 = vld [vmem:[%s2393_s20 + $0x48] sm:$0xf] }
 0x1be   : >> { %1462 = vst [vmem:[%s2389_s15 + $0x44] sm:$0xf] %v1461_v39  ;;  %v1465_v41 = vld [vmem:[%s2393_s20 + $0x4c] sm:$0xf]  ;;  %v1467_v42 = vld [vmem:[%s2393_s20 + $0x50] sm:$0xf] }
 0x1bf   : >> { %1464 = vst [vmem:[%s2389_s15 + $0x48] sm:$0xf] %v1463_v40  ;;  %1466 = vst [vmem:[%s2389_s15 + $0x4c] sm:$0xf] %v1465_v41  ;;  %v1469_v43 = vld [vmem:[%s2393_s20 + $0x54] sm:$0xf] }
 0x1c0   : >> { %1468 = vst [vmem:[%s2389_s15 + $0x50] sm:$0xf] %v1467_v42  ;;  %v1471_v44 = vld [vmem:[%s2393_s20 + $0x58] sm:$0xf]  ;;  %v1473_v45 = vld [vmem:[%s2393_s20 + $0x5c] sm:$0xf] }
 0x1c1   : >> { %1470 = vst [vmem:[%s2389_s15 + $0x54] sm:$0xf] %v1469_v43  ;;  %1472 = vst [vmem:[%s2389_s15 + $0x58] sm:$0xf] %v1471_v44  ;;  %v1475_v46 = vld [vmem:[%s2393_s20 + $0x60] sm:$0xf] }
 0x1c2   : >> { %1474 = vst [vmem:[%s2389_s15 + $0x5c] sm:$0xf] %v1473_v45  ;;  %v1477_v47 = vld [vmem:[%s2393_s20 + $0x64] sm:$0xf]  ;;  %v1479_v48 = vld [vmem:[%s2393_s20 + $0x68] sm:$0xf] }
 0x1c3   : >> { %1476 = vst [vmem:[%s2389_s15 + $0x60] sm:$0xf] %v1475_v46  ;;  %1478 = vst [vmem:[%s2389_s15 + $0x64] sm:$0xf] %v1477_v47  ;;  %v1481_v49 = vld [vmem:[%s2393_s20 + $0x6c] sm:$0xf] }
 0x1c4   : >> { %1480 = vst [vmem:[%s2389_s15 + $0x68] sm:$0xf] %v1479_v48  ;;  %v1483_v50 = vld [vmem:[%s2393_s20 + $0x70] sm:$0xf]  ;;  %v1485_v51 = vld [vmem:[%s2393_s20 + $0x74] sm:$0xf] }
 0x1c5   : >> { %1482 = vst [vmem:[%s2389_s15 + $0x6c] sm:$0xf] %v1481_v49  ;;  %1484 = vst [vmem:[%s2389_s15 + $0x70] sm:$0xf] %v1483_v50  ;;  %v1487_v52 = vld [vmem:[%s2393_s20 + $0x78] sm:$0xf] }
 0x1c6   : >> { %1486 = vst [vmem:[%s2389_s15 + $0x74] sm:$0xf] %v1485_v51  ;;  %v1489_v53 = vld [vmem:[%s2393_s20 + $0x7c] sm:$0xf]  ;;  %v1491_v54 = vld [vmem:[%s2393_s20 + $0x80] sm:$0xf] }
 0x1c7   : >> { %1488 = vst [vmem:[%s2389_s15 + $0x78] sm:$0xf] %v1487_v52  ;;  %1490 = vst [vmem:[%s2389_s15 + $0x7c] sm:$0xf] %v1489_v53  ;;  %v1493_v55 = vld [vmem:[%s2393_s20 + $0x84] sm:$0xf] }
 0x1c8   : >> { %1492 = vst [vmem:[%s2389_s15 + $0x80] sm:$0xf] %v1491_v54  ;;  %v1495_v56 = vld [vmem:[%s2393_s20 + $0x88] sm:$0xf]  ;;  %v1497_v57 = vld [vmem:[%s2393_s20 + $0x8c] sm:$0xf] }
 0x1c9   : >> { %1494 = vst [vmem:[%s2389_s15 + $0x84] sm:$0xf] %v1493_v55  ;;  %1496 = vst [vmem:[%s2389_s15 + $0x88] sm:$0xf] %v1495_v56  ;;  %v1499_v58 = vld [vmem:[%s2393_s20 + $0x90] sm:$0xf] }
 0x1ca   : >> { %1498 = vst [vmem:[%s2389_s15 + $0x8c] sm:$0xf] %v1497_v57  ;;  %v1501_v59 = vld [vmem:[%s2393_s20 + $0x94] sm:$0xf]  ;;  %v1503_v60 = vld [vmem:[%s2393_s20 + $0x98] sm:$0xf] }
 0x1cb   : >> { %1500 = vst [vmem:[%s2389_s15 + $0x90] sm:$0xf] %v1499_v58  ;;  %1502 = vst [vmem:[%s2389_s15 + $0x94] sm:$0xf] %v1501_v59  ;;  %v1505_v61 = vld [vmem:[%s2393_s20 + $0x9c] sm:$0xf] }
 0x1cc   : >> { %1504 = vst [vmem:[%s2389_s15 + $0x98] sm:$0xf] %v1503_v60  ;;  %v1507_v62 = vld [vmem:[%s2393_s20 + $0xa0] sm:$0xf]  ;;  %v1509_v63 = vld [vmem:[%s2393_s20 + $0xa4] sm:$0xf] }
 0x1cd   : >> { %1506 = vst [vmem:[%s2389_s15 + $0x9c] sm:$0xf] %v1505_v61  ;;  %1508 = vst [vmem:[%s2389_s15 + $0xa0] sm:$0xf] %v1507_v62  ;;  %v1511_v0 = vld [vmem:[%s2393_s20 + $0xa8] sm:$0xf] }
 0x1ce   : >> { %1510 = vst [vmem:[%s2389_s15 + $0xa4] sm:$0xf] %v1509_v63  ;;  %v1513_v1 = vld [vmem:[%s2393_s20 + $0xac] sm:$0xf]  ;;  %v1515_v2 = vld [vmem:[%s2393_s20 + $0xb0] sm:$0xf] }
 0x1cf   : >> { %1512 = vst [vmem:[%s2389_s15 + $0xa8] sm:$0xf] %v1511_v0  ;;  %1514 = vst [vmem:[%s2389_s15 + $0xac] sm:$0xf] %v1513_v1  ;;  %v1517_v3 = vld [vmem:[%s2393_s20 + $0xb4] sm:$0xf] }
 0x1d0   : >> { %1516 = vst [vmem:[%s2389_s15 + $0xb0] sm:$0xf] %v1515_v2  ;;  %v1519_v4 = vld [vmem:[%s2393_s20 + $0xb8] sm:$0xf]  ;;  %v1521_v5 = vld [vmem:[%s2393_s20 + $0xbc] sm:$0xf] }
 0x1d1   : >> { %1518 = vst [vmem:[%s2389_s15 + $0xb4] sm:$0xf] %v1517_v3  ;;  %1520 = vst [vmem:[%s2389_s15 + $0xb8] sm:$0xf] %v1519_v4  ;;  %v1523_v6 = vld [vmem:[%s2393_s20 + $0xc0] sm:$0xf] }
 0x1d2   : >> { %1522 = vst [vmem:[%s2389_s15 + $0xbc] sm:$0xf] %v1521_v5  ;;  %v1525_v7 = vld [vmem:[%s2393_s20 + $0xc4] sm:$0xf]  ;;  %v1527_v8 = vld [vmem:[%s2393_s20 + $0xc8] sm:$0xf] }
 0x1d3   : >> { %1524 = vst [vmem:[%s2389_s15 + $0xc0] sm:$0xf] %v1523_v6  ;;  %1526 = vst [vmem:[%s2389_s15 + $0xc4] sm:$0xf] %v1525_v7  ;;  %v1529_v9 = vld [vmem:[%s2393_s20 + $0xcc] sm:$0xf] }
 0x1d4   : >> { %1528 = vst [vmem:[%s2389_s15 + $0xc8] sm:$0xf] %v1527_v8  ;;  %v1531_v10 = vld [vmem:[%s2393_s20 + $0xd0] sm:$0xf]  ;;  %v1533_v11 = vld [vmem:[%s2393_s20 + $0xd4] sm:$0xf] }
 0x1d5   : >> { %1530 = vst [vmem:[%s2389_s15 + $0xcc] sm:$0xf] %v1529_v9  ;;  %1532 = vst [vmem:[%s2389_s15 + $0xd0] sm:$0xf] %v1531_v10  ;;  %v1535_v12 = vld [vmem:[%s2393_s20 + $0xd8] sm:$0xf] }
 0x1d6   : >> { %1534 = vst [vmem:[%s2389_s15 + $0xd4] sm:$0xf] %v1533_v11  ;;  %v1537_v13 = vld [vmem:[%s2393_s20 + $0xdc] sm:$0xf]  ;;  %v1539_v14 = vld [vmem:[%s2393_s20 + $0xe0] sm:$0xf] }
 0x1d7   : >> { %1536 = vst [vmem:[%s2389_s15 + $0xd8] sm:$0xf] %v1535_v12  ;;  %1538 = vst [vmem:[%s2389_s15 + $0xdc] sm:$0xf] %v1537_v13  ;;  %v1541_v15 = vld [vmem:[%s2393_s20 + $0xe4] sm:$0xf] }
 0x1d8   : >> { %1540 = vst [vmem:[%s2389_s15 + $0xe0] sm:$0xf] %v1539_v14  ;;  %v1543_v16 = vld [vmem:[%s2393_s20 + $0xe8] sm:$0xf]  ;;  %v1545_v18 = vld [vmem:[%s2393_s20 + $0xec] sm:$0xf] }
 0x1d9   : >> { %1542 = vst [vmem:[%s2389_s15 + $0xe4] sm:$0xf] %v1541_v15  ;;  %1544 = vst [vmem:[%s2389_s15 + $0xe8] sm:$0xf] %v1543_v16  ;;  %v1547_v19 = vld [vmem:[%s2393_s20 + $0xf0] sm:$0xf] }
 0x1da   : >> { %1546 = vst [vmem:[%s2389_s15 + $0xec] sm:$0xf] %v1545_v18  ;;  %v1549_v20 = vld [vmem:[%s2393_s20 + $0xf4] sm:$0xf]  ;;  %v1551_v21 = vld [vmem:[%s2393_s20 + $0xf8] sm:$0xf] }
 0x1db   : >> { %1548 = vst [vmem:[%s2389_s15 + $0xf0] sm:$0xf] %v1547_v19  ;;  %1550 = vst [vmem:[%s2389_s15 + $0xf4] sm:$0xf] %v1549_v20  ;;  %v1553_v22 = vld [vmem:[%s2393_s20 + $0xfc] sm:$0xf] }
 0x1dc   : >> { %1552 = vst [vmem:[%s2389_s15 + $0xf8] sm:$0xf] %v1551_v21  ;;  %1554 = vst [vmem:[%s2389_s15 + $0xfc] sm:$0xf] %v1553_v22  ;;  %s3036_s4 = smov (%p1556_p11, %s1555_s4), 0  ;;  %s1421_s30 = sadd.s32 1, %s2401_s30  }
 0x1dd   : >> { %s2020_s5 = sshll.u32 %s3036_s4, 8  ;;  %p1420_p12 = scmp.ge.s32.totalorder %s1421_s30, %s2836_s29 }
 0x1de   : >> { %s1560_s20 = scalar_lea.vmem %s2633_s12, %s2020_s5 [#allocation2]   ;;  %s1561_s15 = scalar_lea.vmem %s2830_s27, %s2020_s5  }
 0x1df   : >> { %s3029_s23 = smov %s3036_s4  ;;  %1423 = sbr.rel (!%p1420_p12) target bundleno = 434 (0x1b2), region = 118 }
 0x1e6 PF: > { %s3004_s6 = sand.u32 63, %s3034_s9   ;;  %s2096_s7 = sshll.u32 %s2836_s29, 8 }
 0x1e7   : > { %s1566_s8 = scalar_lea.vmem %s2633_s12, %s2096_s7 [#allocation2]   ;;  %s1568_s10 = scalar_lea.vmem %s2830_s27, %s2096_s7  }
 0x1e8   : > { %p2025_p13 = scmp.le.s32.totalorder %s3004_s6, 0 }
 0x1e9   : > { %s2403_s11 = smov (!%p2025_p13), %s1568_s10   ;;  %s2407_s14 = smov (!%p2025_p13), %s1566_s8  }
 0x1ea   : > { %1830 = sbr.rel (%p2025_p13) target bundleno = 507 (0x1fb), region = 123  ;;  %s2411_s17 = smov (!%p2025_p13), 0  }
 0x1eb   : > { %s2415_s18 = smov (!%p2025_p13), 0  }
 0x1f1 LB: >> { %v1578_v17 = vld [vmem:[%s2409_s14] sm:$0xf]  ;;  %s1580_s21 = sadd.s32 1, %s2413_s17  ;;  %s1572_s18 = sadd.s32 1, %s2417_s18   ;;  %s2417_s18 = sphi %s2415_s18, %s1572_s18   ;;  %s2413_s17 = sphi %s2411_s17, %s2412_s17   ;;  %s2409_s14 = sphi %s2407_s14, %s1585_s14   ;;  %s2405_s11 = sphi %s2403_s11, %s1586_s11  }
 0x1f2   : >> { %1579 = vst [vmem:[%s2405_s11] sm:$0xf] %v1578_v17  ;;  %p1581_p0 = scmp.ge.s32.totalorder %s1580_s21, %s3004_s6  ;;  %p1571_p1 = scmp.ge.s32.totalorder %s1572_s18, %s3004_s6 }
 0x1f4   : >> { %s3038_s21 = smov (%p1581_p0, %s1580_s21), 0  ;;  %1574 = sbr.rel (!%p1571_p1) target bundleno = 497 (0x1f1), region = 129 }
 0x1f5   : >> { %s2026_s22 = sshll.u32 %s3038_s21, 2  ;;  %s2412_s17 = smov %s3038_s21  }
 0x1f6   : >> { %s1585_s14 = scalar_lea.vmem %s1566_s8, %s2026_s22 [#allocation2]   ;;  %s1586_s11 = scalar_lea.vmem %s1568_s10, %s2026_s22  }
 0x1fb PF: > { %p10_p2 = scmp.ge.s32.totalorder %s2455_s16, 4   ;;  %s3030_s12 = smov %s2381_s13 }
 0x1fc   : > { %s3031_s13 = smov %s2463_s19  ;;  %s3032_s14 = smov %s2455_s16 }
 0x1fd   :  { %12 = sbr.rel (!%p10_p2) target bundleno = 2 (0x2), region = 140 }

// kernel: mario_net_forward.5
= control target key start
LH: loop header
LB: loop body
LE: loop exit
PB: predicated region body
PF: predicated region fallthrough
CT: control target
= control target key end

     0   :  { %vm880_vm0 = vcmask 519168   ;;  %vm901_vm1 = vcmask 516096   ;;  %s1637_s1 = inlined_call_operand.vmem [shape: bf16[512,64], index: 1, kind: input, shape index: {}]   ;;  %s1638_s0 = inlined_call_operand.vmem [shape: bf16[162,512], index: 0, kind: input, shape index: {}]   ;;  %s1639_s2 = inlined_call_operand.vmem [shape: f32[1,64], index: 2, kind: input, shape index: {}]   ;;  %s1640_s3 = inlined_call_operand.vmem [shape: bf16[162,64], index: 3, kind: output, shape index: {}]  }
   0x1   :  { %v1190_v0 = vld [vmem:[%s1637_s1 + $0x40] sm:$0xff]   ;;  %v1194_v4 = vld [vmem:[%s1637_s1 + $0x48] sm:$0xff]   ;;  %v1198_v8 = vld [vmem:[%s1637_s1 + $0x50] sm:$0xff]  }
   0x2   :  { %v1191_v1 = vld [vmem:[%s1637_s1 + $0xc0] sm:$0xff]   ;;  %1026 = vmatprep.subr.bf16.mxu0 %v1190_v0  ;;  %v1195_v5 = vld [vmem:[%s1637_s1 + $0xc8] sm:$0xff]   ;;  %v1199_v9 = vld [vmem:[%s1637_s1 + $0xd0] sm:$0xff]  }
   0x3   :  { %v1192_v2 = vld [vmem:[%s1637_s1] sm:$0xff]   ;;  %1108 = vmatprep.subr.bf16.mxu1 %v1191_v1  ;;  %v1196_v6 = vld [vmem:[%s1637_s1 + $0x8] sm:$0xff]   ;;  %v1200_v10 = vld [vmem:[%s1637_s1 + $0x10] sm:$0xff]  }
   0x4   :  { %v1193_v3 = vld [vmem:[%s1637_s1 + $0x80] sm:$0xff]   ;;  %1027 = vmatpush3.bf16.msra.mxu0 %v1192_v2  ;;  %v1197_v7 = vld [vmem:[%s1637_s1 + $0x88] sm:$0xff]   ;;  %v1201_v11 = vld [vmem:[%s1637_s1 + $0x90] sm:$0xff]  }
   0x5   :  { %1109 = vmatpush3.bf16.msra.mxu1 %v1193_v3  ;;  %1028 = vmatprep.subr.bf16.mxu0 %v1194_v4  ;;  %v1202_v12 = vld [vmem:[%s1637_s1 + $0x58] sm:$0xff]   ;;  %v1206_v16 = vld [vmem:[%s1637_s1 + $0x60] sm:$0xff]   ;;  %v1210_v20 = vld [vmem:[%s1637_s1 + $0x68] sm:$0xff]  }
   0x6   :  { %1110 = vmatprep.subr.bf16.mxu1 %v1195_v5  ;;  %v1203_v13 = vld [vmem:[%s1637_s1 + $0xd8] sm:$0xff]   ;;  %v1207_v17 = vld [vmem:[%s1637_s1 + $0xe0] sm:$0xff]   ;;  %v1211_v21 = vld [vmem:[%s1637_s1 + $0xe8] sm:$0xff]  }
   0x7   :  { %v1204_v14 = vld [vmem:[%s1637_s1 + $0x18] sm:$0xff]   ;;  %v1208_v18 = vld [vmem:[%s1637_s1 + $0x20] sm:$0xff]   ;;  %v1212_v22 = vld [vmem:[%s1637_s1 + $0x28] sm:$0xff]  }
   0x8   :  { %1029 = vmatpush3.bf16.msra.mxu0 %v1196_v6  ;;  %v1205_v15 = vld [vmem:[%s1637_s1 + $0x98] sm:$0xff]   ;;  %v1209_v19 = vld [vmem:[%s1637_s1 + $0xa0] sm:$0xff]   ;;  %v1213_v23 = vld [vmem:[%s1637_s1 + $0xa8] sm:$0xff]  }
   0x9   :  { %1111 = vmatpush3.bf16.msra.mxu1 %v1197_v7  ;;  %1030 = vmatprep.subr.bf16.mxu0 %v1198_v8  ;;  %v1214_v24 = vld [vmem:[%s1637_s1 + $0x70] sm:$0xff]   ;;  %v1218_v28 = vld [vmem:[%s1637_s1 + $0x78] sm:$0xff]   ;;  %v55_v6 = vld [vmem:[%s1638_s0 + $0x140] sm:$0x11] }
   0xa   :  { %1112 = vmatprep.subr.bf16.mxu1 %v1199_v9  ;;  %v1215_v25 = vld [vmem:[%s1637_s1 + $0xf0] sm:$0xff]   ;;  %v1219_v29 = vld [vmem:[%s1637_s1 + $0xf8] sm:$0xff]   ;;  %v56_v7 = vld [vmem:[%s1638_s0 + $0x148] sm:$0x11] }
   0xb   :  { %v1216_v26 = vld [vmem:[%s1637_s1 + $0x30] sm:$0xff]   ;;  %v1220_v30 = vld [vmem:[%s1637_s1 + $0x38] sm:$0xff]  }
   0xc   :  { %1031 = vmatpush3.bf16.msra.mxu0 %v1200_v10  ;;  %v1217_v27 = vld [vmem:[%s1637_s1 + $0xb0] sm:$0xff]   ;;  %v1221_v31 = vld [vmem:[%s1637_s1 + $0xb8] sm:$0xff]   ;;  %v949_v10 = vcombine.high %v55_v6, %v55_v6 }
   0xd   :  { %1113 = vmatpush3.bf16.msra.mxu1 %v1201_v11  ;;  %1032 = vmatprep.subr.bf16.mxu0 %v1202_v12  ;;  %v1222_v32 = vld [vmem:[%s1638_s0] ss:$16 sps:$4 sm:$0xff]   ;;  %v1224_v33 = vld [vmem:[%s1638_s0 + $0x4] ss:$16 sps:$4 sm:$0xff]   ;;  %v1225_v34 = vld [vmem:[%s1638_s0 + $0x8] ss:$16 sps:$4 sm:$0xff]   ;;  %v951_v11 = vcombine.high %v56_v7, %v56_v7  ;;  %v948_v12 = vcombine.low %v55_v6, %v55_v6 }
   0xe   :  { %1114 = vmatprep.subr.bf16.mxu1 %v1203_v13  ;;  %v1227_v35 = vld [vmem:[%s1638_s0 + $0xc] ss:$16 sps:$4 sm:$0xff]   ;;  %566 = vmatprep.mubr.bf16.mxu0 %v1224_v33  ;;  %v1228_v36 = vld [vmem:[%s1638_s0 + $0x24] ss:$16 sps:$4 sm:$0xff]   ;;  %v1232_v38 = vld [vmem:[%s1638_s0 + $0x20] ss:$16 sps:$4 sm:$0xff]   ;;  %v950_v13 = vcombine.low %v56_v7, %v56_v7 }
   0xf   :  { %686 = vmatprep.mubr.bf16.mxu1 %v1227_v35  ;;  %v1230_v37 = vld [vmem:[%s1638_s0 + $0x2c] ss:$16 sps:$4 sm:$0xff]   ;;  %v1233_v39 = vld [vmem:[%s1638_s0 + $0x28] ss:$16 sps:$4 sm:$0xff]   ;;  %v1234_v40 = vld [vmem:[%s1638_s0 + $0x44] ss:$16 sps:$4 sm:$0xff]  }
  0x10   :  { %1033 = vmatpush3.bf16.msra.mxu0 %v1204_v14  ;;  %v1236_v41 = vld [vmem:[%s1638_s0 + $0x4c] ss:$16 sps:$4 sm:$0xff]   ;;  %v1238_v42 = vld [vmem:[%s1638_s0 + $0x40] ss:$16 sps:$4 sm:$0xff]   ;;  %v1239_v43 = vld [vmem:[%s1638_s0 + $0x48] ss:$16 sps:$4 sm:$0xff]  }
  0x11   :  { %1115 = vmatpush3.bf16.msra.mxu1 %v1205_v15  ;;  %1034 = vmatprep.subr.bf16.mxu0 %v1206_v16  ;;  %v1240_v44 = vld [vmem:[%s1638_s0 + $0x64] ss:$16 sps:$4 sm:$0xff]   ;;  %v1242_v45 = vld [vmem:[%s1638_s0 + $0x6c] ss:$16 sps:$4 sm:$0xff]   ;;  %v1244_v46 = vld [vmem:[%s1638_s0 + $0x60] ss:$16 sps:$4 sm:$0xff]  }
  0x12   :  { %1116 = vmatprep.subr.bf16.mxu1 %v1207_v17  ;;  %v1245_v47 = vld [vmem:[%s1638_s0 + $0x68] ss:$16 sps:$4 sm:$0xff]   ;;  %v1246_v48 = vld [vmem:[%s1638_s0 + $0x84] ss:$16 sps:$4 sm:$0xff]   ;;  %v1248_v49 = vld [vmem:[%s1638_s0 + $0x8c] ss:$16 sps:$4 sm:$0xff]  }
  0x13   :  { %v1250_v50 = vld [vmem:[%s1638_s0 + $0x80] ss:$16 sps:$4 sm:$0xff]   ;;  %v1251_v51 = vld [vmem:[%s1638_s0 + $0x88] ss:$16 sps:$4 sm:$0xff]   ;;  %v1252_v52 = vld [vmem:[%s1638_s0 + $0xa4] ss:$16 sps:$4 sm:$0xff]  }
  0x14   :  { %1035 = vmatpush3.bf16.msra.mxu0 %v1208_v18  ;;  %v1254_v53 = vld [vmem:[%s1638_s0 + $0xac] ss:$16 sps:$4 sm:$0xff]   ;;  %v1256_v54 = vld [vmem:[%s1638_s0 + $0xa0] ss:$16 sps:$4 sm:$0xff]   ;;  %v1257_v55 = vld [vmem:[%s1638_s0 + $0xa8] ss:$16 sps:$4 sm:$0xff]  }
  0x15   :  { %1117 = vmatpush3.bf16.msra.mxu1 %v1209_v19  ;;  %1036 = vmatprep.subr.bf16.mxu0 %v1210_v20  ;;  %v1258_v56 = vld [vmem:[%s1638_s0 + $0xc4] ss:$16 sps:$4 sm:$0xff]   ;;  %v1260_v57 = vld [vmem:[%s1638_s0 + $0xcc] ss:$16 sps:$4 sm:$0xff]   ;;  %v1262_v58 = vld [vmem:[%s1638_s0 + $0xc0] ss:$16 sps:$4 sm:$0xff]  }
  0x16   :  { %1118 = vmatprep.subr.bf16.mxu1 %v1211_v21  ;;  %v1263_v59 = vld [vmem:[%s1638_s0 + $0xc8] ss:$16 sps:$4 sm:$0xff]   ;;  %v1264_v60 = vld [vmem:[%s1638_s0 + $0xe4] ss:$16 sps:$4 sm:$0xff]   ;;  %v1266_v61 = vld [vmem:[%s1638_s0 + $0xec] ss:$16 sps:$4 sm:$0xff]  }
  0x17   :  { %v1268_v62 = vld [vmem:[%s1638_s0 + $0xe0] ss:$16 sps:$4 sm:$0xff]   ;;  %v1269_v63 = vld [vmem:[%s1638_s0 + $0xe8] ss:$16 sps:$4 sm:$0xff]   ;;  %v1270_v0 = vld [vmem:[%s1638_s0 + $0x104] ss:$16 sps:$4 sm:$0xff]  }
  0x18   :  { %1037 = vmatpush3.bf16.msra.mxu0 %v1212_v22  ;;  %v1272_v1 = vld [vmem:[%s1638_s0 + $0x10c] ss:$16 sps:$4 sm:$0xff]   ;;  %v1274_v2 = vld [vmem:[%s1638_s0 + $0x100] ss:$16 sps:$4 sm:$0xff]   ;;  %v1275_v3 = vld [vmem:[%s1638_s0 + $0x108] ss:$16 sps:$4 sm:$0xff]  }
  0x19   :  { %1119 = vmatpush3.bf16.msra.mxu1 %v1213_v23  ;;  %1038 = vmatprep.subr.bf16.mxu0 %v1214_v24  ;;  %v1276_v4 = vld [vmem:[%s1638_s0 + $0x124] ss:$16 sps:$4 sm:$0xff]   ;;  %v1278_v5 = vld [vmem:[%s1638_s0 + $0x12c] ss:$16 sps:$4 sm:$0xff]   ;;  %v1280_v8 = vld [vmem:[%s1638_s0 + $0x120] ss:$16 sps:$4 sm:$0xff]  }
  0x1a   :  { %1120 = vmatprep.subr.bf16.mxu1 %v1215_v25  ;;  %v1281_v9 = vld [vmem:[%s1638_s0 + $0x128] ss:$16 sps:$4 sm:$0xff]   ;;  %v1531_v16 = vld [vmem:[%s1639_s2] ss:$0 sm:$0xff] }
  0x1c   :  { %1039 = vmatpush3.bf16.msra.mxu0 %v1216_v26 }
  0x1d   :  { %1121 = vmatpush3.bf16.msra.mxu1 %v1217_v27  ;;  %1040 = vmatprep.subr.bf16.mxu0 %v1218_v28 }
  0x1e   :  { %1122 = vmatprep.subr.bf16.mxu1 %v1219_v29 }
  0x20   :  { %1041 = vmatpush3.bf16.msra.mxu0 %v1220_v30 }
  0x21   :  { %1123 = vmatpush3.bf16.msra.mxu1 %v1221_v31 }
  0x23   :  { %567 = vmatmul.mubr.bf16.vlgmr.msra.gmra.mrb[0].mxu0 %v1222_v32 }
  0x24   :  { %687 = vmatmul.mubr.bf16.vlgmr.msra.gmra.mrb[0].mxu1 %v1225_v34  ;;  %574 = vmatprep.mubr.bf16.mxu0 %v1228_v36 }
  0x25   :  { %694 = vmatprep.mubr.bf16.mxu1 %v1230_v37 }
  0x2b   :  { %575 = vmatmul.mubr.bf16.gmra.mrb[4].mxu0 %v1232_v38 }
  0x2c   :  { %695 = vmatmul.mubr.bf16.gmra.mrb[4].mxu1 %v1233_v39  ;;  %582 = vmatprep.mubr.bf16.mxu0 %v1234_v40 }
  0x2d   :  { %702 = vmatprep.mubr.bf16.mxu1 %v1236_v41 }
  0x33   :  { %583 = vmatmul.mubr.bf16.gmra.mrb[8].mxu0 %v1238_v42 }
  0x34   :  { %703 = vmatmul.mubr.bf16.gmra.mrb[8].mxu1 %v1239_v43  ;;  %590 = vmatprep.mubr.bf16.mxu0 %v1240_v44 }
  0x35   :  { %710 = vmatprep.mubr.bf16.mxu1 %v1242_v45 }
  0x3b   :  { %591 = vmatmul.mubr.bf16.gmra.mrb[12].mxu0 %v1244_v46 }
  0x3c   :  { %711 = vmatmul.mubr.bf16.gmra.mrb[12].mxu1 %v1245_v47  ;;  %598 = vmatprep.mubr.bf16.mxu0 %v1246_v48 }
  0x3d   :  { %718 = vmatprep.mubr.bf16.mxu1 %v1248_v49 }
  0x43   :  { %599 = vmatmul.mubr.bf16.gmra.mrb[16].mxu0 %v1250_v50 }
  0x44   :  { %719 = vmatmul.mubr.bf16.gmra.mrb[16].mxu1 %v1251_v51  ;;  %606 = vmatprep.mubr.bf16.mxu0 %v1252_v52 }
  0x45   :  { %726 = vmatprep.mubr.bf16.mxu1 %v1254_v53 }
  0x4b   :  { %607 = vmatmul.mubr.bf16.gmra.mrb[20].mxu0 %v1256_v54 }
  0x4c   :  { %727 = vmatmul.mubr.bf16.gmra.mrb[20].mxu1 %v1257_v55  ;;  %614 = vmatprep.mubr.bf16.mxu0 %v1258_v56 }
  0x4d   :  { %734 = vmatprep.mubr.bf16.mxu1 %v1260_v57 }
  0x53   :  { %615 = vmatmul.mubr.bf16.gmra.mrb[24].mxu0 %v1262_v58 }
  0x54   :  { %735 = vmatmul.mubr.bf16.gmra.mrb[24].mxu1 %v1263_v59  ;;  %622 = vmatprep.mubr.bf16.mxu0 %v1264_v60 }
  0x55   :  { %742 = vmatprep.mubr.bf16.mxu1 %v1266_v61 }
  0x5b   :  { %623 = vmatmul.mubr.bf16.gmra.mrb[28].mxu0 %v1268_v62 }
  0x5c   :  { %743 = vmatmul.mubr.bf16.gmra.mrb[28].mxu1 %v1269_v63  ;;  %630 = vmatprep.mubr.bf16.mxu0 %v1270_v0 }
  0x5d   :  { %750 = vmatprep.mubr.bf16.mxu1 %v1272_v1 }
  0x63   :  { %631 = vmatmul.mubr.bf16.gmra.mrb[32].mxu0 %v1274_v2 }
  0x64   :  { %751 = vmatmul.mubr.bf16.gmra.mrb[32].mxu1 %v1275_v3  ;;  %638 = vmatprep.mubr.bf16.mxu0 %v1276_v4 }
  0x65   :  { %758 = vmatprep.mubr.bf16.mxu1 %v1278_v5 }
  0x6b   :  { %639 = vmatmul.mubr.bf16.gmra.mrb[36].mxu0 %v1280_v8 }
  0x6c   :  { %759 = vmatmul.mubr.bf16.gmra.mrb[36].mxu1 %v1281_v9  ;;  %646 = vmatprep.mubr.bf16.mxu0 %v949_v10 }
  0x6d   :  { %766 = vmatprep.mubr.bf16.mxu1 %v951_v11 }
  0x73   :  { %647 = vmatmul.mubr.bf16.gmra.mrb[40].mxu0 %v948_v12 }
  0x74   :  { %767 = vmatmul.mubr.bf16.gmra.mrb[40].mxu1 %v950_v13 }
  0xf6   :  { %v1042_v14 = vpop.f32.mrb[0].mxu0 }
  0xf7   :  { %v1124_v15 = vpop.f32.mrb[0].mxu1  ;;  %v1043_v17 = vpop.f32.mrb[1].mxu0 }
  0xf8   :  { %v1044_v18 = vadd.f32 %v1043_v17, %v1042_v14  ;;  %v1125_v19 = vpop.f32.mrb[1].mxu1  ;;  %v1045_v20 = vpop.f32.mrb[2].mxu0 }
  0xf9   :  { %v1126_v21 = vadd.f32 %v1125_v19, %v1124_v15  ;;  %v1127_v22 = vpop.f32.mrb[2].mxu1  ;;  %v1046_v23 = vpop.f32.mrb[3].mxu0 }
  0xfa   :  { %v569_v24 = vadd.f32 %v1044_v18, %v1531_v16  ;;  %v1047_v25 = vadd.f32 %v1046_v23, %v1045_v20  ;;  %v1128_v26 = vpop.f32.mrb[3].mxu1 }
  0xfb   :  { %v1129_v27 = vadd.f32 %v1128_v26, %v1127_v22 }
  0xfc   :  { %v689_v28 = vadd.f32 %v1126_v21, %v569_v24  ;;  %v572_v29 = vadd.f32 %v1047_v25, %v1531_v16 }
  0xfe   :  { %v774_v30 = vmax.f32 %v689_v28, 0.0  ;;  %v692_v31 = vadd.f32 %v1129_v27, %v572_v29  ;;  %v1048_v32 = vpop.f32.mrb[4].mxu0 }
  0xff   :  { %v1130_v33 = vpop.f32.mrb[4].mxu1  ;;  %v1049_v34 = vpop.f32.mrb[5].mxu0 }
 0x100   :  { %v1005_v35 = vpack.c.bf16 %v774_v30, %v774_v30  ;;  %v775_v36 = vmax.f32 %v692_v31, 0.0  ;;  %v1050_v37 = vadd.f32 %v1049_v34, %v1048_v32  ;;  %v1131_v38 = vpop.f32.mrb[5].mxu1  ;;  %v1051_v39 = vpop.f32.mrb[6].mxu0 }
 0x101   :  { %v1132_v40 = vadd.f32 %v1131_v38, %v1130_v33  ;;  %v1133_v41 = vpop.f32.mrb[6].mxu1  ;;  %v1052_v42 = vpop.f32.mrb[7].mxu0 }
 0x102   :  { %881 = vst.msk [vmem:[%s1640_s3] sm:$0xf] %vm880_vm0, %v1005_v35  ;;  %v1006_v43 = vpack.c.bf16 %v775_v36, %v775_v36  ;;  %v577_v44 = vadd.f32 %v1050_v37, %v1531_v16  ;;  %v1053_v45 = vadd.f32 %v1052_v42, %v1051_v39  ;;  %v1134_v46 = vpop.f32.mrb[7].mxu1 }
 0x103   :  { %v1135_v47 = vadd.f32 %v1134_v46, %v1133_v41 }
 0x104   :  { %882 = vst.msk [vmem:[%s1640_s3 + $0x4] sm:$0xf] %vm880_vm0, %v1006_v43  ;;  %v697_v48 = vadd.f32 %v1132_v40, %v577_v44  ;;  %v580_v49 = vadd.f32 %v1053_v45, %v1531_v16 }
 0x106   :  { %v776_v50 = vmax.f32 %v697_v48, 0.0  ;;  %v700_v51 = vadd.f32 %v1135_v47, %v580_v49  ;;  %v1054_v52 = vpop.f32.mrb[8].mxu0 }
 0x107   :  { %v1136_v53 = vpop.f32.mrb[8].mxu1  ;;  %v1055_v54 = vpop.f32.mrb[9].mxu0 }
 0x108   :  { %v1007_v55 = vpack.c.bf16 %v776_v50, %v776_v50  ;;  %v777_v56 = vmax.f32 %v700_v51, 0.0  ;;  %v1056_v57 = vadd.f32 %v1055_v54, %v1054_v52  ;;  %v1137_v58 = vpop.f32.mrb[9].mxu1  ;;  %v1057_v59 = vpop.f32.mrb[10].mxu0 }
 0x109   :  { %v1138_v60 = vadd.f32 %v1137_v58, %v1136_v53  ;;  %v1139_v61 = vpop.f32.mrb[10].mxu1  ;;  %v1058_v62 = vpop.f32.mrb[11].mxu0 }
 0x10a   :  { %883 = vst.msk [vmem:[%s1640_s3 + $0x8] sm:$0xf] %vm880_vm0, %v1007_v55  ;;  %v1008_v63 = vpack.c.bf16 %v777_v56, %v777_v56  ;;  %v585_v0 = vadd.f32 %v1056_v57, %v1531_v16  ;;  %v1059_v1 = vadd.f32 %v1058_v62, %v1057_v59  ;;  %v1140_v2 = vpop.f32.mrb[11].mxu1 }
 0x10b   :  { %v1141_v3 = vadd.f32 %v1140_v2, %v1139_v61 }
 0x10c   :  { %884 = vst.msk [vmem:[%s1640_s3 + $0xc] sm:$0xf] %vm880_vm0, %v1008_v63  ;;  %v705_v4 = vadd.f32 %v1138_v60, %v585_v0  ;;  %v588_v5 = vadd.f32 %v1059_v1, %v1531_v16 }
 0x10e   :  { %v778_v6 = vmax.f32 %v705_v4, 0.0  ;;  %v708_v7 = vadd.f32 %v1141_v3, %v588_v5  ;;  %v1060_v8 = vpop.f32.mrb[12].mxu0 }
 0x10f   :  { %v1142_v9 = vpop.f32.mrb[12].mxu1  ;;  %v1061_v10 = vpop.f32.mrb[13].mxu0 }
 0x110   :  { %v1009_v11 = vpack.c.bf16 %v778_v6, %v778_v6  ;;  %v779_v12 = vmax.f32 %v708_v7, 0.0  ;;  %v1062_v13 = vadd.f32 %v1061_v10, %v1060_v8  ;;  %v1143_v14 = vpop.f32.mrb[13].mxu1  ;;  %v1063_v15 = vpop.f32.mrb[14].mxu0 }
 0x111   :  { %v1144_v17 = vadd.f32 %v1143_v14, %v1142_v9  ;;  %v1145_v18 = vpop.f32.mrb[14].mxu1  ;;  %v1064_v19 = vpop.f32.mrb[15].mxu0 }
 0x112   :  { %885 = vst.msk [vmem:[%s1640_s3 + $0x10] sm:$0xf] %vm880_vm0, %v1009_v11  ;;  %v1010_v20 = vpack.c.bf16 %v779_v12, %v779_v12  ;;  %v593_v21 = vadd.f32 %v1062_v13, %v1531_v16  ;;  %v1065_v22 = vadd.f32 %v1064_v19, %v1063_v15  ;;  %v1146_v23 = vpop.f32.mrb[15].mxu1 }
 0x113   :  { %v1147_v24 = vadd.f32 %v1146_v23, %v1145_v18 }
 0x114   :  { %886 = vst.msk [vmem:[%s1640_s3 + $0x14] sm:$0xf] %vm880_vm0, %v1010_v20  ;;  %v713_v25 = vadd.f32 %v1144_v17, %v593_v21  ;;  %v596_v26 = vadd.f32 %v1065_v22, %v1531_v16 }
 0x116   :  { %v780_v27 = vmax.f32 %v713_v25, 0.0  ;;  %v716_v28 = vadd.f32 %v1147_v24, %v596_v26  ;;  %v1066_v29 = vpop.f32.mrb[16].mxu0 }
 0x117   :  { %v1148_v30 = vpop.f32.mrb[16].mxu1  ;;  %v1067_v31 = vpop.f32.mrb[17].mxu0 }
 0x118   :  { %v1011_v32 = vpack.c.bf16 %v780_v27, %v780_v27  ;;  %v781_v33 = vmax.f32 %v716_v28, 0.0  ;;  %v1068_v34 = vadd.f32 %v1067_v31, %v1066_v29  ;;  %v1149_v35 = vpop.f32.mrb[17].mxu1  ;;  %v1069_v36 = vpop.f32.mrb[18].mxu0 }
 0x119   :  { %v1150_v37 = vadd.f32 %v1149_v35, %v1148_v30  ;;  %v1151_v38 = vpop.f32.mrb[18].mxu1  ;;  %v1070_v39 = vpop.f32.mrb[19].mxu0 }
 0x11a   :  { %887 = vst.msk [vmem:[%s1640_s3 + $0x18] sm:$0xf] %vm880_vm0, %v1011_v32  ;;  %v1012_v40 = vpack.c.bf16 %v781_v33, %v781_v33  ;;  %v601_v41 = vadd.f32 %v1068_v34, %v1531_v16  ;;  %v1071_v42 = vadd.f32 %v1070_v39, %v1069_v36  ;;  %v1152_v43 = vpop.f32.mrb[19].mxu1 }
 0x11b   :  { %v1153_v44 = vadd.f32 %v1152_v43, %v1151_v38 }
 0x11c   :  { %888 = vst.msk [vmem:[%s1640_s3 + $0x1c] sm:$0xf] %vm880_vm0, %v1012_v40  ;;  %v721_v45 = vadd.f32 %v1150_v37, %v601_v41  ;;  %v604_v46 = vadd.f32 %v1071_v42, %v1531_v16 }
 0x11e   :  { %v782_v47 = vmax.f32 %v721_v45, 0.0  ;;  %v724_v48 = vadd.f32 %v1153_v44, %v604_v46  ;;  %v1072_v49 = vpop.f32.mrb[20].mxu0 }
 0x11f   :  { %v1154_v50 = vpop.f32.mrb[20].mxu1  ;;  %v1073_v51 = vpop.f32.mrb[21].mxu0 }
 0x120   :  { %v1013_v52 = vpack.c.bf16 %v782_v47, %v782_v47  ;;  %v783_v53 = vmax.f32 %v724_v48, 0.0  ;;  %v1074_v54 = vadd.f32 %v1073_v51, %v1072_v49  ;;  %v1155_v55 = vpop.f32.mrb[21].mxu1  ;;  %v1075_v56 = vpop.f32.mrb[22].mxu0 }
 0x121   :  { %v1156_v57 = vadd.f32 %v1155_v55, %v1154_v50  ;;  %v1157_v58 = vpop.f32.mrb[22].mxu1  ;;  %v1076_v59 = vpop.f32.mrb[23].mxu0 }
 0x122   :  { %889 = vst.msk [vmem:[%s1640_s3 + $0x20] sm:$0xf] %vm880_vm0, %v1013_v52  ;;  %v1014_v60 = vpack.c.bf16 %v783_v53, %v783_v53  ;;  %v609_v61 = vadd.f32 %v1074_v54, %v1531_v16  ;;  %v1077_v62 = vadd.f32 %v1076_v59, %v1075_v56  ;;  %v1158_v63 = vpop.f32.mrb[23].mxu1 }
 0x123   :  { %v1159_v0 = vadd.f32 %v1158_v63, %v1157_v58 }
 0x124   :  { %890 = vst.msk [vmem:[%s1640_s3 + $0x24] sm:$0xf] %vm880_vm0, %v1014_v60  ;;  %v729_v1 = vadd.f32 %v1156_v57, %v609_v61  ;;  %v612_v2 = vadd.f32 %v1077_v62, %v1531_v16 }
 0x126   :  { %v784_v3 = vmax.f32 %v729_v1, 0.0  ;;  %v732_v4 = vadd.f32 %v1159_v0, %v612_v2  ;;  %v1078_v5 = vpop.f32.mrb[24].mxu0 }
 0x127   :  { %v1160_v6 = vpop.f32.mrb[24].mxu1  ;;  %v1079_v7 = vpop.f32.mrb[25].mxu0 }
 0x128   :  { %v1015_v8 = vpack.c.bf16 %v784_v3, %v784_v3  ;;  %v785_v9 = vmax.f32 %v732_v4, 0.0  ;;  %v1080_v10 = vadd.f32 %v1079_v7, %v1078_v5  ;;  %v1161_v11 = vpop.f32.mrb[25].mxu1  ;;  %v1081_v12 = vpop.f32.mrb[26].mxu0 }
 0x129   :  { %v1162_v13 = vadd.f32 %v1161_v11, %v1160_v6  ;;  %v1163_v14 = vpop.f32.mrb[26].mxu1  ;;  %v1082_v15 = vpop.f32.mrb[27].mxu0 }
 0x12a   :  { %891 = vst.msk [vmem:[%s1640_s3 + $0x28] sm:$0xf] %vm880_vm0, %v1015_v8  ;;  %v1016_v17 = vpack.c.bf16 %v785_v9, %v785_v9  ;;  %v617_v18 = vadd.f32 %v1080_v10, %v1531_v16  ;;  %v1083_v19 = vadd.f32 %v1082_v15, %v1081_v12  ;;  %v1164_v20 = vpop.f32.mrb[27].mxu1 }
 0x12b   :  { %v1165_v21 = vadd.f32 %v1164_v20, %v1163_v14 }
 0x12c   :  { %892 = vst.msk [vmem:[%s1640_s3 + $0x2c] sm:$0xf] %vm880_vm0, %v1016_v17  ;;  %v737_v22 = vadd.f32 %v1162_v13, %v617_v18  ;;  %v620_v23 = vadd.f32 %v1083_v19, %v1531_v16 }
 0x12e   :  { %v786_v24 = vmax.f32 %v737_v22, 0.0  ;;  %v740_v25 = vadd.f32 %v1165_v21, %v620_v23  ;;  %v1084_v26 = vpop.f32.mrb[28].mxu0 }
 0x12f   :  { %v1166_v27 = vpop.f32.mrb[28].mxu1  ;;  %v1085_v28 = vpop.f32.mrb[29].mxu0 }
 0x130   :  { %v1017_v29 = vpack.c.bf16 %v786_v24, %v786_v24  ;;  %v787_v30 = vmax.f32 %v740_v25, 0.0  ;;  %v1086_v31 = vadd.f32 %v1085_v28, %v1084_v26  ;;  %v1167_v32 = vpop.f32.mrb[29].mxu1  ;;  %v1087_v33 = vpop.f32.mrb[30].mxu0 }
 0x131   :  { %v1168_v34 = vadd.f32 %v1167_v32, %v1166_v27  ;;  %v1169_v35 = vpop.f32.mrb[30].mxu1  ;;  %v1088_v36 = vpop.f32.mrb[31].mxu0 }
 0x132   :  { %893 = vst.msk [vmem:[%s1640_s3 + $0x30] sm:$0xf] %vm880_vm0, %v1017_v29  ;;  %v1018_v37 = vpack.c.bf16 %v787_v30, %v787_v30  ;;  %v625_v38 = vadd.f32 %v1086_v31, %v1531_v16  ;;  %v1089_v39 = vadd.f32 %v1088_v36, %v1087_v33  ;;  %v1170_v40 = vpop.f32.mrb[31].mxu1 }
 0x133   :  { %v1171_v41 = vadd.f32 %v1170_v40, %v1169_v35 }
 0x134   :  { %894 = vst.msk [vmem:[%s1640_s3 + $0x34] sm:$0xf] %vm880_vm0, %v1018_v37  ;;  %v745_v42 = vadd.f32 %v1168_v34, %v625_v38  ;;  %v628_v43 = vadd.f32 %v1089_v39, %v1531_v16 }
 0x136   :  { %v788_v44 = vmax.f32 %v745_v42, 0.0  ;;  %v748_v45 = vadd.f32 %v1171_v41, %v628_v43  ;;  %v1090_v46 = vpop.f32.mrb[32].mxu0 }
 0x137   :  { %v1172_v47 = vpop.f32.mrb[32].mxu1  ;;  %v1091_v48 = vpop.f32.mrb[33].mxu0 }
 0x138   :  { %v1019_v49 = vpack.c.bf16 %v788_v44, %v788_v44  ;;  %v789_v50 = vmax.f32 %v748_v45, 0.0  ;;  %v1092_v51 = vadd.f32 %v1091_v48, %v1090_v46  ;;  %v1173_v52 = vpop.f32.mrb[33].mxu1  ;;  %v1093_v53 = vpop.f32.mrb[34].mxu0 }
 0x139   :  { %v1174_v54 = vadd.f32 %v1173_v52, %v1172_v47  ;;  %v1175_v55 = vpop.f32.mrb[34].mxu1  ;;  %v1094_v56 = vpop.f32.mrb[35].mxu0 }
 0x13a   :  { %895 = vst.msk [vmem:[%s1640_s3 + $0x38] sm:$0xf] %vm880_vm0, %v1019_v49  ;;  %v1020_v57 = vpack.c.bf16 %v789_v50, %v789_v50  ;;  %v633_v58 = vadd.f32 %v1092_v51, %v1531_v16  ;;  %v1095_v59 = vadd.f32 %v1094_v56, %v1093_v53  ;;  %v1176_v60 = vpop.f32.mrb[35].mxu1 }
 0x13b   :  { %v1177_v61 = vadd.f32 %v1176_v60, %v1175_v55 }
 0x13c   :  { %896 = vst.msk [vmem:[%s1640_s3 + $0x3c] sm:$0xf] %vm880_vm0, %v1020_v57  ;;  %v753_v62 = vadd.f32 %v1174_v54, %v633_v58  ;;  %v636_v63 = vadd.f32 %v1095_v59, %v1531_v16 }
 0x13e   :  { %v790_v0 = vmax.f32 %v753_v62, 0.0  ;;  %v756_v1 = vadd.f32 %v1177_v61, %v636_v63  ;;  %v1096_v2 = vpop.f32.mrb[36].mxu0 }
 0x13f   :  { %v1178_v3 = vpop.f32.mrb[36].mxu1  ;;  %v1097_v4 = vpop.f32.mrb[37].mxu0 }
 0x140   :  { %v1021_v5 = vpack.c.bf16 %v790_v0, %v790_v0  ;;  %v791_v6 = vmax.f32 %v756_v1, 0.0  ;;  %v1098_v7 = vadd.f32 %v1097_v4, %v1096_v2  ;;  %v1179_v8 = vpop.f32.mrb[37].mxu1  ;;  %v1099_v9 = vpop.f32.mrb[38].mxu0 }
 0x141   :  { %v1180_v10 = vadd.f32 %v1179_v8, %v1178_v3  ;;  %v1181_v11 = vpop.f32.mrb[38].mxu1  ;;  %v1100_v12 = vpop.f32.mrb[39].mxu0 }
 0x142   :  { %897 = vst.msk [vmem:[%s1640_s3 + $0x40] sm:$0xf] %vm880_vm0, %v1021_v5  ;;  %v1022_v13 = vpack.c.bf16 %v791_v6, %v791_v6  ;;  %v641_v14 = vadd.f32 %v1098_v7, %v1531_v16  ;;  %v1101_v15 = vadd.f32 %v1100_v12, %v1099_v9  ;;  %v1182_v17 = vpop.f32.mrb[39].mxu1 }
 0x143   :  { %v1183_v18 = vadd.f32 %v1182_v17, %v1181_v11 }
 0x144   :  { %898 = vst.msk [vmem:[%s1640_s3 + $0x44] sm:$0xf] %vm880_vm0, %v1022_v13  ;;  %v761_v19 = vadd.f32 %v1180_v10, %v641_v14  ;;  %v644_v20 = vadd.f32 %v1101_v15, %v1531_v16 }
 0x146   :  { %v792_v21 = vmax.f32 %v761_v19, 0.0  ;;  %v764_v22 = vadd.f32 %v1183_v18, %v644_v20  ;;  %v1102_v23 = vpop.f32.mrb[40].mxu0 }
 0x147   :  { %v1184_v24 = vpop.f32.mrb[40].mxu1  ;;  %v1103_v25 = vpop.f32.mrb[41].mxu0 }
 0x148   :  { %v1023_v26 = vpack.c.bf16 %v792_v21, %v792_v21  ;;  %v793_v27 = vmax.f32 %v764_v22, 0.0  ;;  %v1104_v28 = vadd.f32 %v1103_v25, %v1102_v23  ;;  %v1185_v29 = vpop.f32.mrb[41].mxu1  ;;  %v1105_v30 = vpop.f32.mrb[42].mxu0 }
 0x149   :  { %v1186_v31 = vadd.f32 %v1185_v29, %v1184_v24  ;;  %v1187_v32 = vpop.f32.mrb[42].mxu1  ;;  %v1106_v33 = vpop.f32.mrb[43].mxu0 }
 0x14a   :  { %899 = vst.msk [vmem:[%s1640_s3 + $0x48] sm:$0xf] %vm880_vm0, %v1023_v26  ;;  %v1024_v34 = vpack.c.bf16 %v793_v27, %v793_v27  ;;  %v649_v35 = vadd.f32 %v1104_v28, %v1531_v16  ;;  %v1188_v36 = vpop.f32.mrb[43].mxu1 }
 0x14c   :  { %900 = vst.msk [vmem:[%s1640_s3 + $0x4c] sm:$0xf] %vm880_vm0, %v1024_v34  ;;  %v769_v37 = vadd.f32 %v1186_v31, %v649_v35 }
 0x14e   :  { %v794_v38 = vmax.f32 %v769_v37, 0.0 }
 0x150   :  { %v1025_v39 = vpack.c.bf16 %v794_v38, %v794_v38 }
 0x152   :  { %902 = vst.msk [vmem:[%s1640_s3 + $0x50] sm:$0x1] %vm901_vm1, %v1025_v39 }

// kernel: mario_net_forward.6
= control target key start
LH: loop header
LB: loop body
LE: loop exit
PB: predicated region body
PF: predicated region fallthrough
CT: control target
= control target key end

     0   :  { %v1248_v34 = vmov 0.0   ;;  %vm1249_vm0 = vmmov 0   ;;  %vm516_vm1 = vcmask 523264   ;;  %vm868_vm2 = vcmask 519168   ;;  %s1599_s1 = inlined_call_operand.vmem [shape: bf16[576,64], index: 1, kind: input, shape index: {}]   ;;  %s1600_s0 = inlined_call_operand.vmem [shape: bf16[98,576], index: 0, kind: input, shape index: {}]   ;;  %s1601_s2 = inlined_call_operand.vmem [shape: f32[1,64], index: 2, kind: input, shape index: {}]   ;;  %s1602_s3 = inlined_call_operand.vmem [shape: bf16[98,64], index: 3, kind: output, shape index: {}]  }
   0x1   :  { %v1165_v0 = vld [vmem:[%s1599_s1 + $0x40] sm:$0xff]   ;;  %v1169_v4 = vld [vmem:[%s1599_s1 + $0x48] sm:$0xff]   ;;  %v1173_v8 = vld [vmem:[%s1599_s1 + $0x50] sm:$0xff]   ;;  %vm881_vm3 = vcmask 516096  }
   0x2   :  { %v1166_v1 = vld [vmem:[%s1599_s1 + $0xc0] sm:$0xff]   ;;  %992 = vmatprep.subr.bf16.mxu0 %v1165_v0  ;;  %v1170_v5 = vld [vmem:[%s1599_s1 + $0xc8] sm:$0xff]   ;;  %v1174_v9 = vld [vmem:[%s1599_s1 + $0xd0] sm:$0xff]  }
   0x3   :  { %v1167_v2 = vld [vmem:[%s1599_s1] sm:$0xff]   ;;  %1050 = vmatprep.subr.bf16.mxu1 %v1166_v1  ;;  %v1171_v6 = vld [vmem:[%s1599_s1 + $0x8] sm:$0xff]   ;;  %v1175_v10 = vld [vmem:[%s1599_s1 + $0x10] sm:$0xff]  }
   0x4   :  { %v1168_v3 = vld [vmem:[%s1599_s1 + $0x80] sm:$0xff]   ;;  %993 = vmatpush3.bf16.msra.mxu0 %v1167_v2  ;;  %v1172_v7 = vld [vmem:[%s1599_s1 + $0x88] sm:$0xff]   ;;  %v1176_v11 = vld [vmem:[%s1599_s1 + $0x90] sm:$0xff]  }
   0x5   :  { %1051 = vmatpush3.bf16.msra.mxu1 %v1168_v3  ;;  %994 = vmatprep.subr.bf16.mxu0 %v1169_v4  ;;  %v1177_v12 = vld [vmem:[%s1599_s1 + $0x58] sm:$0xff]   ;;  %v1181_v16 = vld [vmem:[%s1599_s1 + $0x60] sm:$0xff]   ;;  %v1185_v20 = vld [vmem:[%s1599_s1 + $0x68] sm:$0xff]  }
   0x6   :  { %1052 = vmatprep.subr.bf16.mxu1 %v1170_v5  ;;  %v1178_v13 = vld [vmem:[%s1599_s1 + $0xd8] sm:$0xff]   ;;  %v1182_v17 = vld [vmem:[%s1599_s1 + $0xe0] sm:$0xff]   ;;  %v1186_v21 = vld [vmem:[%s1599_s1 + $0xe8] sm:$0xff]  }
   0x7   :  { %v1179_v14 = vld [vmem:[%s1599_s1 + $0x18] sm:$0xff]   ;;  %v1183_v18 = vld [vmem:[%s1599_s1 + $0x20] sm:$0xff]   ;;  %v1187_v22 = vld [vmem:[%s1599_s1 + $0x28] sm:$0xff]  }
   0x8   :  { %995 = vmatpush3.bf16.msra.mxu0 %v1171_v6  ;;  %v1180_v15 = vld [vmem:[%s1599_s1 + $0x98] sm:$0xff]   ;;  %v1184_v19 = vld [vmem:[%s1599_s1 + $0xa0] sm:$0xff]   ;;  %v1188_v23 = vld [vmem:[%s1599_s1 + $0xa8] sm:$0xff]  }
   0x9   :  { %1053 = vmatpush3.bf16.msra.mxu1 %v1172_v7  ;;  %996 = vmatprep.subr.bf16.mxu0 %v1173_v8  ;;  %v1189_v24 = vld [vmem:[%s1599_s1 + $0x70] sm:$0xff]   ;;  %v1193_v28 = vld [vmem:[%s1599_s1 + $0x78] sm:$0xff]   ;;  %v1202_v36 = vld [vmem:[%s1600_s0 + $0xc] ss:$20 sps:$4 sm:$0xff]  }
   0xa   :  { %1054 = vmatprep.subr.bf16.mxu1 %v1174_v9  ;;  %v1190_v25 = vld [vmem:[%s1599_s1 + $0xf0] sm:$0xff]   ;;  %v1194_v29 = vld [vmem:[%s1599_s1 + $0xf8] sm:$0xff]   ;;  %v1203_v37 = vld [vmem:[%s1599_s1 + $0x100] sm:$0xff]   ;;  %658 = vmatprep.mubr.bf16.mxu1 %v1202_v36 }
   0xb   :  { %v1191_v26 = vld [vmem:[%s1599_s1 + $0x30] sm:$0xff]   ;;  %v1195_v30 = vld [vmem:[%s1599_s1 + $0x38] sm:$0xff]   ;;  %v1204_v38 = vld [vmem:[%s1600_s0 + $0x2c] ss:$20 sps:$4 sm:$0xff]  }
   0xc   :  { %997 = vmatpush3.bf16.msra.mxu0 %v1175_v10  ;;  %v1192_v27 = vld [vmem:[%s1599_s1 + $0xb0] sm:$0xff]   ;;  %v1196_v31 = vld [vmem:[%s1599_s1 + $0xb8] sm:$0xff]   ;;  %v1214_v43 = vld [vmem:[%s1599_s1 + $0x108] sm:$0xff]  }
   0xd   :  { %1055 = vmatpush3.bf16.msra.mxu1 %v1176_v11  ;;  %998 = vmatprep.subr.bf16.mxu0 %v1177_v12  ;;  %v1197_v32 = vld [vmem:[%s1600_s0] ss:$20 sps:$4 sm:$0xff]   ;;  %v1199_v33 = vld [vmem:[%s1600_s0 + $0x4] ss:$20 sps:$4 sm:$0xff]   ;;  %v1200_v35 = vld [vmem:[%s1600_s0 + $0x8] ss:$20 sps:$4 sm:$0xff]  }
   0xe   :  { %1056 = vmatprep.subr.bf16.mxu1 %v1178_v13  ;;  %570 = vmatprep.mubr.bf16.mxu0 %v1199_v33  ;;  %v1206_v39 = vld [vmem:[%s1600_s0 + $0x34] ss:$20 sps:$4 sm:$0xff]   ;;  %v1209_v41 = vld [vmem:[%s1600_s0 + $0x30] ss:$20 sps:$4 sm:$0xff]   ;;  %v1216_v47 = vld [vmem:[%s1600_s0 + $0x58] ss:$20 sps:$4 sm:$0xff]  }
   0xf   :  { %v1208_v40 = vld [vmem:[%s1600_s0 + $0x28] ss:$20 sps:$4 sm:$0xff]   ;;  %v1223_v45 = vld [vmem:[%s1599_s1 + $0x110] sm:$0xff]   ;;  %v1219_v49 = vld [vmem:[%s1600_s0 + $0x84] ss:$20 sps:$4 sm:$0xff]  }
  0x10   :  { %999 = vmatpush3.bf16.msra.mxu0 %v1179_v14  ;;  %v1210_v42 = vld [vmem:[%s1600_s0 + $0x54] ss:$20 sps:$4 sm:$0xff]   ;;  %v1212_v44 = vld [vmem:[%s1600_s0 + $0x5c] ss:$20 sps:$4 sm:$0xff]   ;;  %v1221_v51 = vld [vmem:[%s1600_s0 + $0x78] ss:$20 sps:$4 sm:$0xff]  }
  0x11   :  { %1057 = vmatpush3.bf16.msra.mxu1 %v1180_v15  ;;  %1000 = vmatprep.subr.bf16.mxu0 %v1181_v16  ;;  %v1215_v46 = vld [vmem:[%s1600_s0 + $0x50] ss:$20 sps:$4 sm:$0xff]   ;;  %v1236_v50 = vld [vmem:[%s1599_s1 + $0x118] sm:$0xff]   ;;  %v1222_v52 = vld [vmem:[%s1600_s0 + $0x80] ss:$20 sps:$4 sm:$0xff]  }
  0x12   :  { %1058 = vmatprep.subr.bf16.mxu1 %v1182_v17  ;;  %v1217_v48 = vld [vmem:[%s1600_s0 + $0x7c] ss:$20 sps:$4 sm:$0xff]   ;;  %v1224_v53 = vld [vmem:[%s1600_s0 + $0xa4] ss:$20 sps:$4 sm:$0xff]   ;;  %v1226_v54 = vld [vmem:[%s1600_s0 + $0xac] ss:$20 sps:$4 sm:$0xff]  }
  0x13   :  { %v1228_v55 = vld [vmem:[%s1600_s0 + $0xa0] ss:$20 sps:$4 sm:$0xff]   ;;  %v1229_v56 = vld [vmem:[%s1600_s0 + $0xa8] ss:$20 sps:$4 sm:$0xff]   ;;  %v1235_v62 = vld [vmem:[%s1600_s0 + $0xd0] ss:$20 sps:$4 sm:$0xff]  }
  0x14   :  { %1001 = vmatpush3.bf16.msra.mxu0 %v1183_v18  ;;  %v1230_v57 = vld [vmem:[%s1600_s0 + $0xcc] ss:$20 sps:$4 sm:$0xff]   ;;  %v1232_v58 = vld [vmem:[%s1600_s0 + $0xd4] ss:$20 sps:$4 sm:$0xff]   ;;  %v52_v60 = vld [vmem:[%s1600_s0 + $0xf8] sm:$0x11] }
  0x15   :  { %1059 = vmatpush3.bf16.msra.mxu1 %v1184_v19  ;;  %1002 = vmatprep.subr.bf16.mxu0 %v1185_v20  ;;  %v51_v59 = vld [vmem:[%s1600_s0 + $0xf0] sm:$0x11]  ;;  %v1234_v61 = vld [vmem:[%s1600_s0 + $0xc8] ss:$20 sps:$4 sm:$0xff]   ;;  %v921_v0 = vcombine.high %v52_v60, %v52_v60  ;;  %v920_v2 = vcombine.low %v52_v60, %v52_v60  ;;  %v1243_v5 = vld [vmem:[%s1600_s0 + $0x38] ss:$20 sps:$4 sm:$0xff]  }
  0x16   :  { %1060 = vmatprep.subr.bf16.mxu1 %v1186_v21  ;;  %v919_v63 = vcombine.high %v51_v59, %v51_v59  ;;  %v918_v1 = vcombine.low %v51_v59, %v51_v59  ;;  %v1241_v3 = vld [vmem:[%s1600_s0 + $0x10] ss:$20 sps:$4 sm:$0xff]   ;;  %v1244_v6 = vld [vmem:[%s1600_s0 + $0xd8] ss:$20 sps:$4 sm:$0xff]   ;;  %v1245_v7 = vld [vmem:[%s1600_s0 + $0x60] ss:$20 sps:$4 sm:$0xff]  }
  0x17   :  { %v1242_v4 = vld [vmem:[%s1600_s0 + $0xb0] ss:$20 sps:$4 sm:$0xff]   ;;  %v1246_v8 = vld [vmem:[%s1600_s0 + $0x100] ss:$0 sps:$4 sm:$0x11]  }
  0x18   :  { %1003 = vmatpush3.bf16.msra.mxu0 %v1187_v22  ;;  %v1247_v9 = vld [vmem:[%s1600_s0 + $0x88] ss:$20 sps:$4 sm:$0xff]   ;;  %v1509_v11 = vld [vmem:[%s1601_s2] ss:$0 sm:$0xff] }
  0x19   :  { %1061 = vmatpush3.bf16.msra.mxu1 %v1188_v23  ;;  %1004 = vmatprep.subr.bf16.mxu0 %v1189_v24 }
  0x1a   :  { %1062 = vmatprep.subr.bf16.mxu1 %v1190_v25 }
  0x1c   :  { %1005 = vmatpush3.bf16.msra.mxu0 %v1191_v26 }
  0x1d   :  { %1063 = vmatpush3.bf16.msra.mxu1 %v1192_v27  ;;  %1006 = vmatprep.subr.bf16.mxu0 %v1193_v28 }
  0x1e   :  { %1064 = vmatprep.subr.bf16.mxu1 %v1194_v29 }
  0x20   :  { %1007 = vmatpush3.bf16.msra.mxu0 %v1195_v30 }
  0x21   :  { %1065 = vmatpush3.bf16.msra.mxu1 %v1196_v31  ;;  %1119 = vmatprep.subr.bf16.mxu0 %v1248_v34 }
  0x22   :  { %1155 = vmatprep.subr.bf16.mxu1 %v1248_v34 }
  0x23   :  { %571 = vmatmul.mubr.bf16.vlgmr.msra.gmra.mrb[0].mxu0 %v1197_v32 }
  0x24   :  { %659 = vmatmul.mubr.bf16.vlgmr.msra.gmra.mrb[0].mxu1 %v1200_v35  ;;  %1120 = vmatpush3.bf16.msra.mxu0 %v1203_v37 }
  0x25   :  { %578 = vmatprep.mubr.bf16.mxu0 %v1204_v38  ;;  %1159 = vmatpush3.bf16.msra.mxu1 %v1203_v37 }
  0x26   :  { %666 = vmatprep.mubr.bf16.mxu1 %v1206_v39  ;;  %1121 = vmatprep.subr.bf16.mxu0 %v1248_v34 }
  0x27   :  { %1156 = vmatprep.subr.bf16.mxu1 %v1248_v34 }
  0x28   :  { %1122 = vmatpush3.bf16.msra.mxu0 %v1214_v43 }
  0x29   :  { %1160 = vmatpush3.bf16.msra.mxu1 %v1214_v43  ;;  %1123 = vmatprep.subr.bf16.mxu0 %v1248_v34 }
  0x2a   :  { %1157 = vmatprep.subr.bf16.mxu1 %v1248_v34 }
  0x2b   :  { %579 = vmatmul.mubr.bf16.gmra.mrb[4].mxu0 %v1208_v40 }
  0x2c   :  { %667 = vmatmul.mubr.bf16.gmra.mrb[4].mxu1 %v1209_v41  ;;  %586 = vmatprep.mubr.bf16.mxu0 %v1210_v42 }
  0x2d   :  { %674 = vmatprep.mubr.bf16.mxu1 %v1212_v44  ;;  %1124 = vmatpush3.bf16.msra.mxu0 %v1223_v45 }
  0x2e   :  { %1161 = vmatpush3.bf16.msra.mxu1 %v1223_v45  ;;  %1125 = vmatprep.subr.bf16.mxu0 %v1248_v34 }
  0x2f   :  { %1158 = vmatprep.subr.bf16.mxu1 %v1248_v34 }
  0x31   :  { %1126 = vmatpush3.bf16.msra.mxu0 %v1236_v50 }
  0x32   :  { %1162 = vmatpush3.bf16.msra.mxu1 %v1236_v50 }
  0x33   :  { %587 = vmatmul.mubr.bf16.gmra.mrb[8].mxu0 %v1215_v46 }
  0x34   :  { %675 = vmatmul.mubr.bf16.gmra.mrb[8].mxu1 %v1216_v47  ;;  %594 = vmatprep.mubr.bf16.mxu0 %v1217_v48 }
  0x35   :  { %682 = vmatprep.mubr.bf16.mxu1 %v1219_v49 }
  0x3b   :  { %595 = vmatmul.mubr.bf16.gmra.mrb[12].mxu0 %v1221_v51 }
  0x3c   :  { %683 = vmatmul.mubr.bf16.gmra.mrb[12].mxu1 %v1222_v52  ;;  %602 = vmatprep.mubr.bf16.mxu0 %v1224_v53 }
  0x3d   :  { %690 = vmatprep.mubr.bf16.mxu1 %v1226_v54 }
  0x43   :  { %603 = vmatmul.mubr.bf16.gmra.mrb[16].mxu0 %v1228_v55 }
  0x44   :  { %691 = vmatmul.mubr.bf16.gmra.mrb[16].mxu1 %v1229_v56  ;;  %610 = vmatprep.mubr.bf16.mxu0 %v1230_v57 }
  0x45   :  { %698 = vmatprep.mubr.bf16.mxu1 %v1232_v58 }
  0x4b   :  { %611 = vmatmul.mubr.bf16.gmra.mrb[20].mxu0 %v1234_v61 }
  0x4c   :  { %699 = vmatmul.mubr.bf16.gmra.mrb[20].mxu1 %v1235_v62  ;;  %618 = vmatprep.mubr.bf16.mxu0 %v919_v63 }
  0x4d   :  { %706 = vmatprep.mubr.bf16.mxu1 %v921_v0 }
  0x53   :  { %619 = vmatmul.mubr.bf16.gmra.mrb[24].mxu0 %v918_v1 }
  0x54   :  { %707 = vmatmul.mubr.bf16.gmra.mrb[24].mxu1 %v920_v2  ;;  %1127 = vmatprep.mubr.msk.bf16.mxu0 %vm1249_vm0, %v1248_v34 }
  0x55   :  { %1143 = vmatprep.mubr.msk.bf16.mxu1 %vm1249_vm0, %v1248_v34 }
  0x5b   :  { %1128 = vmatmul.mubr.msk.bf16.vlgmr.msra.gmra.mrb[28].mxu0 %vm516_vm1, %v1241_v3 }
  0x5c   :  { %1144 = vmatmul.mubr.msk.bf16.vlgmr.msra.gmra.mrb[28].mxu1 %vm516_vm1, %v1242_v4  ;;  %1131 = vmatprep.mubr.msk.bf16.mxu0 %vm1249_vm0, %v1248_v34 }
  0x5d   :  { %1147 = vmatprep.mubr.msk.bf16.mxu1 %vm1249_vm0, %v1248_v34 }
  0x63   :  { %1132 = vmatmul.mubr.msk.bf16.gmra.mrb[32].mxu0 %vm516_vm1, %v1243_v5 }
  0x64   :  { %1148 = vmatmul.mubr.msk.bf16.gmra.mrb[32].mxu1 %vm516_vm1, %v1244_v6  ;;  %1135 = vmatprep.mubr.msk.bf16.mxu0 %vm1249_vm0, %v1248_v34 }
  0x65   :  { %1151 = vmatprep.mubr.msk.bf16.mxu1 %vm1249_vm0, %v1248_v34 }
  0x6b   :  { %1136 = vmatmul.mubr.msk.bf16.gmra.mrb[36].mxu0 %vm516_vm1, %v1245_v7 }
  0x6c   :  { %1152 = vmatmul.mubr.msk.bf16.gmra.mrb[36].mxu1 %vm516_vm1, %v1246_v8  ;;  %1139 = vmatprep.mubr.msk.bf16.mxu0 %vm1249_vm0, %v1248_v34 }
  0x73   :  { %1140 = vmatmul.mubr.msk.bf16.gmra.mrb[40].mxu0 %vm516_vm1, %v1247_v9 }
  0xf6   :  { %v1008_v10 = vpop.f32.mrb[0].mxu0 }
  0xf7   :  { %v1009_v12 = vpop.f32.mrb[1].mxu0  ;;  %v1066_v13 = vpop.f32.mrb[0].mxu1 }
  0xf8   :  { %v1010_v14 = vadd.f32 %v1009_v12, %v1008_v10  ;;  %v1011_v15 = vpop.f32.mrb[2].mxu0  ;;  %v1067_v16 = vpop.f32.mrb[1].mxu1 }
  0xf9   :  { %v1012_v17 = vpop.f32.mrb[3].mxu0  ;;  %v1068_v18 = vadd.f32 %v1067_v16, %v1066_v13  ;;  %v1069_v19 = vpop.f32.mrb[2].mxu1 }
  0xfa   :  { %v573_v20 = vadd.f32 %v1010_v14, %v1509_v11  ;;  %v1013_v21 = vadd.f32 %v1012_v17, %v1011_v15  ;;  %v1070_v22 = vpop.f32.mrb[3].mxu1 }
  0xfb   :  { %v1071_v23 = vadd.f32 %v1070_v22, %v1069_v19 }
  0xfc   :  { %v576_v24 = vadd.f32 %v1013_v21, %v1509_v11  ;;  %v1513_v25 = vadd.f32 %v1068_v18, %v573_v20 }
  0xfe   :  { %v1014_v26 = vpop.f32.mrb[4].mxu0  ;;  %v1515_v27 = vadd.f32 %v1071_v23, %v576_v24 }
  0xff   :  { %v1015_v28 = vpop.f32.mrb[5].mxu0  ;;  %v1072_v29 = vpop.f32.mrb[4].mxu1 }
 0x100   :  { %v1016_v30 = vadd.f32 %v1015_v28, %v1014_v26  ;;  %v1017_v31 = vpop.f32.mrb[6].mxu0  ;;  %v1073_v32 = vpop.f32.mrb[5].mxu1 }
 0x101   :  { %v1018_v33 = vpop.f32.mrb[7].mxu0  ;;  %v1074_v34 = vadd.f32 %v1073_v32, %v1072_v29  ;;  %v1075_v35 = vpop.f32.mrb[6].mxu1 }
 0x102   :  { %v581_v36 = vadd.f32 %v1016_v30, %v1509_v11  ;;  %v1019_v37 = vadd.f32 %v1018_v33, %v1017_v31  ;;  %v1076_v38 = vpop.f32.mrb[7].mxu1 }
 0x103   :  { %v1077_v39 = vadd.f32 %v1076_v38, %v1075_v35 }
 0x104   :  { %v584_v40 = vadd.f32 %v1019_v37, %v1509_v11  ;;  %v1519_v41 = vadd.f32 %v1074_v34, %v581_v36 }
 0x106   :  { %v1020_v42 = vpop.f32.mrb[8].mxu0  ;;  %v1521_v43 = vadd.f32 %v1077_v39, %v584_v40 }
 0x107   :  { %v1021_v44 = vpop.f32.mrb[9].mxu0  ;;  %v1078_v45 = vpop.f32.mrb[8].mxu1 }
 0x108   :  { %v1022_v46 = vadd.f32 %v1021_v44, %v1020_v42  ;;  %v1023_v47 = vpop.f32.mrb[10].mxu0  ;;  %v1079_v48 = vpop.f32.mrb[9].mxu1 }
 0x109   :  { %v1024_v49 = vpop.f32.mrb[11].mxu0  ;;  %v1080_v50 = vadd.f32 %v1079_v48, %v1078_v45  ;;  %v1081_v51 = vpop.f32.mrb[10].mxu1 }
 0x10a   :  { %v589_v52 = vadd.f32 %v1022_v46, %v1509_v11  ;;  %v1025_v53 = vadd.f32 %v1024_v49, %v1023_v47  ;;  %v1082_v54 = vpop.f32.mrb[11].mxu1 }
 0x10b   :  { %v1083_v55 = vadd.f32 %v1082_v54, %v1081_v51 }
 0x10c   :  { %v592_v56 = vadd.f32 %v1025_v53, %v1509_v11  ;;  %v1525_v57 = vadd.f32 %v1080_v50, %v589_v52 }
 0x10e   :  { %v1026_v58 = vpop.f32.mrb[12].mxu0  ;;  %v1527_v59 = vadd.f32 %v1083_v55, %v592_v56 }
 0x10f   :  { %v1027_v60 = vpop.f32.mrb[13].mxu0  ;;  %v1084_v61 = vpop.f32.mrb[12].mxu1 }
 0x110   :  { %v1028_v62 = vadd.f32 %v1027_v60, %v1026_v58  ;;  %v1029_v63 = vpop.f32.mrb[14].mxu0  ;;  %v1085_v0 = vpop.f32.mrb[13].mxu1 }
 0x111   :  { %v1030_v1 = vpop.f32.mrb[15].mxu0  ;;  %v1086_v2 = vadd.f32 %v1085_v0, %v1084_v61  ;;  %v1087_v3 = vpop.f32.mrb[14].mxu1 }
 0x112   :  { %v597_v4 = vadd.f32 %v1028_v62, %v1509_v11  ;;  %v1031_v5 = vadd.f32 %v1030_v1, %v1029_v63  ;;  %v1088_v6 = vpop.f32.mrb[15].mxu1 }
 0x113   :  { %v1089_v7 = vadd.f32 %v1088_v6, %v1087_v3 }
 0x114   :  { %v600_v8 = vadd.f32 %v1031_v5, %v1509_v11  ;;  %v1531_v9 = vadd.f32 %v1086_v2, %v597_v4 }
 0x116   :  { %v1032_v10 = vpop.f32.mrb[16].mxu0  ;;  %v1533_v12 = vadd.f32 %v1089_v7, %v600_v8 }
 0x117   :  { %v1033_v13 = vpop.f32.mrb[17].mxu0  ;;  %v1090_v14 = vpop.f32.mrb[16].mxu1 }
 0x118   :  { %v1034_v15 = vadd.f32 %v1033_v13, %v1032_v10  ;;  %v1035_v16 = vpop.f32.mrb[18].mxu0  ;;  %v1091_v17 = vpop.f32.mrb[17].mxu1 }
 0x119   :  { %v1036_v18 = vpop.f32.mrb[19].mxu0  ;;  %v1092_v19 = vadd.f32 %v1091_v17, %v1090_v14  ;;  %v1093_v20 = vpop.f32.mrb[18].mxu1 }
 0x11a   :  { %v605_v21 = vadd.f32 %v1034_v15, %v1509_v11  ;;  %v1037_v22 = vadd.f32 %v1036_v18, %v1035_v16  ;;  %v1094_v23 = vpop.f32.mrb[19].mxu1 }
 0x11b   :  { %v1095_v24 = vadd.f32 %v1094_v23, %v1093_v20 }
 0x11c   :  { %v608_v26 = vadd.f32 %v1037_v22, %v1509_v11  ;;  %v693_v28 = vadd.f32 %v1092_v19, %v605_v21 }
 0x11e   :  { %v1038_v29 = vpop.f32.mrb[20].mxu0  ;;  %v696_v30 = vadd.f32 %v1095_v24, %v608_v26 }
 0x11f   :  { %v1039_v31 = vpop.f32.mrb[21].mxu0  ;;  %v1096_v32 = vpop.f32.mrb[20].mxu1 }
 0x120   :  { %v1040_v33 = vadd.f32 %v1039_v31, %v1038_v29  ;;  %v1041_v34 = vpop.f32.mrb[22].mxu0  ;;  %v1097_v35 = vpop.f32.mrb[21].mxu1 }
 0x121   :  { %v1042_v36 = vpop.f32.mrb[23].mxu0  ;;  %v1098_v37 = vadd.f32 %v1097_v35, %v1096_v32  ;;  %v1099_v38 = vpop.f32.mrb[22].mxu1 }
 0x122   :  { %v613_v39 = vadd.f32 %v1040_v33, %v1509_v11  ;;  %v1043_v40 = vadd.f32 %v1042_v36, %v1041_v34  ;;  %v1100_v42 = vpop.f32.mrb[23].mxu1 }
 0x123   :  { %v1101_v44 = vadd.f32 %v1100_v42, %v1099_v38 }
 0x124   :  { %v616_v45 = vadd.f32 %v1043_v40, %v1509_v11  ;;  %v701_v46 = vadd.f32 %v1098_v37, %v613_v39 }
 0x126   :  { %v1044_v47 = vpop.f32.mrb[24].mxu0  ;;  %v704_v48 = vadd.f32 %v1101_v44, %v616_v45 }
 0x127   :  { %v1045_v49 = vpop.f32.mrb[25].mxu0  ;;  %v1102_v50 = vpop.f32.mrb[24].mxu1 }
 0x128   :  { %v1046_v51 = vadd.f32 %v1045_v49, %v1044_v47  ;;  %v1047_v52 = vpop.f32.mrb[26].mxu0  ;;  %v1103_v53 = vpop.f32.mrb[25].mxu1 }
 0x129   :  { %v1048_v54 = vpop.f32.mrb[27].mxu0  ;;  %v1104_v55 = vadd.f32 %v1103_v53, %v1102_v50  ;;  %v1105_v56 = vpop.f32.mrb[26].mxu1 }
 0x12a   :  { %v621_v58 = vadd.f32 %v1046_v51, %v1509_v11  ;;  %v1106_v60 = vpop.f32.mrb[27].mxu1 }
 0x12c   :  { %v709_v61 = vadd.f32 %v1104_v55, %v621_v58 }
 0x12e   :  { %v748_v62 = vpop.f32.mrb[28].mxu0 }
 0x12f   :  { %v749_v63 = vadd.f32 %v748_v62, %v1513_v25  ;;  %v780_v0 = vpop.f32.mrb[28].mxu1  ;;  %v1129_v1 = vpop.f32.mrb[29].mxu0 }
 0x130   :  { %v781_v2 = vadd.f32 %v780_v0, %v693_v28  ;;  %v1145_v3 = vpop.f32.mrb[29].mxu1  ;;  %v751_v4 = vpop.f32.mrb[30].mxu0 }
 0x131   :  { %v802_v5 = vmax.f32 %v749_v63, 0.0  ;;  %v752_v6 = vadd.f32 %v751_v4, %v1515_v27  ;;  %v783_v7 = vpop.f32.mrb[30].mxu1  ;;  %v1130_v8 = vpop.f32.mrb[31].mxu0 }
 0x132   :  { %v810_v10 = vmax.f32 %v781_v2, 0.0  ;;  %v784_v13 = vadd.f32 %v783_v7, %v696_v30  ;;  %v1146_v14 = vpop.f32.mrb[31].mxu1 }
 0x133   :  { %v979_v11 = vpack.c.bf16 %v802_v5, %v802_v5  ;;  %v803_v15 = vmax.f32 %v752_v6, 0.0 }
 0x134   :  { %v987_v16 = vpack.c.bf16 %v810_v10, %v810_v10  ;;  %v811_v17 = vmax.f32 %v784_v13, 0.0 }
 0x135   :  { %869 = vst.msk [vmem:[%s1602_s3] sm:$0xf] %vm868_vm2, %v979_v11  ;;  %v980_v25 = vpack.c.bf16 %v803_v15, %v803_v15 }
 0x136   :  { %877 = vst.msk [vmem:[%s1602_s3 + $0x20] sm:$0xf] %vm868_vm2, %v987_v16  ;;  %v988_v27 = vpack.c.bf16 %v811_v17, %v811_v17  ;;  %v756_v18 = vpop.f32.mrb[32].mxu0 }
 0x137   :  { %870 = vst.msk [vmem:[%s1602_s3 + $0x4] sm:$0xf] %vm868_vm2, %v980_v25  ;;  %v757_v19 = vadd.f32 %v756_v18, %v1519_v41  ;;  %v788_v20 = vpop.f32.mrb[32].mxu1  ;;  %v1133_v21 = vpop.f32.mrb[33].mxu0 }
 0x138   :  { %878 = vst.msk [vmem:[%s1602_s3 + $0x24] sm:$0xf] %vm868_vm2, %v988_v27  ;;  %v789_v22 = vadd.f32 %v788_v20, %v701_v46  ;;  %v1149_v23 = vpop.f32.mrb[33].mxu1  ;;  %v759_v24 = vpop.f32.mrb[34].mxu0 }
 0x139   :  { %v804_v26 = vmax.f32 %v757_v19, 0.0  ;;  %v760_v28 = vadd.f32 %v759_v24, %v1521_v43  ;;  %v791_v29 = vpop.f32.mrb[34].mxu1  ;;  %v1134_v30 = vpop.f32.mrb[35].mxu0 }
 0x13a   :  { %v812_v31 = vmax.f32 %v789_v22, 0.0  ;;  %v792_v32 = vadd.f32 %v791_v29, %v704_v48  ;;  %v1150_v33 = vpop.f32.mrb[35].mxu1 }
 0x13b   :  { %v981_v34 = vpack.c.bf16 %v804_v26, %v804_v26  ;;  %v805_v41 = vmax.f32 %v760_v28, 0.0 }
 0x13c   :  { %v989_v35 = vpack.c.bf16 %v812_v31, %v812_v31  ;;  %v813_v36 = vmax.f32 %v792_v32, 0.0 }
 0x13d   :  { %871 = vst.msk [vmem:[%s1602_s3 + $0x8] sm:$0xf] %vm868_vm2, %v981_v34  ;;  %v982_v37 = vpack.c.bf16 %v805_v41, %v805_v41 }
 0x13e   :  { %879 = vst.msk [vmem:[%s1602_s3 + $0x28] sm:$0xf] %vm868_vm2, %v989_v35  ;;  %v990_v43 = vpack.c.bf16 %v813_v36, %v813_v36  ;;  %v764_v38 = vpop.f32.mrb[36].mxu0 }
 0x13f   :  { %872 = vst.msk [vmem:[%s1602_s3 + $0xc] sm:$0xf] %vm868_vm2, %v982_v37  ;;  %v765_v39 = vadd.f32 %v764_v38, %v1525_v57  ;;  %v796_v40 = vpop.f32.mrb[36].mxu1  ;;  %v1137_v42 = vpop.f32.mrb[37].mxu0 }
 0x140   :  { %880 = vst.msk [vmem:[%s1602_s3 + $0x2c] sm:$0xf] %vm868_vm2, %v990_v43  ;;  %v797_v44 = vadd.f32 %v796_v40, %v709_v61  ;;  %v767_v45 = vpop.f32.mrb[38].mxu0  ;;  %v1153_v46 = vpop.f32.mrb[37].mxu1 }
 0x141   :  { %v806_v47 = vmax.f32 %v765_v39, 0.0  ;;  %v768_v48 = vadd.f32 %v767_v45, %v1527_v59  ;;  %v1138_v49 = vpop.f32.mrb[39].mxu0  ;;  %v799_v50 = vpop.f32.mrb[38].mxu1 }
 0x142   :  { %v814_v51 = vmax.f32 %v797_v44, 0.0  ;;  %v1154_v52 = vpop.f32.mrb[39].mxu1 }
 0x143   :  { %v983_v53 = vpack.c.bf16 %v806_v47, %v806_v47  ;;  %v807_v57 = vmax.f32 %v768_v48, 0.0 }
 0x144   :  { %v991_v54 = vpack.c.bf16 %v814_v51, %v814_v51 }
 0x145   :  { %873 = vst.msk [vmem:[%s1602_s3 + $0x10] sm:$0xf] %vm868_vm2, %v983_v53  ;;  %v984_v55 = vpack.c.bf16 %v807_v57, %v807_v57 }
 0x146   :  { %882 = vst.msk [vmem:[%s1602_s3 + $0x30] sm:$0x1] %vm881_vm3, %v991_v54  ;;  %v772_v56 = vpop.f32.mrb[40].mxu0 }
 0x147   :  { %874 = vst.msk [vmem:[%s1602_s3 + $0x14] sm:$0xf] %vm868_vm2, %v984_v55  ;;  %v773_v59 = vadd.f32 %v772_v56, %v1531_v9  ;;  %v1141_v58 = vpop.f32.mrb[41].mxu0 }
 0x148   :  { %v775_v60 = vpop.f32.mrb[42].mxu0 }
 0x149   :  { %v808_v61 = vmax.f32 %v773_v59, 0.0  ;;  %v776_v62 = vadd.f32 %v775_v60, %v1533_v12  ;;  %v1142_v63 = vpop.f32.mrb[43].mxu0 }
 0x14b   :  { %v985_v0 = vpack.c.bf16 %v808_v61, %v808_v61  ;;  %v809_v1 = vmax.f32 %v776_v62, 0.0 }
 0x14d   :  { %875 = vst.msk [vmem:[%s1602_s3 + $0x18] sm:$0xf] %vm868_vm2, %v985_v0  ;;  %v986_v2 = vpack.c.bf16 %v809_v1, %v809_v1 }
 0x14f   :  { %876 = vst.msk [vmem:[%s1602_s3 + $0x1c] sm:$0xf] %vm868_vm2, %v986_v2 }

// kernel: mario_net_forward.7
= control target key start
LH: loop header
LB: loop body
LE: loop exit
PB: predicated region body
PF: predicated region fallthrough
CT: control target
= control target key end

     0   :  { %v812_v36 = vlaneseq  ;;  %v8582_v37 = vmov 1966171168   ;;  %s11224_s0 = inlined_call_operand.vmem [shape: bf16[2,3136], index: 0, kind: input, shape index: {}]   ;;  %s11225_s1 = inlined_call_operand.vmem [shape: bf16[3136,512], index: 1, kind: input, shape index: {}]   ;;  %s11226_s2 = inlined_call_operand.vmem [shape: f32[1,512], index: 2, kind: input, shape index: {}]   ;;  %s11227_s3 = inlined_call_operand.vmem [shape: bf16[512,12], index: 3, kind: input, shape index: {}]   ;;  %s11228_s4 = inlined_call_operand.vmem [shape: f32[1,12], index: 4, kind: input, shape index: {}]   ;;  %s11229_s5 = inlined_call_operand.hbm [shape: f32[2,12], index: 5, kind: output, shape index: {}]  }
   0x1   :  { %v7345_v0 = vld [vmem:[%s11225_s1 + $0x4] ss:$16 sps:$4 sm:$0xff]   ;;  %v7347_v1 = vld [vmem:[%s11225_s1 + $0xc] ss:$16 sps:$4 sm:$0xff]   ;;  %v7349_v2 = vld [vmem:[%s11225_s1] ss:$16 sps:$4 sm:$0xff]   ;;  %v838_v38 = vunpack.c.l.s4 %v8582_v37 }
   0x2   :  { %4945 = vmatprep.subr.bf16.mxu0 %v7345_v0  ;;  %v7350_v3 = vld [vmem:[%s11225_s1 + $0x8] ss:$16 sps:$4 sm:$0xff]   ;;  %5478 = vmatprep.subr.bf16.mxu1 %v7347_v1  ;;  %v7351_v4 = vld [vmem:[%s11225_s1 + $0x24] ss:$16 sps:$4 sm:$0xff]   ;;  %v7353_v5 = vld [vmem:[%s11225_s1 + $0x2c] ss:$16 sps:$4 sm:$0xff]  }
   0x3   :  { %4946 = vmatpush1.bf16.msra.mxu0 %v7349_v2  ;;  %5479 = vmatpush1.bf16.msra.mxu1 %v7350_v3  ;;  %v7355_v6 = vld [vmem:[%s11225_s1 + $0x20] ss:$16 sps:$4 sm:$0xff]   ;;  %v7356_v7 = vld [vmem:[%s11225_s1 + $0x28] ss:$16 sps:$4 sm:$0xff]   ;;  %v7357_v8 = vld [vmem:[%s11225_s1 + $0x44] ss:$16 sps:$4 sm:$0xff]   ;;  %v839_v43 = vunpack.c.0.s8 %v838_v38 }
   0x4   :  { %4947 = vmatprep.subr.bf16.mxu0 %v7351_v4  ;;  %5480 = vmatprep.subr.bf16.mxu1 %v7353_v5  ;;  %v7359_v9 = vld [vmem:[%s11225_s1 + $0x4c] ss:$16 sps:$4 sm:$0xff]   ;;  %v7361_v10 = vld [vmem:[%s11225_s1 + $0x40] ss:$16 sps:$4 sm:$0xff]   ;;  %v7362_v11 = vld [vmem:[%s11225_s1 + $0x48] ss:$16 sps:$4 sm:$0xff]  }
   0x5   :  { %v7363_v12 = vld [vmem:[%s11225_s1 + $0x64] ss:$16 sps:$4 sm:$0xff]   ;;  %v7365_v13 = vld [vmem:[%s11225_s1 + $0x6c] ss:$16 sps:$4 sm:$0xff]   ;;  %v7367_v14 = vld [vmem:[%s11225_s1 + $0x60] ss:$16 sps:$4 sm:$0xff]  }
   0x6   :  { %v7368_v15 = vld [vmem:[%s11225_s1 + $0x68] ss:$16 sps:$4 sm:$0xff]   ;;  %v7369_v16 = vld [vmem:[%s11225_s1 + $0x84] ss:$16 sps:$4 sm:$0xff]   ;;  %v7371_v17 = vld [vmem:[%s11225_s1 + $0x8c] ss:$16 sps:$4 sm:$0xff]  }
   0x7   :  { %4948 = vmatpush1.bf16.msra.mxu0 %v7355_v6  ;;  %5481 = vmatpush1.bf16.msra.mxu1 %v7356_v7  ;;  %v7373_v18 = vld [vmem:[%s11225_s1 + $0x80] ss:$16 sps:$4 sm:$0xff]   ;;  %v7374_v19 = vld [vmem:[%s11225_s1 + $0x88] ss:$16 sps:$4 sm:$0xff]   ;;  %v7375_v20 = vld [vmem:[%s11225_s1 + $0xa4] ss:$16 sps:$4 sm:$0xff]  }
   0x8   :  { %4949 = vmatprep.subr.bf16.mxu0 %v7357_v8  ;;  %5482 = vmatprep.subr.bf16.mxu1 %v7359_v9  ;;  %v7377_v21 = vld [vmem:[%s11225_s1 + $0xac] ss:$16 sps:$4 sm:$0xff]   ;;  %v7379_v22 = vld [vmem:[%s11225_s1 + $0xa0] ss:$16 sps:$4 sm:$0xff]   ;;  %v7380_v23 = vld [vmem:[%s11225_s1 + $0xa8] ss:$16 sps:$4 sm:$0xff]  }
   0x9   :  { %v7381_v24 = vld [vmem:[%s11225_s1 + $0xc4] ss:$16 sps:$4 sm:$0xff]   ;;  %v7383_v25 = vld [vmem:[%s11225_s1 + $0xcc] ss:$16 sps:$4 sm:$0xff]   ;;  %v7385_v26 = vld [vmem:[%s11225_s1 + $0xc0] ss:$16 sps:$4 sm:$0xff]  }
   0xa   :  { %v7386_v27 = vld [vmem:[%s11225_s1 + $0xc8] ss:$16 sps:$4 sm:$0xff]   ;;  %v7387_v28 = vld [vmem:[%s11225_s1 + $0xe4] ss:$16 sps:$4 sm:$0xff]   ;;  %v7389_v29 = vld [vmem:[%s11225_s1 + $0xec] ss:$16 sps:$4 sm:$0xff]  }
   0xb   :  { %4950 = vmatpush1.bf16.msra.mxu0 %v7361_v10  ;;  %5483 = vmatpush1.bf16.msra.mxu1 %v7362_v11  ;;  %v7391_v30 = vld [vmem:[%s11225_s1 + $0xe0] ss:$16 sps:$4 sm:$0xff]   ;;  %v7392_v31 = vld [vmem:[%s11225_s1 + $0xe8] ss:$16 sps:$4 sm:$0xff]   ;;  %v7393_v32 = vld [vmem:[%s11225_s1 + $0x104] ss:$16 sps:$4 sm:$0xff]  }
   0xc   :  { %4951 = vmatprep.subr.bf16.mxu0 %v7363_v12  ;;  %5484 = vmatprep.subr.bf16.mxu1 %v7365_v13  ;;  %v7395_v33 = vld [vmem:[%s11225_s1 + $0x10c] ss:$16 sps:$4 sm:$0xff]   ;;  %v7397_v34 = vld [vmem:[%s11225_s1 + $0x100] ss:$16 sps:$4 sm:$0xff]   ;;  %v7398_v35 = vld [vmem:[%s11225_s1 + $0x108] ss:$16 sps:$4 sm:$0xff]  }
   0xd   :  { %v7399_v39 = vld [vmem:[%s11225_s1 + $0x124] ss:$16 sps:$4 sm:$0xff]   ;;  %v7401_v40 = vld [vmem:[%s11225_s1 + $0x12c] ss:$16 sps:$4 sm:$0xff]   ;;  %v7403_v41 = vld [vmem:[%s11225_s1 + $0x120] ss:$16 sps:$4 sm:$0xff]  }
   0xe   :  { %v8732_v42 = vshrl.u32 %v812_v36, 7  ;;  %v7404_v44 = vld [vmem:[%s11225_s1 + $0x128] ss:$16 sps:$4 sm:$0xff]   ;;  %v7405_v45 = vld [vmem:[%s11225_s1 + $0x144] ss:$16 sps:$4 sm:$0xff]  }
   0xf   :  { %4952 = vmatpush1.bf16.msra.mxu0 %v7367_v14  ;;  %5485 = vmatpush1.bf16.msra.mxu1 %v7368_v15  ;;  %v7407_v46 = vld [vmem:[%s11225_s1 + $0x14c] ss:$16 sps:$4 sm:$0xff]   ;;  %v7409_v47 = vld [vmem:[%s11225_s1 + $0x140] ss:$16 sps:$4 sm:$0xff]   ;;  %v7410_v48 = vld [vmem:[%s11225_s1 + $0x148] ss:$16 sps:$4 sm:$0xff]  }
  0x10   :  { %4953 = vmatprep.subr.bf16.mxu0 %v7369_v16  ;;  %5486 = vmatprep.subr.bf16.mxu1 %v7371_v17  ;;  %v8750_v49 = vsub.s32 %v839_v43, %v8732_v42  ;;  %v7411_v50 = vld [vmem:[%s11225_s1 + $0x164] ss:$16 sps:$4 sm:$0xff]   ;;  %v7413_v51 = vld [vmem:[%s11225_s1 + $0x16c] ss:$16 sps:$4 sm:$0xff]   ;;  %v7415_v53 = vld [vmem:[%s11225_s1 + $0x160] ss:$16 sps:$4 sm:$0xff]  }
  0x11   :  { %v8761_v52 = vld [vmem:[%s11224_s0] sm:$0xff]  ;;  %v7416_v55 = vld [vmem:[%s11225_s1 + $0x168] ss:$16 sps:$4 sm:$0xff]   ;;  %v7419_v57 = vld [vmem:[%s11225_s1 + $0x18c] ss:$16 sps:$4 sm:$0xff]  }
  0x12   :  { %v843_v54 = vrot.slane %v8761_v52, %v8750_v49  ;;  %v7417_v56 = vld [vmem:[%s11225_s1 + $0x184] ss:$16 sps:$4 sm:$0xff]   ;;  %v7421_v59 = vld [vmem:[%s11225_s1 + $0x180] ss:$16 sps:$4 sm:$0xff]   ;;  %v7422_v61 = vld [vmem:[%s11225_s1 + $0x188] ss:$16 sps:$4 sm:$0xff]  }
  0x13   :  { %4954 = vmatpush1.bf16.msra.mxu0 %v7373_v18  ;;  %5487 = vmatpush1.bf16.msra.mxu1 %v7374_v19  ;;  %v7423_v62 = vld [vmem:[%s11225_s1 + $0x1a4] ss:$16 sps:$4 sm:$0xff]   ;;  %v7425_v63 = vld [vmem:[%s11225_s1 + $0x1ac] ss:$16 sps:$4 sm:$0xff]   ;;  %v7427_v0 = vld [vmem:[%s11225_s1 + $0x1a0] ss:$16 sps:$4 sm:$0xff]  }
  0x14   :  { %4955 = vmatprep.subr.bf16.mxu0 %v7375_v20  ;;  %5488 = vmatprep.subr.bf16.mxu1 %v7377_v21  ;;  %v851_v58 = vcombine.high %v843_v54, %v843_v54  ;;  %v7428_v1 = vld [vmem:[%s11225_s1 + $0x1a8] ss:$16 sps:$4 sm:$0xff]   ;;  %v7429_v2 = vld [vmem:[%s11225_s1 + $0x1c4] ss:$16 sps:$4 sm:$0xff]   ;;  %v7431_v3 = vld [vmem:[%s11225_s1 + $0x1cc] ss:$16 sps:$4 sm:$0xff]   ;;  %v8830_v13 = vrot.slane %v843_v54, %v8750_v49 }
  0x15   :  { %v7433_v4 = vld [vmem:[%s11225_s1 + $0x1c0] ss:$16 sps:$4 sm:$0xff]   ;;  %v7434_v5 = vld [vmem:[%s11225_s1 + $0x1c8] ss:$16 sps:$4 sm:$0xff]   ;;  %v7435_v6 = vld [vmem:[%s11225_s1 + $0x1e4] ss:$16 sps:$4 sm:$0xff]  }
  0x16   :  { %v873_v60 = vrot.slane %v851_v58, %v8750_v49  ;;  %v7437_v7 = vld [vmem:[%s11225_s1 + $0x1ec] ss:$16 sps:$4 sm:$0xff]   ;;  %v7439_v8 = vld [vmem:[%s11225_s1 + $0x1e0] ss:$16 sps:$4 sm:$0xff]   ;;  %v7440_v9 = vld [vmem:[%s11225_s1 + $0x1e8] ss:$16 sps:$4 sm:$0xff]  }
  0x17   :  { %4956 = vmatpush1.bf16.msra.mxu0 %v7379_v22  ;;  %5489 = vmatpush1.bf16.msra.mxu1 %v7380_v23  ;;  %v7443_v10 = vld [vmem:[%s11225_s1 + $0x204] ss:$16 sps:$4 sm:$0xff]   ;;  %v7446_v11 = vld [vmem:[%s11225_s1 + $0x20c] ss:$16 sps:$4 sm:$0xff]   ;;  %v7441_v12 = vld [vmem:[%s11225_s1 + $0x200] ss:$16 sps:$4 sm:$0xff]  }
  0x18   :  { %4957 = vmatprep.subr.bf16.mxu0 %v7381_v24  ;;  %5490 = vmatprep.subr.bf16.mxu1 %v7383_v25  ;;  %v7444_v14 = vld [vmem:[%s11225_s1 + $0x208] ss:$16 sps:$4 sm:$0xff]   ;;  %v7449_v15 = vld [vmem:[%s11225_s1 + $0x224] ss:$16 sps:$4 sm:$0xff]   ;;  %v7452_v16 = vld [vmem:[%s11225_s1 + $0x22c] ss:$16 sps:$4 sm:$0xff]   ;;  %v883_v17 = vcombine.high %v873_v60, %v873_v60 }
  0x19   :  { %4977 = vmatprep.mubr.bf16.mxu0 %v873_v60  ;;  %5510 = vmatprep.mubr.bf16.mxu1 %v873_v60  ;;  %v7447_v18 = vld [vmem:[%s11225_s1 + $0x220] ss:$16 sps:$4 sm:$0xff]   ;;  %v7450_v19 = vld [vmem:[%s11225_s1 + $0x228] ss:$16 sps:$4 sm:$0xff]   ;;  %v7455_v20 = vld [vmem:[%s11225_s1 + $0x244] ss:$16 sps:$4 sm:$0xff]  }
  0x1a   :  { %v7458_v21 = vld [vmem:[%s11225_s1 + $0x24c] ss:$16 sps:$4 sm:$0xff]   ;;  %v7453_v22 = vld [vmem:[%s11225_s1 + $0x240] ss:$16 sps:$4 sm:$0xff]   ;;  %v7456_v23 = vld [vmem:[%s11225_s1 + $0x248] ss:$16 sps:$4 sm:$0xff]  }
  0x1b   :  { %4958 = vmatpush1.bf16.msra.mxu0 %v7385_v26  ;;  %5491 = vmatpush1.bf16.msra.mxu1 %v7386_v27  ;;  %v7461_v24 = vld [vmem:[%s11225_s1 + $0x264] ss:$16 sps:$4 sm:$0xff]   ;;  %v7464_v25 = vld [vmem:[%s11225_s1 + $0x26c] ss:$16 sps:$4 sm:$0xff]   ;;  %v7459_v26 = vld [vmem:[%s11225_s1 + $0x260] ss:$16 sps:$4 sm:$0xff]  }
  0x1c   :  { %4959 = vmatprep.subr.bf16.mxu0 %v7387_v28  ;;  %5492 = vmatprep.subr.bf16.mxu1 %v7389_v29  ;;  %v7462_v27 = vld [vmem:[%s11225_s1 + $0x268] ss:$16 sps:$4 sm:$0xff]   ;;  %v7467_v28 = vld [vmem:[%s11225_s1 + $0x284] ss:$16 sps:$4 sm:$0xff]   ;;  %v7470_v29 = vld [vmem:[%s11225_s1 + $0x28c] ss:$16 sps:$4 sm:$0xff]  }
  0x1d   :  { %v7479_v36 = vld [vmem:[%s11225_s1 + $0x2c4] ss:$16 sps:$4 sm:$0xff]   ;;  %v7482_v37 = vld [vmem:[%s11225_s1 + $0x2cc] ss:$16 sps:$4 sm:$0xff]   ;;  %v7477_v38 = vld [vmem:[%s11225_s1 + $0x2c0] ss:$16 sps:$4 sm:$0xff]  }
  0x1e   :  { %v7483_v43 = vld [vmem:[%s11225_s1 + $0x2e0] ss:$16 sps:$4 sm:$0xff]   ;;  %v7498_v54 = vld [vmem:[%s11225_s1 + $0x328] ss:$16 sps:$4 sm:$0xff]   ;;  %v7512_v60 = vld [vmem:[%s11225_s1 + $0x36c] ss:$16 sps:$4 sm:$0xff]  }
  0x1f   :  { %4960 = vmatpush1.bf16.msra.mxu0 %v7391_v30  ;;  %5493 = vmatpush1.bf16.msra.mxu1 %v7392_v31  ;;  %v7465_v30 = vld [vmem:[%s11225_s1 + $0x280] ss:$16 sps:$4 sm:$0xff]   ;;  %v7468_v31 = vld [vmem:[%s11225_s1 + $0x288] ss:$16 sps:$4 sm:$0xff]  }
  0x20   :  { %4961 = vmatprep.subr.bf16.mxu0 %v7393_v32  ;;  %5494 = vmatprep.subr.bf16.mxu1 %v7395_v33  ;;  %v7473_v32 = vld [vmem:[%s11225_s1 + $0x2a4] ss:$16 sps:$4 sm:$0xff]   ;;  %v7476_v33 = vld [vmem:[%s11225_s1 + $0x2ac] ss:$16 sps:$4 sm:$0xff]   ;;  %v7504_v58 = vld [vmem:[%s11225_s1 + $0x348] ss:$16 sps:$4 sm:$0xff]  }
  0x23   :  { %4962 = vmatpush1.bf16.msra.mxu0 %v7397_v34  ;;  %5495 = vmatpush1.bf16.msra.mxu1 %v7398_v35  ;;  %v7471_v34 = vld [vmem:[%s11225_s1 + $0x2a0] ss:$16 sps:$4 sm:$0xff]   ;;  %v7474_v35 = vld [vmem:[%s11225_s1 + $0x2a8] ss:$16 sps:$4 sm:$0xff]  }
  0x24   :  { %4963 = vmatprep.subr.bf16.mxu0 %v7399_v39  ;;  %5496 = vmatprep.subr.bf16.mxu1 %v7401_v40  ;;  %v7480_v39 = vld [vmem:[%s11225_s1 + $0x2c8] ss:$16 sps:$4 sm:$0xff]   ;;  %v7485_v40 = vld [vmem:[%s11225_s1 + $0x2e4] ss:$16 sps:$4 sm:$0xff]  }
  0x27   :  { %4964 = vmatpush1.bf16.msra.mxu0 %v7403_v41  ;;  %5497 = vmatpush1.bf16.msra.mxu1 %v7404_v44  ;;  %v7488_v41 = vld [vmem:[%s11225_s1 + $0x2ec] ss:$16 sps:$4 sm:$0xff]   ;;  %v7486_v44 = vld [vmem:[%s11225_s1 + $0x2e8] ss:$16 sps:$4 sm:$0xff]  }
  0x28   :  { %4965 = vmatprep.subr.bf16.mxu0 %v7405_v45  ;;  %5498 = vmatprep.subr.bf16.mxu1 %v7407_v46  ;;  %v7491_v45 = vld [vmem:[%s11225_s1 + $0x304] ss:$16 sps:$4 sm:$0xff]   ;;  %v7494_v46 = vld [vmem:[%s11225_s1 + $0x30c] ss:$16 sps:$4 sm:$0xff]  }
  0x2b   :  { %4966 = vmatpush1.bf16.msra.mxu0 %v7409_v47  ;;  %5499 = vmatpush1.bf16.msra.mxu1 %v7410_v48  ;;  %v7489_v47 = vld [vmem:[%s11225_s1 + $0x300] ss:$16 sps:$4 sm:$0xff]   ;;  %v7492_v48 = vld [vmem:[%s11225_s1 + $0x308] ss:$16 sps:$4 sm:$0xff]  }
  0x2c   :  { %4967 = vmatprep.subr.bf16.mxu0 %v7411_v50  ;;  %5500 = vmatprep.subr.bf16.mxu1 %v7413_v51  ;;  %v7497_v50 = vld [vmem:[%s11225_s1 + $0x324] ss:$16 sps:$4 sm:$0xff]   ;;  %v7500_v51 = vld [vmem:[%s11225_s1 + $0x32c] ss:$16 sps:$4 sm:$0xff]  }
  0x2f   :  { %4968 = vmatpush1.bf16.msra.mxu0 %v7415_v53  ;;  %5501 = vmatpush1.bf16.msra.mxu1 %v7416_v55  ;;  %v7495_v53 = vld [vmem:[%s11225_s1 + $0x320] ss:$16 sps:$4 sm:$0xff]   ;;  %v7503_v55 = vld [vmem:[%s11225_s1 + $0x344] ss:$16 sps:$4 sm:$0xff]  }
  0x30   :  { %4969 = vmatprep.subr.bf16.mxu0 %v7417_v56  ;;  %5502 = vmatprep.subr.bf16.mxu1 %v7419_v57  ;;  %v7506_v56 = vld [vmem:[%s11225_s1 + $0x34c] ss:$16 sps:$4 sm:$0xff]   ;;  %v7501_v57 = vld [vmem:[%s11225_s1 + $0x340] ss:$16 sps:$4 sm:$0xff]  }
  0x33   :  { %4970 = vmatpush1.bf16.msra.mxu0 %v7421_v59  ;;  %5503 = vmatpush1.bf16.msra.mxu1 %v7422_v61  ;;  %v7509_v59 = vld [vmem:[%s11225_s1 + $0x364] ss:$16 sps:$4 sm:$0xff]   ;;  %v7507_v61 = vld [vmem:[%s11225_s1 + $0x360] ss:$16 sps:$4 sm:$0xff]  }
  0x34   :  { %4971 = vmatprep.subr.bf16.mxu0 %v7423_v62  ;;  %5504 = vmatprep.subr.bf16.mxu1 %v7425_v63  ;;  %v7510_v62 = vld [vmem:[%s11225_s1 + $0x368] ss:$16 sps:$4 sm:$0xff]   ;;  %v7515_v63 = vld [vmem:[%s11225_s1 + $0x384] ss:$16 sps:$4 sm:$0xff]  }
  0x37   :  { %4972 = vmatpush1.bf16.msra.mxu0 %v7427_v0  ;;  %5505 = vmatpush1.bf16.msra.mxu1 %v7428_v1  ;;  %v7518_v0 = vld [vmem:[%s11225_s1 + $0x38c] ss:$16 sps:$4 sm:$0xff]   ;;  %v7513_v1 = vld [vmem:[%s11225_s1 + $0x380] ss:$16 sps:$4 sm:$0xff]  }
  0x38   :  { %4973 = vmatprep.subr.bf16.mxu0 %v7429_v2  ;;  %5506 = vmatprep.subr.bf16.mxu1 %v7431_v3  ;;  %v7516_v2 = vld [vmem:[%s11225_s1 + $0x388] ss:$16 sps:$4 sm:$0xff]   ;;  %v7521_v3 = vld [vmem:[%s11225_s1 + $0x3a4] ss:$16 sps:$4 sm:$0xff]  }
  0x3b   :  { %4974 = vmatpush1.bf16.msra.mxu0 %v7433_v4  ;;  %5507 = vmatpush1.bf16.msra.mxu1 %v7434_v5  ;;  %v7524_v4 = vld [vmem:[%s11225_s1 + $0x3ac] ss:$16 sps:$4 sm:$0xff]   ;;  %v7519_v5 = vld [vmem:[%s11225_s1 + $0x3a0] ss:$16 sps:$4 sm:$0xff]  }
  0x3c   :  { %4975 = vmatprep.subr.bf16.mxu0 %v7435_v6  ;;  %5508 = vmatprep.subr.bf16.mxu1 %v7437_v7  ;;  %v7522_v6 = vld [vmem:[%s11225_s1 + $0x3a8] ss:$16 sps:$4 sm:$0xff]   ;;  %v7527_v7 = vld [vmem:[%s11225_s1 + $0x3c4] ss:$16 sps:$4 sm:$0xff]  }
  0x3f   :  { %4976 = vmatpush1.bf16.msra.mxu0 %v7439_v8  ;;  %5509 = vmatpush1.bf16.msra.mxu1 %v7440_v9  ;;  %v7530_v8 = vld [vmem:[%s11225_s1 + $0x3cc] ss:$16 sps:$4 sm:$0xff]   ;;  %v836_v9 = vcombine.high %v8761_v52, %v8761_v52 }
  0x40   :  { %4986 = vmatprep.subr.bf16.mxu0 %v7443_v10  ;;  %5519 = vmatprep.subr.bf16.mxu1 %v7446_v11  ;;  %v7525_v10 = vld [vmem:[%s11225_s1 + $0x3c0] ss:$16 sps:$4 sm:$0xff]   ;;  %v7528_v11 = vld [vmem:[%s11225_s1 + $0x3c8] ss:$16 sps:$4 sm:$0xff]   ;;  %v7536_v52 = vld [vmem:[%s11225_s1 + $0x3ec] ss:$16 sps:$4 sm:$0xff]  }
  0x42   :  { %4978 = vmatmul.mubr.bf16.vlgmr.msra.gmra.mrb[0].mxu0 %v8830_v13  ;;  %5511 = vmatmul.mubr.bf16.vlgmr.msra.gmra.mrb[0].mxu1 %v8830_v13 }
  0x43   :  { %4987 = vmatpush1.bf16.msra.mxu0 %v7441_v12  ;;  %5520 = vmatpush1.bf16.msra.mxu1 %v7444_v14  ;;  %v7533_v12 = vld [vmem:[%s11225_s1 + $0x3e4] ss:$16 sps:$4 sm:$0xff]   ;;  %v9014_v14 = vrot.slane %v836_v9, %v8750_v49  ;;  %v7612_v9 = vld [vmem:[%s11225_s1 + $0x588] ss:$16 sps:$4 sm:$0xff]  }
  0x44   :  { %4988 = vmatprep.subr.bf16.mxu0 %v7449_v15  ;;  %5521 = vmatprep.subr.bf16.mxu1 %v7452_v16  ;;  %v7531_v15 = vld [vmem:[%s11225_s1 + $0x3e0] ss:$16 sps:$4 sm:$0xff]   ;;  %v7534_v16 = vld [vmem:[%s11225_s1 + $0x3e8] ss:$16 sps:$4 sm:$0xff]  }
  0x45   :  { %5018 = vmatprep.mubr.bf16.mxu0 %v883_v17  ;;  %5551 = vmatprep.mubr.bf16.mxu1 %v883_v17  ;;  %v7539_v17 = vld [vmem:[%s11225_s1 + $0x404] ss:$16 sps:$4 sm:$0xff]  }
  0x47   :  { %4989 = vmatpush1.bf16.msra.mxu0 %v7447_v18  ;;  %5522 = vmatpush1.bf16.msra.mxu1 %v7450_v19  ;;  %v7542_v18 = vld [vmem:[%s11225_s1 + $0x40c] ss:$16 sps:$4 sm:$0xff]   ;;  %v852_v19 = vcombine.high %v9014_v14, %v9014_v14 }
  0x48   :  { %4990 = vmatprep.subr.bf16.mxu0 %v7455_v20  ;;  %5523 = vmatprep.subr.bf16.mxu1 %v7458_v21  ;;  %v7537_v20 = vld [vmem:[%s11225_s1 + $0x400] ss:$16 sps:$4 sm:$0xff]   ;;  %v881_v21 = vcombine.high %v8830_v13, %v8830_v13 }
  0x49   :  { %v7543_v13 = vld [vmem:[%s11225_s1 + $0x420] ss:$16 sps:$4 sm:$0xff]  }
  0x4b   :  { %4991 = vmatpush1.bf16.msra.mxu0 %v7453_v22  ;;  %5524 = vmatpush1.bf16.msra.mxu1 %v7456_v23  ;;  %v7540_v22 = vld [vmem:[%s11225_s1 + $0x408] ss:$16 sps:$4 sm:$0xff]   ;;  %v7545_v23 = vld [vmem:[%s11225_s1 + $0x424] ss:$16 sps:$4 sm:$0xff]  }
  0x4c   :  { %4992 = vmatprep.subr.bf16.mxu0 %v7461_v24  ;;  %5525 = vmatprep.subr.bf16.mxu1 %v7464_v25  ;;  %v7548_v24 = vld [vmem:[%s11225_s1 + $0x42c] ss:$16 sps:$4 sm:$0xff]   ;;  %v9045_v25 = vrot.slane %v852_v19, %v8750_v49  ;;  %v7629_v19 = vld [vmem:[%s11225_s1 + $0x5e4] ss:$16 sps:$4 sm:$0xff]  }
  0x4f   :  { %4993 = vmatpush1.bf16.msra.mxu0 %v7459_v26  ;;  %5526 = vmatpush1.bf16.msra.mxu1 %v7462_v27  ;;  %v7546_v26 = vld [vmem:[%s11225_s1 + $0x428] ss:$16 sps:$4 sm:$0xff]   ;;  %v7551_v27 = vld [vmem:[%s11225_s1 + $0x444] ss:$16 sps:$4 sm:$0xff]  }
  0x50   :  { %4994 = vmatprep.subr.bf16.mxu0 %v7467_v28  ;;  %5527 = vmatprep.subr.bf16.mxu1 %v7470_v29  ;;  %v7554_v28 = vld [vmem:[%s11225_s1 + $0x44c] ss:$16 sps:$4 sm:$0xff]   ;;  %v7549_v29 = vld [vmem:[%s11225_s1 + $0x440] ss:$16 sps:$4 sm:$0xff]  }
  0x53   :  { %4995 = vmatpush1.bf16.msra.mxu0 %v7465_v30  ;;  %5528 = vmatpush1.bf16.msra.mxu1 %v7468_v31  ;;  %v7552_v30 = vld [vmem:[%s11225_s1 + $0x448] ss:$16 sps:$4 sm:$0xff]   ;;  %v7557_v31 = vld [vmem:[%s11225_s1 + $0x464] ss:$16 sps:$4 sm:$0xff]  }
  0x54   :  { %4996 = vmatprep.subr.bf16.mxu0 %v7473_v32  ;;  %5529 = vmatprep.subr.bf16.mxu1 %v7476_v33  ;;  %v7560_v32 = vld [vmem:[%s11225_s1 + $0x46c] ss:$16 sps:$4 sm:$0xff]   ;;  %v7555_v33 = vld [vmem:[%s11225_s1 + $0x460] ss:$16 sps:$4 sm:$0xff]  }
  0x57   :  { %4997 = vmatpush1.bf16.msra.mxu0 %v7471_v34  ;;  %5530 = vmatpush1.bf16.msra.mxu1 %v7474_v35  ;;  %v7558_v34 = vld [vmem:[%s11225_s1 + $0x468] ss:$16 sps:$4 sm:$0xff]   ;;  %v7563_v35 = vld [vmem:[%s11225_s1 + $0x484] ss:$16 sps:$4 sm:$0xff]  }
  0x58   :  { %4998 = vmatprep.subr.bf16.mxu0 %v7479_v36  ;;  %5531 = vmatprep.subr.bf16.mxu1 %v7482_v37  ;;  %v7566_v36 = vld [vmem:[%s11225_s1 + $0x48c] ss:$16 sps:$4 sm:$0xff]   ;;  %v7561_v37 = vld [vmem:[%s11225_s1 + $0x480] ss:$16 sps:$4 sm:$0xff]  }
  0x5b   :  { %4999 = vmatpush1.bf16.msra.mxu0 %v7477_v38  ;;  %5532 = vmatpush1.bf16.msra.mxu1 %v7480_v39  ;;  %v7564_v38 = vld [vmem:[%s11225_s1 + $0x488] ss:$16 sps:$4 sm:$0xff]   ;;  %v7569_v39 = vld [vmem:[%s11225_s1 + $0x4a4] ss:$16 sps:$4 sm:$0xff]  }
  0x5c   :  { %5000 = vmatprep.subr.bf16.mxu0 %v7485_v40  ;;  %5533 = vmatprep.subr.bf16.mxu1 %v7488_v41  ;;  %v7572_v40 = vld [vmem:[%s11225_s1 + $0x4ac] ss:$16 sps:$4 sm:$0xff]   ;;  %v7567_v41 = vld [vmem:[%s11225_s1 + $0x4a0] ss:$16 sps:$4 sm:$0xff]  }
  0x5f   :  { %5001 = vmatpush1.bf16.msra.mxu0 %v7483_v43  ;;  %5534 = vmatpush1.bf16.msra.mxu1 %v7486_v44  ;;  %v7570_v43 = vld [vmem:[%s11225_s1 + $0x4a8] ss:$16 sps:$4 sm:$0xff]   ;;  %v7575_v44 = vld [vmem:[%s11225_s1 + $0x4c4] ss:$16 sps:$4 sm:$0xff]  }
  0x60   :  { %5002 = vmatprep.subr.bf16.mxu0 %v7491_v45  ;;  %5535 = vmatprep.subr.bf16.mxu1 %v7494_v46  ;;  %v7578_v45 = vld [vmem:[%s11225_s1 + $0x4cc] ss:$16 sps:$4 sm:$0xff]   ;;  %v7573_v46 = vld [vmem:[%s11225_s1 + $0x4c0] ss:$16 sps:$4 sm:$0xff]  }
  0x63   :  { %5003 = vmatpush1.bf16.msra.mxu0 %v7489_v47  ;;  %5536 = vmatpush1.bf16.msra.mxu1 %v7492_v48  ;;  %v7576_v47 = vld [vmem:[%s11225_s1 + $0x4c8] ss:$16 sps:$4 sm:$0xff]   ;;  %v7581_v48 = vld [vmem:[%s11225_s1 + $0x4e4] ss:$16 sps:$4 sm:$0xff]  }
  0x64   :  { %5004 = vmatprep.subr.bf16.mxu0 %v7497_v50  ;;  %5537 = vmatprep.subr.bf16.mxu1 %v7500_v51  ;;  %v7584_v50 = vld [vmem:[%s11225_s1 + $0x4ec] ss:$16 sps:$4 sm:$0xff]   ;;  %v7579_v51 = vld [vmem:[%s11225_s1 + $0x4e0] ss:$16 sps:$4 sm:$0xff]  }
  0x67   :  { %5005 = vmatpush1.bf16.msra.mxu0 %v7495_v53  ;;  %5538 = vmatpush1.bf16.msra.mxu1 %v7498_v54  ;;  %v7582_v53 = vld [vmem:[%s11225_s1 + $0x4e8] ss:$16 sps:$4 sm:$0xff]   ;;  %v7587_v54 = vld [vmem:[%s11225_s1 + $0x504] ss:$16 sps:$4 sm:$0xff]  }
  0x68   :  { %5006 = vmatprep.subr.bf16.mxu0 %v7503_v55  ;;  %5539 = vmatprep.subr.bf16.mxu1 %v7506_v56  ;;  %v7590_v55 = vld [vmem:[%s11225_s1 + $0x50c] ss:$16 sps:$4 sm:$0xff]   ;;  %v7585_v56 = vld [vmem:[%s11225_s1 + $0x500] ss:$16 sps:$4 sm:$0xff]  }
  0x6b   :  { %5007 = vmatpush1.bf16.msra.mxu0 %v7501_v57  ;;  %5540 = vmatpush1.bf16.msra.mxu1 %v7504_v58  ;;  %v7588_v57 = vld [vmem:[%s11225_s1 + $0x508] ss:$16 sps:$4 sm:$0xff]   ;;  %v7593_v58 = vld [vmem:[%s11225_s1 + $0x524] ss:$16 sps:$4 sm:$0xff]  }
  0x6c   :  { %5008 = vmatprep.subr.bf16.mxu0 %v7509_v59  ;;  %5541 = vmatprep.subr.bf16.mxu1 %v7512_v60  ;;  %v7596_v59 = vld [vmem:[%s11225_s1 + $0x52c] ss:$16 sps:$4 sm:$0xff]   ;;  %v7591_v60 = vld [vmem:[%s11225_s1 + $0x520] ss:$16 sps:$4 sm:$0xff]  }
  0x6f   :  { %5009 = vmatpush1.bf16.msra.mxu0 %v7507_v61  ;;  %5542 = vmatpush1.bf16.msra.mxu1 %v7510_v62  ;;  %v7594_v61 = vld [vmem:[%s11225_s1 + $0x528] ss:$16 sps:$4 sm:$0xff]   ;;  %v7599_v62 = vld [vmem:[%s11225_s1 + $0x544] ss:$16 sps:$4 sm:$0xff]  }
  0x70   :  { %5010 = vmatprep.subr.bf16.mxu0 %v7515_v63  ;;  %5543 = vmatprep.subr.bf16.mxu1 %v7518_v0  ;;  %v7602_v63 = vld [vmem:[%s11225_s1 + $0x54c] ss:$16 sps:$4 sm:$0xff]   ;;  %v7597_v0 = vld [vmem:[%s11225_s1 + $0x540] ss:$16 sps:$4 sm:$0xff]  }
  0x73   :  { %5011 = vmatpush1.bf16.msra.mxu0 %v7513_v1  ;;  %5544 = vmatpush1.bf16.msra.mxu1 %v7516_v2  ;;  %v7600_v1 = vld [vmem:[%s11225_s1 + $0x548] ss:$16 sps:$4 sm:$0xff]   ;;  %v7605_v2 = vld [vmem:[%s11225_s1 + $0x564] ss:$16 sps:$4 sm:$0xff]  }
  0x74   :  { %5012 = vmatprep.subr.bf16.mxu0 %v7521_v3  ;;  %5545 = vmatprep.subr.bf16.mxu1 %v7524_v4  ;;  %v7608_v3 = vld [vmem:[%s11225_s1 + $0x56c] ss:$16 sps:$4 sm:$0xff]   ;;  %v7603_v4 = vld [vmem:[%s11225_s1 + $0x560] ss:$16 sps:$4 sm:$0xff]  }
  0x77   :  { %5013 = vmatpush1.bf16.msra.mxu0 %v7519_v5  ;;  %5546 = vmatpush1.bf16.msra.mxu1 %v7522_v6  ;;  %v7606_v5 = vld [vmem:[%s11225_s1 + $0x568] ss:$16 sps:$4 sm:$0xff]   ;;  %v7611_v6 = vld [vmem:[%s11225_s1 + $0x584] ss:$16 sps:$4 sm:$0xff]  }
  0x78   :  { %5014 = vmatprep.subr.bf16.mxu0 %v7527_v7  ;;  %5547 = vmatprep.subr.bf16.mxu1 %v7530_v8  ;;  %v7614_v7 = vld [vmem:[%s11225_s1 + $0x58c] ss:$16 sps:$4 sm:$0xff]   ;;  %v7609_v8 = vld [vmem:[%s11225_s1 + $0x580] ss:$16 sps:$4 sm:$0xff]  }
  0x7b   :  { %5015 = vmatpush1.bf16.msra.mxu0 %v7525_v10  ;;  %5548 = vmatpush1.bf16.msra.mxu1 %v7528_v11  ;;  %v7617_v10 = vld [vmem:[%s11225_s1 + $0x5a4] ss:$16 sps:$4 sm:$0xff]   ;;  %v7620_v11 = vld [vmem:[%s11225_s1 + $0x5ac] ss:$16 sps:$4 sm:$0xff]  }
  0x7c   :  { %5016 = vmatprep.subr.bf16.mxu0 %v7533_v12  ;;  %5549 = vmatprep.subr.bf16.mxu1 %v7536_v52  ;;  %v7615_v12 = vld [vmem:[%s11225_s1 + $0x5a0] ss:$16 sps:$4 sm:$0xff]   ;;  %v7618_v52 = vld [vmem:[%s11225_s1 + $0x5a8] ss:$16 sps:$4 sm:$0xff]  }
  0x7f   :  { %5017 = vmatpush1.bf16.msra.mxu0 %v7531_v15  ;;  %5550 = vmatpush1.bf16.msra.mxu1 %v7534_v16  ;;  %v7623_v15 = vld [vmem:[%s11225_s1 + $0x5c4] ss:$16 sps:$4 sm:$0xff]   ;;  %v7626_v16 = vld [vmem:[%s11225_s1 + $0x5cc] ss:$16 sps:$4 sm:$0xff]  }
  0x80   :  { %5027 = vmatprep.subr.bf16.mxu0 %v7539_v17  ;;  %5560 = vmatprep.subr.bf16.mxu1 %v7542_v18  ;;  %v7621_v17 = vld [vmem:[%s11225_s1 + $0x5c0] ss:$16 sps:$4 sm:$0xff]   ;;  %v7624_v18 = vld [vmem:[%s11225_s1 + $0x5c8] ss:$16 sps:$4 sm:$0xff]  }
  0x82   :  { %5019 = vmatmul.mubr.bf16.vlgmr.msra.gmra.mrb[0].mxu0 %v881_v21  ;;  %5552 = vmatmul.mubr.bf16.vlgmr.msra.gmra.mrb[0].mxu1 %v881_v21  ;;  %v7627_v21 = vld [vmem:[%s11225_s1 + $0x5e0] ss:$16 sps:$4 sm:$0xff]  }
  0x83   :  { %5028 = vmatpush1.bf16.msra.mxu0 %v7537_v20  ;;  %5561 = vmatpush1.bf16.msra.mxu1 %v7540_v22  ;;  %v7632_v20 = vld [vmem:[%s11225_s1 + $0x5ec] ss:$16 sps:$4 sm:$0xff]   ;;  %v7630_v22 = vld [vmem:[%s11225_s1 + $0x5e8] ss:$16 sps:$4 sm:$0xff]  }
  0x84   :  { %5029 = vmatprep.subr.bf16.mxu0 %v7545_v23  ;;  %5562 = vmatprep.subr.bf16.mxu1 %v7548_v24  ;;  %v7636_v23 = vld [vmem:[%s11225_s1 + $0x604] ss:$16 sps:$4 sm:$0xff]   ;;  %v7639_v24 = vld [vmem:[%s11225_s1 + $0x60c] ss:$16 sps:$4 sm:$0xff]  }
  0x85   :  { %5059 = vmatprep.mubr.bf16.mxu0 %v9045_v25  ;;  %5592 = vmatprep.mubr.bf16.mxu1 %v9045_v25 }
  0x87   :  { %5030 = vmatpush1.bf16.msra.mxu0 %v7543_v13  ;;  %5563 = vmatpush1.bf16.msra.mxu1 %v7546_v26  ;;  %v7634_v13 = vld [vmem:[%s11225_s1 + $0x600] ss:$16 sps:$4 sm:$0xff]   ;;  %v9234_v26 = vrot.slane %v9014_v14, %v8750_v49  ;;  %v884_v14 = vcombine.high %v9045_v25, %v9045_v25  ;;  %v7648_v25 = vld [vmem:[%s11225_s1 + $0x644] ss:$16 sps:$4 sm:$0xff]  }
  0x88   :  { %5031 = vmatprep.subr.bf16.mxu0 %v7551_v27  ;;  %5564 = vmatprep.subr.bf16.mxu1 %v7554_v28  ;;  %v7637_v27 = vld [vmem:[%s11225_s1 + $0x608] ss:$16 sps:$4 sm:$0xff]   ;;  %v7642_v28 = vld [vmem:[%s11225_s1 + $0x624] ss:$16 sps:$4 sm:$0xff]  }
  0x8b   :  { %5032 = vmatpush1.bf16.msra.mxu0 %v7549_v29  ;;  %5565 = vmatpush1.bf16.msra.mxu1 %v7552_v30  ;;  %v7645_v29 = vld [vmem:[%s11225_s1 + $0x62c] ss:$16 sps:$4 sm:$0xff]   ;;  %v7640_v30 = vld [vmem:[%s11225_s1 + $0x620] ss:$16 sps:$4 sm:$0xff]  }
  0x8c   :  { %5033 = vmatprep.subr.bf16.mxu0 %v7557_v31  ;;  %5566 = vmatprep.subr.bf16.mxu1 %v7560_v32  ;;  %v7643_v31 = vld [vmem:[%s11225_s1 + $0x628] ss:$16 sps:$4 sm:$0xff]   ;;  %v7651_v32 = vld [vmem:[%s11225_s1 + $0x64c] ss:$16 sps:$4 sm:$0xff]  }
  0x8f   :  { %5034 = vmatpush1.bf16.msra.mxu0 %v7555_v33  ;;  %5567 = vmatpush1.bf16.msra.mxu1 %v7558_v34  ;;  %v7646_v33 = vld [vmem:[%s11225_s1 + $0x640] ss:$16 sps:$4 sm:$0xff]   ;;  %v7649_v34 = vld [vmem:[%s11225_s1 + $0x648] ss:$16 sps:$4 sm:$0xff]  }
  0x90   :  { %5035 = vmatprep.subr.bf16.mxu0 %v7563_v35  ;;  %5568 = vmatprep.subr.bf16.mxu1 %v7566_v36  ;;  %v7654_v35 = vld [vmem:[%s11225_s1 + $0x664] ss:$16 sps:$4 sm:$0xff]   ;;  %v7657_v36 = vld [vmem:[%s11225_s1 + $0x66c] ss:$16 sps:$4 sm:$0xff]  }
  0x93   :  { %5036 = vmatpush1.bf16.msra.mxu0 %v7561_v37  ;;  %5569 = vmatpush1.bf16.msra.mxu1 %v7564_v38  ;;  %v7652_v37 = vld [vmem:[%s11225_s1 + $0x660] ss:$16 sps:$4 sm:$0xff]   ;;  %v7655_v38 = vld [vmem:[%s11225_s1 + $0x668] ss:$16 sps:$4 sm:$0xff]  }
  0x94   :  { %5037 = vmatprep.subr.bf16.mxu0 %v7569_v39  ;;  %5570 = vmatprep.subr.bf16.mxu1 %v7572_v40  ;;  %v7660_v39 = vld [vmem:[%s11225_s1 + $0x684] ss:$16 sps:$4 sm:$0xff]   ;;  %v7663_v40 = vld [vmem:[%s11225_s1 + $0x68c] ss:$16 sps:$4 sm:$0xff]  }
  0x97   :  { %5038 = vmatpush1.bf16.msra.mxu0 %v7567_v41  ;;  %5571 = vmatpush1.bf16.msra.mxu1 %v7570_v43  ;;  %v7658_v41 = vld [vmem:[%s11225_s1 + $0x680] ss:$16 sps:$4 sm:$0xff]   ;;  %v7661_v43 = vld [vmem:[%s11225_s1 + $0x688] ss:$16 sps:$4 sm:$0xff]  }
  0x98   :  { %5039 = vmatprep.subr.bf16.mxu0 %v7575_v44  ;;  %5572 = vmatprep.subr.bf16.mxu1 %v7578_v45  ;;  %v7666_v44 = vld [vmem:[%s11225_s1 + $0x6a4] ss:$16 sps:$4 sm:$0xff]   ;;  %v7669_v45 = vld [vmem:[%s11225_s1 + $0x6ac] ss:$16 sps:$4 sm:$0xff]  }
  0x9b   :  { %5040 = vmatpush1.bf16.msra.mxu0 %v7573_v46  ;;  %5573 = vmatpush1.bf16.msra.mxu1 %v7576_v47  ;;  %v7664_v46 = vld [vmem:[%s11225_s1 + $0x6a0] ss:$16 sps:$4 sm:$0xff]   ;;  %v7667_v47 = vld [vmem:[%s11225_s1 + $0x6a8] ss:$16 sps:$4 sm:$0xff]  }
  0x9c   :  { %5041 = vmatprep.subr.bf16.mxu0 %v7581_v48  ;;  %5574 = vmatprep.subr.bf16.mxu1 %v7584_v50  ;;  %v7672_v48 = vld [vmem:[%s11225_s1 + $0x6c4] ss:$16 sps:$4 sm:$0xff]   ;;  %v7675_v50 = vld [vmem:[%s11225_s1 + $0x6cc] ss:$16 sps:$4 sm:$0xff]  }
  0x9f   :  { %5042 = vmatpush1.bf16.msra.mxu0 %v7579_v51  ;;  %5575 = vmatpush1.bf16.msra.mxu1 %v7582_v53  ;;  %v7670_v51 = vld [vmem:[%s11225_s1 + $0x6c0] ss:$16 sps:$4 sm:$0xff]   ;;  %v7673_v53 = vld [vmem:[%s11225_s1 + $0x6c8] ss:$16 sps:$4 sm:$0xff]  }
  0xa0   :  { %5043 = vmatprep.subr.bf16.mxu0 %v7587_v54  ;;  %5576 = vmatprep.subr.bf16.mxu1 %v7590_v55  ;;  %v7678_v54 = vld [vmem:[%s11225_s1 + $0x6e4] ss:$16 sps:$4 sm:$0xff]   ;;  %v7681_v55 = vld [vmem:[%s11225_s1 + $0x6ec] ss:$16 sps:$4 sm:$0xff]  }
  0xa3   :  { %5044 = vmatpush1.bf16.msra.mxu0 %v7585_v56  ;;  %5577 = vmatpush1.bf16.msra.mxu1 %v7588_v57  ;;  %v7676_v56 = vld [vmem:[%s11225_s1 + $0x6e0] ss:$16 sps:$4 sm:$0xff]   ;;  %v7679_v57 = vld [vmem:[%s11225_s1 + $0x6e8] ss:$16 sps:$4 sm:$0xff]  }
  0xa4   :  { %5045 = vmatprep.subr.bf16.mxu0 %v7593_v58  ;;  %5578 = vmatprep.subr.bf16.mxu1 %v7596_v59  ;;  %v7684_v58 = vld [vmem:[%s11225_s1 + $0x704] ss:$16 sps:$4 sm:$0xff]   ;;  %v7687_v59 = vld [vmem:[%s11225_s1 + $0x70c] ss:$16 sps:$4 sm:$0xff]  }
  0xa7   :  { %5046 = vmatpush1.bf16.msra.mxu0 %v7591_v60  ;;  %5579 = vmatpush1.bf16.msra.mxu1 %v7594_v61  ;;  %v7682_v60 = vld [vmem:[%s11225_s1 + $0x700] ss:$16 sps:$4 sm:$0xff]   ;;  %v7685_v61 = vld [vmem:[%s11225_s1 + $0x708] ss:$16 sps:$4 sm:$0xff]  }
  0xa8   :  { %5047 = vmatprep.subr.bf16.mxu0 %v7599_v62  ;;  %5580 = vmatprep.subr.bf16.mxu1 %v7602_v63  ;;  %v7690_v62 = vld [vmem:[%s11225_s1 + $0x724] ss:$16 sps:$4 sm:$0xff]   ;;  %v7693_v63 = vld [vmem:[%s11225_s1 + $0x72c] ss:$16 sps:$4 sm:$0xff]  }
  0xab   :  { %5048 = vmatpush1.bf16.msra.mxu0 %v7597_v0  ;;  %5581 = vmatpush1.bf16.msra.mxu1 %v7600_v1  ;;  %v7688_v0 = vld [vmem:[%s11225_s1 + $0x720] ss:$16 sps:$4 sm:$0xff]   ;;  %v7691_v1 = vld [vmem:[%s11225_s1 + $0x728] ss:$16 sps:$4 sm:$0xff]  }
  0xac   :  { %5049 = vmatprep.subr.bf16.mxu0 %v7605_v2  ;;  %5582 = vmatprep.subr.bf16.mxu1 %v7608_v3  ;;  %v7696_v2 = vld [vmem:[%s11225_s1 + $0x744] ss:$16 sps:$4 sm:$0xff]   ;;  %v7699_v3 = vld [vmem:[%s11225_s1 + $0x74c] ss:$16 sps:$4 sm:$0xff]  }
  0xaf   :  { %5050 = vmatpush1.bf16.msra.mxu0 %v7603_v4  ;;  %5583 = vmatpush1.bf16.msra.mxu1 %v7606_v5  ;;  %v7694_v4 = vld [vmem:[%s11225_s1 + $0x740] ss:$16 sps:$4 sm:$0xff]   ;;  %v7697_v5 = vld [vmem:[%s11225_s1 + $0x748] ss:$16 sps:$4 sm:$0xff]  }
  0xb0   :  { %5051 = vmatprep.subr.bf16.mxu0 %v7611_v6  ;;  %5584 = vmatprep.subr.bf16.mxu1 %v7614_v7  ;;  %v7702_v6 = vld [vmem:[%s11225_s1 + $0x764] ss:$16 sps:$4 sm:$0xff]   ;;  %v7705_v7 = vld [vmem:[%s11225_s1 + $0x76c] ss:$16 sps:$4 sm:$0xff]  }
  0xb3   :  { %5052 = vmatpush1.bf16.msra.mxu0 %v7609_v8  ;;  %5585 = vmatpush1.bf16.msra.mxu1 %v7612_v9  ;;  %v7700_v8 = vld [vmem:[%s11225_s1 + $0x760] ss:$16 sps:$4 sm:$0xff]   ;;  %v7703_v9 = vld [vmem:[%s11225_s1 + $0x768] ss:$16 sps:$4 sm:$0xff]  }
  0xb4   :  { %5053 = vmatprep.subr.bf16.mxu0 %v7617_v10  ;;  %5586 = vmatprep.subr.bf16.mxu1 %v7620_v11  ;;  %v7708_v10 = vld [vmem:[%s11225_s1 + $0x784] ss:$16 sps:$4 sm:$0xff]   ;;  %v7711_v11 = vld [vmem:[%s11225_s1 + $0x78c] ss:$16 sps:$4 sm:$0xff]  }
  0xb7   :  { %5054 = vmatpush1.bf16.msra.mxu0 %v7615_v12  ;;  %5587 = vmatpush1.bf16.msra.mxu1 %v7618_v52  ;;  %v7706_v12 = vld [vmem:[%s11225_s1 + $0x780] ss:$16 sps:$4 sm:$0xff]   ;;  %v7709_v52 = vld [vmem:[%s11225_s1 + $0x788] ss:$16 sps:$4 sm:$0xff]  }
  0xb8   :  { %5055 = vmatprep.subr.bf16.mxu0 %v7623_v15  ;;  %5588 = vmatprep.subr.bf16.mxu1 %v7626_v16  ;;  %v7714_v15 = vld [vmem:[%s11225_s1 + $0x7a4] ss:$16 sps:$4 sm:$0xff]   ;;  %v7717_v16 = vld [vmem:[%s11225_s1 + $0x7ac] ss:$16 sps:$4 sm:$0xff]  }
  0xbb   :  { %5056 = vmatpush1.bf16.msra.mxu0 %v7621_v17  ;;  %5589 = vmatpush1.bf16.msra.mxu1 %v7624_v18  ;;  %v7712_v17 = vld [vmem:[%s11225_s1 + $0x7a0] ss:$16 sps:$4 sm:$0xff]   ;;  %v7715_v18 = vld [vmem:[%s11225_s1 + $0x7a8] ss:$16 sps:$4 sm:$0xff]  }
  0xbc   :  { %5057 = vmatprep.subr.bf16.mxu0 %v7629_v19  ;;  %5590 = vmatprep.subr.bf16.mxu1 %v7632_v20  ;;  %v7720_v19 = vld [vmem:[%s11225_s1 + $0x7c4] ss:$16 sps:$4 sm:$0xff]   ;;  %v7723_v20 = vld [vmem:[%s11225_s1 + $0x7cc] ss:$16 sps:$4 sm:$0xff]  }
  0xbf   :  { %5058 = vmatpush1.bf16.msra.mxu0 %v7627_v21  ;;  %5591 = vmatpush1.bf16.msra.mxu1 %v7630_v22  ;;  %v9408_v21 = vld.sshfl [vmem:[%s11224_s0 + $0x8] sm:$0xff pattern:$0x75316420]  ;;  %v7718_v22 = vld [vmem:[%s11225_s1 + $0x7c0] ss:$16 sps:$4 sm:$0xff]  }
  0xc0   :  { %5068 = vmatprep.subr.bf16.mxu0 %v7636_v23  ;;  %5601 = vmatprep.subr.bf16.mxu1 %v7639_v24  ;;  %v7721_v23 = vld [vmem:[%s11225_s1 + $0x7c8] ss:$16 sps:$4 sm:$0xff]   ;;  %v7726_v24 = vld [vmem:[%s11225_s1 + $0x7e4] ss:$16 sps:$4 sm:$0xff]  }
  0xc2   :  { %5060 = vmatmul.mubr.bf16.vlgmr.msra.gmra.mrb[0].mxu0 %v9234_v26  ;;  %5593 = vmatmul.mubr.bf16.vlgmr.msra.gmra.mrb[0].mxu1 %v9234_v26 }
  0xc3   :  { %5069 = vmatpush1.bf16.msra.mxu0 %v7634_v13  ;;  %5602 = vmatpush1.bf16.msra.mxu1 %v7637_v27  ;;  %v7729_v13 = vld [vmem:[%s11225_s1 + $0x7ec] ss:$16 sps:$4 sm:$0xff]   ;;  %v7724_v27 = vld [vmem:[%s11225_s1 + $0x7e0] ss:$16 sps:$4 sm:$0xff]  }
  0xc4   :  { %5070 = vmatprep.subr.bf16.mxu0 %v7642_v28  ;;  %5603 = vmatprep.subr.bf16.mxu1 %v7645_v29  ;;  %v7727_v28 = vld [vmem:[%s11225_s1 + $0x7e8] ss:$16 sps:$4 sm:$0xff]   ;;  %v7732_v29 = vld [vmem:[%s11225_s1 + $0x804] ss:$16 sps:$4 sm:$0xff]  }
  0xc5   :  { %5100 = vmatprep.mubr.bf16.mxu0 %v884_v14  ;;  %5633 = vmatprep.mubr.bf16.mxu1 %v884_v14  ;;  %v7735_v14 = vld [vmem:[%s11225_s1 + $0x80c] ss:$16 sps:$4 sm:$0xff]  }
  0xc7   :  { %5071 = vmatpush1.bf16.msra.mxu0 %v7640_v30  ;;  %5604 = vmatpush1.bf16.msra.mxu1 %v7643_v31  ;;  %v900_v30 = vcombine.high %v9408_v21, %v9408_v21  ;;  %v882_v31 = vcombine.high %v9234_v26, %v9234_v26  ;;  %v7741_v26 = vld [vmem:[%s11225_s1 + $0x82c] ss:$16 sps:$4 sm:$0xff]  }
  0xc8   :  { %5072 = vmatprep.subr.bf16.mxu0 %v7648_v25  ;;  %5605 = vmatprep.subr.bf16.mxu1 %v7651_v32  ;;  %v7730_v25 = vld [vmem:[%s11225_s1 + $0x800] ss:$16 sps:$4 sm:$0xff]   ;;  %v7733_v32 = vld [vmem:[%s11225_s1 + $0x808] ss:$16 sps:$4 sm:$0xff]  }
  0xcb   :  { %5073 = vmatpush1.bf16.msra.mxu0 %v7646_v33  ;;  %5606 = vmatpush1.bf16.msra.mxu1 %v7649_v34  ;;  %v7738_v33 = vld [vmem:[%s11225_s1 + $0x824] ss:$16 sps:$4 sm:$0xff]   ;;  %v9451_v34 = vrot.slane %v900_v30, %v8750_v49 }
  0xcc   :  { %5074 = vmatprep.subr.bf16.mxu0 %v7654_v35  ;;  %5607 = vmatprep.subr.bf16.mxu1 %v7657_v36  ;;  %v7736_v35 = vld [vmem:[%s11225_s1 + $0x820] ss:$16 sps:$4 sm:$0xff]   ;;  %v7739_v36 = vld [vmem:[%s11225_s1 + $0x828] ss:$16 sps:$4 sm:$0xff]   ;;  %v7822_v30 = vld [vmem:[%s11225_s1 + $0x9e4] ss:$16 sps:$4 sm:$0xff]  }
  0xcf   :  { %5075 = vmatpush1.bf16.msra.mxu0 %v7652_v37  ;;  %5608 = vmatpush1.bf16.msra.mxu1 %v7655_v38  ;;  %v7744_v37 = vld [vmem:[%s11225_s1 + $0x844] ss:$16 sps:$4 sm:$0xff]   ;;  %v7747_v38 = vld [vmem:[%s11225_s1 + $0x84c] ss:$16 sps:$4 sm:$0xff]  }
  0xd0   :  { %5076 = vmatprep.subr.bf16.mxu0 %v7660_v39  ;;  %5609 = vmatprep.subr.bf16.mxu1 %v7663_v40  ;;  %v7742_v39 = vld [vmem:[%s11225_s1 + $0x840] ss:$16 sps:$4 sm:$0xff]   ;;  %v7745_v40 = vld [vmem:[%s11225_s1 + $0x848] ss:$16 sps:$4 sm:$0xff]  }
  0xd3   :  { %5077 = vmatpush1.bf16.msra.mxu0 %v7658_v41  ;;  %5610 = vmatpush1.bf16.msra.mxu1 %v7661_v43  ;;  %v7750_v41 = vld [vmem:[%s11225_s1 + $0x864] ss:$16 sps:$4 sm:$0xff]   ;;  %v7753_v43 = vld [vmem:[%s11225_s1 + $0x86c] ss:$16 sps:$4 sm:$0xff]  }
  0xd4   :  { %5078 = vmatprep.subr.bf16.mxu0 %v7666_v44  ;;  %5611 = vmatprep.subr.bf16.mxu1 %v7669_v45  ;;  %v7748_v44 = vld [vmem:[%s11225_s1 + $0x860] ss:$16 sps:$4 sm:$0xff]   ;;  %v7751_v45 = vld [vmem:[%s11225_s1 + $0x868] ss:$16 sps:$4 sm:$0xff]  }
  0xd7   :  { %5079 = vmatpush1.bf16.msra.mxu0 %v7664_v46  ;;  %5612 = vmatpush1.bf16.msra.mxu1 %v7667_v47  ;;  %v7756_v46 = vld [vmem:[%s11225_s1 + $0x884] ss:$16 sps:$4 sm:$0xff]   ;;  %v7759_v47 = vld [vmem:[%s11225_s1 + $0x88c] ss:$16 sps:$4 sm:$0xff]  }
  0xd8   :  { %5080 = vmatprep.subr.bf16.mxu0 %v7672_v48  ;;  %5613 = vmatprep.subr.bf16.mxu1 %v7675_v50  ;;  %v7754_v48 = vld [vmem:[%s11225_s1 + $0x880] ss:$16 sps:$4 sm:$0xff]   ;;  %v7757_v50 = vld [vmem:[%s11225_s1 + $0x888] ss:$16 sps:$4 sm:$0xff]  }
  0xdb   :  { %5081 = vmatpush1.bf16.msra.mxu0 %v7670_v51  ;;  %5614 = vmatpush1.bf16.msra.mxu1 %v7673_v53  ;;  %v7762_v51 = vld [vmem:[%s11225_s1 + $0x8a4] ss:$16 sps:$4 sm:$0xff]   ;;  %v7765_v53 = vld [vmem:[%s11225_s1 + $0x8ac] ss:$16 sps:$4 sm:$0xff]  }
  0xdc   :  { %5082 = vmatprep.subr.bf16.mxu0 %v7678_v54  ;;  %5615 = vmatprep.subr.bf16.mxu1 %v7681_v55  ;;  %v7760_v54 = vld [vmem:[%s11225_s1 + $0x8a0] ss:$16 sps:$4 sm:$0xff]   ;;  %v7763_v55 = vld [vmem:[%s11225_s1 + $0x8a8] ss:$16 sps:$4 sm:$0xff]  }
  0xdf   :  { %5083 = vmatpush1.bf16.msra.mxu0 %v7676_v56  ;;  %5616 = vmatpush1.bf16.msra.mxu1 %v7679_v57  ;;  %v7768_v56 = vld [vmem:[%s11225_s1 + $0x8c4] ss:$16 sps:$4 sm:$0xff]   ;;  %v7771_v57 = vld [vmem:[%s11225_s1 + $0x8cc] ss:$16 sps:$4 sm:$0xff]  }
  0xe0   :  { %5084 = vmatprep.subr.bf16.mxu0 %v7684_v58  ;;  %5617 = vmatprep.subr.bf16.mxu1 %v7687_v59  ;;  %v7766_v58 = vld [vmem:[%s11225_s1 + $0x8c0] ss:$16 sps:$4 sm:$0xff]   ;;  %v7769_v59 = vld [vmem:[%s11225_s1 + $0x8c8] ss:$16 sps:$4 sm:$0xff]  }
  0xe3   :  { %5085 = vmatpush1.bf16.msra.mxu0 %v7682_v60  ;;  %5618 = vmatpush1.bf16.msra.mxu1 %v7685_v61  ;;  %v7774_v60 = vld [vmem:[%s11225_s1 + $0x8e4] ss:$16 sps:$4 sm:$0xff]   ;;  %v7777_v61 = vld [vmem:[%s11225_s1 + $0x8ec] ss:$16 sps:$4 sm:$0xff]  }
  0xe4   :  { %5086 = vmatprep.subr.bf16.mxu0 %v7690_v62  ;;  %5619 = vmatprep.subr.bf16.mxu1 %v7693_v63  ;;  %v7772_v62 = vld [vmem:[%s11225_s1 + $0x8e0] ss:$16 sps:$4 sm:$0xff]   ;;  %v7775_v63 = vld [vmem:[%s11225_s1 + $0x8e8] ss:$16 sps:$4 sm:$0xff]  }
  0xe7   :  { %5087 = vmatpush1.bf16.msra.mxu0 %v7688_v0  ;;  %5620 = vmatpush1.bf16.msra.mxu1 %v7691_v1  ;;  %v7780_v0 = vld [vmem:[%s11225_s1 + $0x904] ss:$16 sps:$4 sm:$0xff]   ;;  %v7783_v1 = vld [vmem:[%s11225_s1 + $0x90c] ss:$16 sps:$4 sm:$0xff]  }
  0xe8   :  { %5088 = vmatprep.subr.bf16.mxu0 %v7696_v2  ;;  %5621 = vmatprep.subr.bf16.mxu1 %v7699_v3  ;;  %v7778_v2 = vld [vmem:[%s11225_s1 + $0x900] ss:$16 sps:$4 sm:$0xff]   ;;  %v7781_v3 = vld [vmem:[%s11225_s1 + $0x908] ss:$16 sps:$4 sm:$0xff]  }
  0xeb   :  { %5089 = vmatpush1.bf16.msra.mxu0 %v7694_v4  ;;  %5622 = vmatpush1.bf16.msra.mxu1 %v7697_v5  ;;  %v7786_v4 = vld [vmem:[%s11225_s1 + $0x924] ss:$16 sps:$4 sm:$0xff]   ;;  %v7789_v5 = vld [vmem:[%s11225_s1 + $0x92c] ss:$16 sps:$4 sm:$0xff]  }
  0xec   :  { %5090 = vmatprep.subr.bf16.mxu0 %v7702_v6  ;;  %5623 = vmatprep.subr.bf16.mxu1 %v7705_v7  ;;  %v7784_v6 = vld [vmem:[%s11225_s1 + $0x920] ss:$16 sps:$4 sm:$0xff]   ;;  %v7787_v7 = vld [vmem:[%s11225_s1 + $0x928] ss:$16 sps:$4 sm:$0xff]  }
  0xef   :  { %5091 = vmatpush1.bf16.msra.mxu0 %v7700_v8  ;;  %5624 = vmatpush1.bf16.msra.mxu1 %v7703_v9  ;;  %v7792_v8 = vld [vmem:[%s11225_s1 + $0x944] ss:$16 sps:$4 sm:$0xff]   ;;  %v7795_v9 = vld [vmem:[%s11225_s1 + $0x94c] ss:$16 sps:$4 sm:$0xff]  }
  0xf0   :  { %5092 = vmatprep.subr.bf16.mxu0 %v7708_v10  ;;  %5625 = vmatprep.subr.bf16.mxu1 %v7711_v11  ;;  %v7790_v10 = vld [vmem:[%s11225_s1 + $0x940] ss:$16 sps:$4 sm:$0xff]   ;;  %v7793_v11 = vld [vmem:[%s11225_s1 + $0x948] ss:$16 sps:$4 sm:$0xff]  }
  0xf3   :  { %5093 = vmatpush1.bf16.msra.mxu0 %v7706_v12  ;;  %5626 = vmatpush1.bf16.msra.mxu1 %v7709_v52  ;;  %v7798_v12 = vld [vmem:[%s11225_s1 + $0x964] ss:$16 sps:$4 sm:$0xff]   ;;  %v7801_v52 = vld [vmem:[%s11225_s1 + $0x96c] ss:$16 sps:$4 sm:$0xff]  }
  0xf4   :  { %5094 = vmatprep.subr.bf16.mxu0 %v7714_v15  ;;  %5627 = vmatprep.subr.bf16.mxu1 %v7717_v16  ;;  %v7796_v15 = vld [vmem:[%s11225_s1 + $0x960] ss:$16 sps:$4 sm:$0xff]   ;;  %v7799_v16 = vld [vmem:[%s11225_s1 + $0x968] ss:$16 sps:$4 sm:$0xff]  }
  0xf7   :  { %5095 = vmatpush1.bf16.msra.mxu0 %v7712_v17  ;;  %5628 = vmatpush1.bf16.msra.mxu1 %v7715_v18  ;;  %v7804_v17 = vld [vmem:[%s11225_s1 + $0x984] ss:$16 sps:$4 sm:$0xff]   ;;  %v7807_v18 = vld [vmem:[%s11225_s1 + $0x98c] ss:$16 sps:$4 sm:$0xff]  }
  0xf8   :  { %5096 = vmatprep.subr.bf16.mxu0 %v7720_v19  ;;  %5629 = vmatprep.subr.bf16.mxu1 %v7723_v20  ;;  %v7802_v19 = vld [vmem:[%s11225_s1 + $0x980] ss:$16 sps:$4 sm:$0xff]   ;;  %v7805_v20 = vld [vmem:[%s11225_s1 + $0x988] ss:$16 sps:$4 sm:$0xff]  }
  0xfb   :  { %5097 = vmatpush1.bf16.msra.mxu0 %v7718_v22  ;;  %5630 = vmatpush1.bf16.msra.mxu1 %v7721_v23  ;;  %v7810_v22 = vld [vmem:[%s11225_s1 + $0x9a4] ss:$16 sps:$4 sm:$0xff]   ;;  %v7813_v23 = vld [vmem:[%s11225_s1 + $0x9ac] ss:$16 sps:$4 sm:$0xff]  }
  0xfc   :  { %5098 = vmatprep.subr.bf16.mxu0 %v7726_v24  ;;  %5631 = vmatprep.subr.bf16.mxu1 %v7729_v13  ;;  %v7808_v24 = vld [vmem:[%s11225_s1 + $0x9a0] ss:$16 sps:$4 sm:$0xff]   ;;  %v7811_v13 = vld [vmem:[%s11225_s1 + $0x9a8] ss:$16 sps:$4 sm:$0xff]  }
  0xff   :  { %5099 = vmatpush1.bf16.msra.mxu0 %v7724_v27  ;;  %5632 = vmatpush1.bf16.msra.mxu1 %v7727_v28  ;;  %v7816_v27 = vld [vmem:[%s11225_s1 + $0x9c4] ss:$16 sps:$4 sm:$0xff]   ;;  %v7819_v28 = vld [vmem:[%s11225_s1 + $0x9cc] ss:$16 sps:$4 sm:$0xff]  }
 0x100   :  { %5109 = vmatprep.subr.bf16.mxu0 %v7732_v29  ;;  %5642 = vmatprep.subr.bf16.mxu1 %v7735_v14  ;;  %v7814_v29 = vld [vmem:[%s11225_s1 + $0x9c0] ss:$16 sps:$4 sm:$0xff]   ;;  %v7817_v14 = vld [vmem:[%s11225_s1 + $0x9c8] ss:$16 sps:$4 sm:$0xff]  }
 0x102   :  { %5101 = vmatmul.mubr.bf16.vlgmr.msra.gmra.mrb[0].mxu0 %v882_v31  ;;  %5634 = vmatmul.mubr.bf16.vlgmr.msra.gmra.mrb[0].mxu1 %v882_v31  ;;  %v7825_v31 = vld [vmem:[%s11225_s1 + $0x9ec] ss:$16 sps:$4 sm:$0xff]  }
 0x103   :  { %5110 = vmatpush1.bf16.msra.mxu0 %v7730_v25  ;;  %5643 = vmatpush1.bf16.msra.mxu1 %v7733_v32  ;;  %v7820_v25 = vld [vmem:[%s11225_s1 + $0x9e0] ss:$16 sps:$4 sm:$0xff]   ;;  %v7823_v32 = vld [vmem:[%s11225_s1 + $0x9e8] ss:$16 sps:$4 sm:$0xff]  }
 0x104   :  { %5111 = vmatprep.subr.bf16.mxu0 %v7738_v33  ;;  %5644 = vmatprep.subr.bf16.mxu1 %v7741_v26  ;;  %v7828_v33 = vld [vmem:[%s11225_s1 + $0xa04] ss:$16 sps:$4 sm:$0xff]   ;;  %v7831_v26 = vld [vmem:[%s11225_s1 + $0xa0c] ss:$16 sps:$4 sm:$0xff]  }
 0x105   :  { %5141 = vmatprep.mubr.bf16.mxu0 %v9451_v34  ;;  %5674 = vmatprep.mubr.bf16.mxu1 %v9451_v34 }
 0x107   :  { %5112 = vmatpush1.bf16.msra.mxu0 %v7736_v35  ;;  %5645 = vmatpush1.bf16.msra.mxu1 %v7739_v36  ;;  %v9637_v35 = vrot.slane %v9408_v21, %v8750_v49  ;;  %v7826_v36 = vld [vmem:[%s11225_s1 + $0xa00] ss:$16 sps:$4 sm:$0xff]   ;;  %v7837_v21 = vld [vmem:[%s11225_s1 + $0xa2c] ss:$16 sps:$4 sm:$0xff]  }
 0x108   :  { %5113 = vmatprep.subr.bf16.mxu0 %v7744_v37  ;;  %5646 = vmatprep.subr.bf16.mxu1 %v7747_v38  ;;  %v7829_v37 = vld [vmem:[%s11225_s1 + $0xa08] ss:$16 sps:$4 sm:$0xff]   ;;  %v7834_v38 = vld [vmem:[%s11225_s1 + $0xa24] ss:$16 sps:$4 sm:$0xff]  }
 0x10b   :  { %5114 = vmatpush1.bf16.msra.mxu0 %v7742_v39  ;;  %5647 = vmatpush1.bf16.msra.mxu1 %v7745_v40  ;;  %v932_v39 = vcombine.high %v9451_v34, %v9451_v34  ;;  %v7832_v40 = vld [vmem:[%s11225_s1 + $0xa20] ss:$16 sps:$4 sm:$0xff]   ;;  %v7840_v34 = vld [vmem:[%s11225_s1 + $0xa44] ss:$16 sps:$4 sm:$0xff]  }
 0x10c   :  { %5115 = vmatprep.subr.bf16.mxu0 %v7750_v41  ;;  %5648 = vmatprep.subr.bf16.mxu1 %v7753_v43  ;;  %v7835_v41 = vld [vmem:[%s11225_s1 + $0xa28] ss:$16 sps:$4 sm:$0xff]   ;;  %v7843_v43 = vld [vmem:[%s11225_s1 + $0xa4c] ss:$16 sps:$4 sm:$0xff]  }
 0x10f   :  { %5116 = vmatpush1.bf16.msra.mxu0 %v7748_v44  ;;  %5649 = vmatpush1.bf16.msra.mxu1 %v7751_v45  ;;  %v7838_v44 = vld [vmem:[%s11225_s1 + $0xa40] ss:$16 sps:$4 sm:$0xff]   ;;  %v7841_v45 = vld [vmem:[%s11225_s1 + $0xa48] ss:$16 sps:$4 sm:$0xff]  }
 0x110   :  { %5117 = vmatprep.subr.bf16.mxu0 %v7756_v46  ;;  %5650 = vmatprep.subr.bf16.mxu1 %v7759_v47  ;;  %v7846_v46 = vld [vmem:[%s11225_s1 + $0xa64] ss:$16 sps:$4 sm:$0xff]   ;;  %v7849_v47 = vld [vmem:[%s11225_s1 + $0xa6c] ss:$16 sps:$4 sm:$0xff]  }
 0x113   :  { %5118 = vmatpush1.bf16.msra.mxu0 %v7754_v48  ;;  %5651 = vmatpush1.bf16.msra.mxu1 %v7757_v50  ;;  %v7844_v48 = vld [vmem:[%s11225_s1 + $0xa60] ss:$16 sps:$4 sm:$0xff]   ;;  %v7847_v50 = vld [vmem:[%s11225_s1 + $0xa68] ss:$16 sps:$4 sm:$0xff]  }
 0x114   :  { %5119 = vmatprep.subr.bf16.mxu0 %v7762_v51  ;;  %5652 = vmatprep.subr.bf16.mxu1 %v7765_v53  ;;  %v7852_v51 = vld [vmem:[%s11225_s1 + $0xa84] ss:$16 sps:$4 sm:$0xff]   ;;  %v7855_v53 = vld [vmem:[%s11225_s1 + $0xa8c] ss:$16 sps:$4 sm:$0xff]  }
 0x117   :  { %5120 = vmatpush1.bf16.msra.mxu0 %v7760_v54  ;;  %5653 = vmatpush1.bf16.msra.mxu1 %v7763_v55  ;;  %v7850_v54 = vld [vmem:[%s11225_s1 + $0xa80] ss:$16 sps:$4 sm:$0xff]   ;;  %v7853_v55 = vld [vmem:[%s11225_s1 + $0xa88] ss:$16 sps:$4 sm:$0xff]  }
 0x118   :  { %5121 = vmatprep.subr.bf16.mxu0 %v7768_v56  ;;  %5654 = vmatprep.subr.bf16.mxu1 %v7771_v57  ;;  %v7858_v56 = vld [vmem:[%s11225_s1 + $0xaa4] ss:$16 sps:$4 sm:$0xff]   ;;  %v7861_v57 = vld [vmem:[%s11225_s1 + $0xaac] ss:$16 sps:$4 sm:$0xff]  }
 0x11b   :  { %5122 = vmatpush1.bf16.msra.mxu0 %v7766_v58  ;;  %5655 = vmatpush1.bf16.msra.mxu1 %v7769_v59  ;;  %v7856_v58 = vld [vmem:[%s11225_s1 + $0xaa0] ss:$16 sps:$4 sm:$0xff]   ;;  %v7859_v59 = vld [vmem:[%s11225_s1 + $0xaa8] ss:$16 sps:$4 sm:$0xff]  }
 0x11c   :  { %5123 = vmatprep.subr.bf16.mxu0 %v7774_v60  ;;  %5656 = vmatprep.subr.bf16.mxu1 %v7777_v61  ;;  %v7864_v60 = vld [vmem:[%s11225_s1 + $0xac4] ss:$16 sps:$4 sm:$0xff]   ;;  %v7867_v61 = vld [vmem:[%s11225_s1 + $0xacc] ss:$16 sps:$4 sm:$0xff]  }
 0x11f   :  { %5124 = vmatpush1.bf16.msra.mxu0 %v7772_v62  ;;  %5657 = vmatpush1.bf16.msra.mxu1 %v7775_v63  ;;  %v7862_v62 = vld [vmem:[%s11225_s1 + $0xac0] ss:$16 sps:$4 sm:$0xff]   ;;  %v7865_v63 = vld [vmem:[%s11225_s1 + $0xac8] ss:$16 sps:$4 sm:$0xff]  }
 0x120   :  { %5125 = vmatprep.subr.bf16.mxu0 %v7780_v0  ;;  %5658 = vmatprep.subr.bf16.mxu1 %v7783_v1  ;;  %v7870_v0 = vld [vmem:[%s11225_s1 + $0xae4] ss:$16 sps:$4 sm:$0xff]   ;;  %v7873_v1 = vld [vmem:[%s11225_s1 + $0xaec] ss:$16 sps:$4 sm:$0xff]  }
 0x123   :  { %5126 = vmatpush1.bf16.msra.mxu0 %v7778_v2  ;;  %5659 = vmatpush1.bf16.msra.mxu1 %v7781_v3  ;;  %v7868_v2 = vld [vmem:[%s11225_s1 + $0xae0] ss:$16 sps:$4 sm:$0xff]   ;;  %v7871_v3 = vld [vmem:[%s11225_s1 + $0xae8] ss:$16 sps:$4 sm:$0xff]  }
 0x124   :  { %5127 = vmatprep.subr.bf16.mxu0 %v7786_v4  ;;  %5660 = vmatprep.subr.bf16.mxu1 %v7789_v5  ;;  %v7876_v4 = vld [vmem:[%s11225_s1 + $0xb04] ss:$16 sps:$4 sm:$0xff]   ;;  %v7879_v5 = vld [vmem:[%s11225_s1 + $0xb0c] ss:$16 sps:$4 sm:$0xff]  }
 0x127   :  { %5128 = vmatpush1.bf16.msra.mxu0 %v7784_v6  ;;  %5661 = vmatpush1.bf16.msra.mxu1 %v7787_v7  ;;  %v7874_v6 = vld [vmem:[%s11225_s1 + $0xb00] ss:$16 sps:$4 sm:$0xff]   ;;  %v7877_v7 = vld [vmem:[%s11225_s1 + $0xb08] ss:$16 sps:$4 sm:$0xff]  }
 0x128   :  { %5129 = vmatprep.subr.bf16.mxu0 %v7792_v8  ;;  %5662 = vmatprep.subr.bf16.mxu1 %v7795_v9  ;;  %v7882_v8 = vld [vmem:[%s11225_s1 + $0xb24] ss:$16 sps:$4 sm:$0xff]   ;;  %v7885_v9 = vld [vmem:[%s11225_s1 + $0xb2c] ss:$16 sps:$4 sm:$0xff]  }
 0x12b   :  { %5130 = vmatpush1.bf16.msra.mxu0 %v7790_v10  ;;  %5663 = vmatpush1.bf16.msra.mxu1 %v7793_v11  ;;  %v7880_v10 = vld [vmem:[%s11225_s1 + $0xb20] ss:$16 sps:$4 sm:$0xff]   ;;  %v7883_v11 = vld [vmem:[%s11225_s1 + $0xb28] ss:$16 sps:$4 sm:$0xff]  }
 0x12c   :  { %5131 = vmatprep.subr.bf16.mxu0 %v7798_v12  ;;  %5664 = vmatprep.subr.bf16.mxu1 %v7801_v52  ;;  %v7888_v12 = vld [vmem:[%s11225_s1 + $0xb44] ss:$16 sps:$4 sm:$0xff]   ;;  %v7891_v52 = vld [vmem:[%s11225_s1 + $0xb4c] ss:$16 sps:$4 sm:$0xff]  }
 0x12f   :  { %5132 = vmatpush1.bf16.msra.mxu0 %v7796_v15  ;;  %5665 = vmatpush1.bf16.msra.mxu1 %v7799_v16  ;;  %v7886_v15 = vld [vmem:[%s11225_s1 + $0xb40] ss:$16 sps:$4 sm:$0xff]   ;;  %v7889_v16 = vld [vmem:[%s11225_s1 + $0xb48] ss:$16 sps:$4 sm:$0xff]  }
 0x130   :  { %5133 = vmatprep.subr.bf16.mxu0 %v7804_v17  ;;  %5666 = vmatprep.subr.bf16.mxu1 %v7807_v18  ;;  %v7894_v17 = vld [vmem:[%s11225_s1 + $0xb64] ss:$16 sps:$4 sm:$0xff]   ;;  %v7897_v18 = vld [vmem:[%s11225_s1 + $0xb6c] ss:$16 sps:$4 sm:$0xff]  }
 0x133   :  { %5134 = vmatpush1.bf16.msra.mxu0 %v7802_v19  ;;  %5667 = vmatpush1.bf16.msra.mxu1 %v7805_v20  ;;  %v7892_v19 = vld [vmem:[%s11225_s1 + $0xb60] ss:$16 sps:$4 sm:$0xff]   ;;  %v7895_v20 = vld [vmem:[%s11225_s1 + $0xb68] ss:$16 sps:$4 sm:$0xff]  }
 0x134   :  { %5135 = vmatprep.subr.bf16.mxu0 %v7810_v22  ;;  %5668 = vmatprep.subr.bf16.mxu1 %v7813_v23  ;;  %v7900_v22 = vld [vmem:[%s11225_s1 + $0xb84] ss:$16 sps:$4 sm:$0xff]   ;;  %v7903_v23 = vld [vmem:[%s11225_s1 + $0xb8c] ss:$16 sps:$4 sm:$0xff]  }
 0x137   :  { %5136 = vmatpush1.bf16.msra.mxu0 %v7808_v24  ;;  %5669 = vmatpush1.bf16.msra.mxu1 %v7811_v13  ;;  %v7898_v24 = vld [vmem:[%s11225_s1 + $0xb80] ss:$16 sps:$4 sm:$0xff]   ;;  %v7901_v13 = vld [vmem:[%s11225_s1 + $0xb88] ss:$16 sps:$4 sm:$0xff]  }
 0x138   :  { %5137 = vmatprep.subr.bf16.mxu0 %v7816_v27  ;;  %5670 = vmatprep.subr.bf16.mxu1 %v7819_v28  ;;  %v7906_v27 = vld [vmem:[%s11225_s1 + $0xba4] ss:$16 sps:$4 sm:$0xff]   ;;  %v7909_v28 = vld [vmem:[%s11225_s1 + $0xbac] ss:$16 sps:$4 sm:$0xff]  }
 0x13b   :  { %5138 = vmatpush1.bf16.msra.mxu0 %v7814_v29  ;;  %5671 = vmatpush1.bf16.msra.mxu1 %v7817_v14  ;;  %v7904_v29 = vld [vmem:[%s11225_s1 + $0xba0] ss:$16 sps:$4 sm:$0xff]   ;;  %v7907_v14 = vld [vmem:[%s11225_s1 + $0xba8] ss:$16 sps:$4 sm:$0xff]  }
 0x13c   :  { %5139 = vmatprep.subr.bf16.mxu0 %v7822_v30  ;;  %5672 = vmatprep.subr.bf16.mxu1 %v7825_v31  ;;  %v7912_v30 = vld [vmem:[%s11225_s1 + $0xbc4] ss:$16 sps:$4 sm:$0xff]   ;;  %v7915_v31 = vld [vmem:[%s11225_s1 + $0xbcc] ss:$16 sps:$4 sm:$0xff]  }
 0x13f   :  { %5140 = vmatpush1.bf16.msra.mxu0 %v7820_v25  ;;  %5673 = vmatpush1.bf16.msra.mxu1 %v7823_v32  ;;  %v8556_v25 = vld [vmem:[%s11224_s0 + $0x8] sm:$0xff] }
 0x140   :  { %5150 = vmatprep.subr.bf16.mxu0 %v7828_v33  ;;  %5683 = vmatprep.subr.bf16.mxu1 %v7831_v26  ;;  %v885_v32 = vcombine.high %v8556_v25, %v8556_v25  ;;  %v7910_v33 = vld [vmem:[%s11225_s1 + $0xbc0] ss:$16 sps:$4 sm:$0xff]   ;;  %v7913_v26 = vld [vmem:[%s11225_s1 + $0xbc8] ss:$16 sps:$4 sm:$0xff]  }
 0x141   :  { %v7994_v25 = vld [vmem:[%s11225_s1 + $0xd80] ss:$16 sps:$4 sm:$0xff]  }
 0x142   :  { %5142 = vmatmul.mubr.bf16.vlgmr.msra.gmra.mrb[0].mxu0 %v9637_v35  ;;  %5675 = vmatmul.mubr.bf16.vlgmr.msra.gmra.mrb[0].mxu1 %v9637_v35 }
 0x143   :  { %5151 = vmatpush1.bf16.msra.mxu0 %v7826_v36  ;;  %5684 = vmatpush1.bf16.msra.mxu1 %v7829_v37  ;;  %v7918_v36 = vld [vmem:[%s11225_s1 + $0xbe4] ss:$16 sps:$4 sm:$0xff]   ;;  %v7921_v37 = vld [vmem:[%s11225_s1 + $0xbec] ss:$16 sps:$4 sm:$0xff]  }
 0x144   :  { %5152 = vmatprep.subr.bf16.mxu0 %v7834_v38  ;;  %5685 = vmatprep.subr.bf16.mxu1 %v7837_v21  ;;  %v9827_v38 = vrot.slane %v885_v32, %v8750_v49  ;;  %v7916_v21 = vld [vmem:[%s11225_s1 + $0xbe0] ss:$16 sps:$4 sm:$0xff]   ;;  %v7997_v32 = vld [vmem:[%s11225_s1 + $0xd88] ss:$16 sps:$4 sm:$0xff]  }
 0x145   :  { %5182 = vmatprep.mubr.bf16.mxu0 %v932_v39  ;;  %5715 = vmatprep.mubr.bf16.mxu1 %v932_v39  ;;  %v7919_v39 = vld [vmem:[%s11225_s1 + $0xbe8] ss:$16 sps:$4 sm:$0xff]  }
 0x147   :  { %5153 = vmatpush1.bf16.msra.mxu0 %v7832_v40  ;;  %5686 = vmatpush1.bf16.msra.mxu1 %v7835_v41  ;;  %v7924_v40 = vld [vmem:[%s11225_s1 + $0xc04] ss:$16 sps:$4 sm:$0xff]   ;;  %v7927_v41 = vld [vmem:[%s11225_s1 + $0xc0c] ss:$16 sps:$4 sm:$0xff]  }
 0x148   :  { %5154 = vmatprep.subr.bf16.mxu0 %v7840_v34  ;;  %5687 = vmatprep.subr.bf16.mxu1 %v7843_v43  ;;  %v901_v34 = vcombine.high %v9827_v38, %v9827_v38  ;;  %v930_v43 = vcombine.high %v9637_v35, %v9637_v35  ;;  %v7933_v35 = vld [vmem:[%s11225_s1 + $0xc2c] ss:$16 sps:$4 sm:$0xff]  }
 0x14b   :  { %5155 = vmatpush1.bf16.msra.mxu0 %v7838_v44  ;;  %5688 = vmatpush1.bf16.msra.mxu1 %v7841_v45  ;;  %v7922_v44 = vld [vmem:[%s11225_s1 + $0xc00] ss:$16 sps:$4 sm:$0xff]   ;;  %v7925_v45 = vld [vmem:[%s11225_s1 + $0xc08] ss:$16 sps:$4 sm:$0xff]  }
 0x14c   :  { %5156 = vmatprep.subr.bf16.mxu0 %v7846_v46  ;;  %5689 = vmatprep.subr.bf16.mxu1 %v7849_v47  ;;  %v7930_v46 = vld [vmem:[%s11225_s1 + $0xc24] ss:$16 sps:$4 sm:$0xff]   ;;  %v9858_v47 = vrot.slane %v901_v34, %v8750_v49 }
 0x14d   :  { %v8014_v34 = vld [vmem:[%s11225_s1 + $0xde4] ss:$16 sps:$4 sm:$0xff]  }
 0x14f   :  { %5157 = vmatpush1.bf16.msra.mxu0 %v7844_v48  ;;  %5690 = vmatpush1.bf16.msra.mxu1 %v7847_v50  ;;  %v7928_v48 = vld [vmem:[%s11225_s1 + $0xc20] ss:$16 sps:$4 sm:$0xff]   ;;  %v7931_v50 = vld [vmem:[%s11225_s1 + $0xc28] ss:$16 sps:$4 sm:$0xff]  }
 0x150   :  { %5158 = vmatprep.subr.bf16.mxu0 %v7852_v51  ;;  %5691 = vmatprep.subr.bf16.mxu1 %v7855_v53  ;;  %v7936_v51 = vld [vmem:[%s11225_s1 + $0xc44] ss:$16 sps:$4 sm:$0xff]   ;;  %v7939_v53 = vld [vmem:[%s11225_s1 + $0xc4c] ss:$16 sps:$4 sm:$0xff]  }
 0x153   :  { %5159 = vmatpush1.bf16.msra.mxu0 %v7850_v54  ;;  %5692 = vmatpush1.bf16.msra.mxu1 %v7853_v55  ;;  %v7934_v54 = vld [vmem:[%s11225_s1 + $0xc40] ss:$16 sps:$4 sm:$0xff]   ;;  %v7937_v55 = vld [vmem:[%s11225_s1 + $0xc48] ss:$16 sps:$4 sm:$0xff]  }
 0x154   :  { %5160 = vmatprep.subr.bf16.mxu0 %v7858_v56  ;;  %5693 = vmatprep.subr.bf16.mxu1 %v7861_v57  ;;  %v7942_v56 = vld [vmem:[%s11225_s1 + $0xc64] ss:$16 sps:$4 sm:$0xff]   ;;  %v7945_v57 = vld [vmem:[%s11225_s1 + $0xc6c] ss:$16 sps:$4 sm:$0xff]  }
 0x157   :  { %5161 = vmatpush1.bf16.msra.mxu0 %v7856_v58  ;;  %5694 = vmatpush1.bf16.msra.mxu1 %v7859_v59  ;;  %v7940_v58 = vld [vmem:[%s11225_s1 + $0xc60] ss:$16 sps:$4 sm:$0xff]   ;;  %v7943_v59 = vld [vmem:[%s11225_s1 + $0xc68] ss:$16 sps:$4 sm:$0xff]  }
 0x158   :  { %5162 = vmatprep.subr.bf16.mxu0 %v7864_v60  ;;  %5695 = vmatprep.subr.bf16.mxu1 %v7867_v61  ;;  %v7948_v60 = vld [vmem:[%s11225_s1 + $0xc84] ss:$16 sps:$4 sm:$0xff]   ;;  %v7951_v61 = vld [vmem:[%s11225_s1 + $0xc8c] ss:$16 sps:$4 sm:$0xff]  }
 0x15b   :  { %5163 = vmatpush1.bf16.msra.mxu0 %v7862_v62  ;;  %5696 = vmatpush1.bf16.msra.mxu1 %v7865_v63  ;;  %v7946_v62 = vld [vmem:[%s11225_s1 + $0xc80] ss:$16 sps:$4 sm:$0xff]   ;;  %v7949_v63 = vld [vmem:[%s11225_s1 + $0xc88] ss:$16 sps:$4 sm:$0xff]  }
 0x15c   :  { %5164 = vmatprep.subr.bf16.mxu0 %v7870_v0  ;;  %5697 = vmatprep.subr.bf16.mxu1 %v7873_v1  ;;  %v7954_v0 = vld [vmem:[%s11225_s1 + $0xca4] ss:$16 sps:$4 sm:$0xff]   ;;  %v7957_v1 = vld [vmem:[%s11225_s1 + $0xcac] ss:$16 sps:$4 sm:$0xff]  }
 0x15f   :  { %5165 = vmatpush1.bf16.msra.mxu0 %v7868_v2  ;;  %5698 = vmatpush1.bf16.msra.mxu1 %v7871_v3  ;;  %v7952_v2 = vld [vmem:[%s11225_s1 + $0xca0] ss:$16 sps:$4 sm:$0xff]   ;;  %v7955_v3 = vld [vmem:[%s11225_s1 + $0xca8] ss:$16 sps:$4 sm:$0xff]  }
 0x160   :  { %5166 = vmatprep.subr.bf16.mxu0 %v7876_v4  ;;  %5699 = vmatprep.subr.bf16.mxu1 %v7879_v5  ;;  %v7960_v4 = vld [vmem:[%s11225_s1 + $0xcc4] ss:$16 sps:$4 sm:$0xff]   ;;  %v7963_v5 = vld [vmem:[%s11225_s1 + $0xccc] ss:$16 sps:$4 sm:$0xff]  }
 0x163   :  { %5167 = vmatpush1.bf16.msra.mxu0 %v7874_v6  ;;  %5700 = vmatpush1.bf16.msra.mxu1 %v7877_v7  ;;  %v7958_v6 = vld [vmem:[%s11225_s1 + $0xcc0] ss:$16 sps:$4 sm:$0xff]   ;;  %v7961_v7 = vld [vmem:[%s11225_s1 + $0xcc8] ss:$16 sps:$4 sm:$0xff]  }
 0x164   :  { %5168 = vmatprep.subr.bf16.mxu0 %v7882_v8  ;;  %5701 = vmatprep.subr.bf16.mxu1 %v7885_v9  ;;  %v7966_v8 = vld [vmem:[%s11225_s1 + $0xce4] ss:$16 sps:$4 sm:$0xff]   ;;  %v7969_v9 = vld [vmem:[%s11225_s1 + $0xcec] ss:$16 sps:$4 sm:$0xff]  }
 0x167   :  { %5169 = vmatpush1.bf16.msra.mxu0 %v7880_v10  ;;  %5702 = vmatpush1.bf16.msra.mxu1 %v7883_v11  ;;  %v7964_v10 = vld [vmem:[%s11225_s1 + $0xce0] ss:$16 sps:$4 sm:$0xff]   ;;  %v7967_v11 = vld [vmem:[%s11225_s1 + $0xce8] ss:$16 sps:$4 sm:$0xff]  }
 0x168   :  { %5170 = vmatprep.subr.bf16.mxu0 %v7888_v12  ;;  %5703 = vmatprep.subr.bf16.mxu1 %v7891_v52  ;;  %v7972_v12 = vld [vmem:[%s11225_s1 + $0xd04] ss:$16 sps:$4 sm:$0xff]   ;;  %v7975_v52 = vld [vmem:[%s11225_s1 + $0xd0c] ss:$16 sps:$4 sm:$0xff]  }
 0x16b   :  { %5171 = vmatpush1.bf16.msra.mxu0 %v7886_v15  ;;  %5704 = vmatpush1.bf16.msra.mxu1 %v7889_v16  ;;  %v7970_v15 = vld [vmem:[%s11225_s1 + $0xd00] ss:$16 sps:$4 sm:$0xff]   ;;  %v7973_v16 = vld [vmem:[%s11225_s1 + $0xd08] ss:$16 sps:$4 sm:$0xff]  }
 0x16c   :  { %5172 = vmatprep.subr.bf16.mxu0 %v7894_v17  ;;  %5705 = vmatprep.subr.bf16.mxu1 %v7897_v18  ;;  %v7978_v17 = vld [vmem:[%s11225_s1 + $0xd24] ss:$16 sps:$4 sm:$0xff]   ;;  %v7981_v18 = vld [vmem:[%s11225_s1 + $0xd2c] ss:$16 sps:$4 sm:$0xff]  }
 0x16f   :  { %5173 = vmatpush1.bf16.msra.mxu0 %v7892_v19  ;;  %5706 = vmatpush1.bf16.msra.mxu1 %v7895_v20  ;;  %v7976_v19 = vld [vmem:[%s11225_s1 + $0xd20] ss:$16 sps:$4 sm:$0xff]   ;;  %v7979_v20 = vld [vmem:[%s11225_s1 + $0xd28] ss:$16 sps:$4 sm:$0xff]  }
 0x170   :  { %5174 = vmatprep.subr.bf16.mxu0 %v7900_v22  ;;  %5707 = vmatprep.subr.bf16.mxu1 %v7903_v23  ;;  %v7984_v22 = vld [vmem:[%s11225_s1 + $0xd44] ss:$16 sps:$4 sm:$0xff]   ;;  %v7987_v23 = vld [vmem:[%s11225_s1 + $0xd4c] ss:$16 sps:$4 sm:$0xff]  }
 0x173   :  { %5175 = vmatpush1.bf16.msra.mxu0 %v7898_v24  ;;  %5708 = vmatpush1.bf16.msra.mxu1 %v7901_v13  ;;  %v7982_v24 = vld [vmem:[%s11225_s1 + $0xd40] ss:$16 sps:$4 sm:$0xff]   ;;  %v7985_v13 = vld [vmem:[%s11225_s1 + $0xd48] ss:$16 sps:$4 sm:$0xff]  }
 0x174   :  { %5176 = vmatprep.subr.bf16.mxu0 %v7906_v27  ;;  %5709 = vmatprep.subr.bf16.mxu1 %v7909_v28  ;;  %v7990_v27 = vld [vmem:[%s11225_s1 + $0xd64] ss:$16 sps:$4 sm:$0xff]   ;;  %v7993_v28 = vld [vmem:[%s11225_s1 + $0xd6c] ss:$16 sps:$4 sm:$0xff]  }
 0x177   :  { %5177 = vmatpush1.bf16.msra.mxu0 %v7904_v29  ;;  %5710 = vmatpush1.bf16.msra.mxu1 %v7907_v14  ;;  %v7988_v29 = vld [vmem:[%s11225_s1 + $0xd60] ss:$16 sps:$4 sm:$0xff]   ;;  %v7991_v14 = vld [vmem:[%s11225_s1 + $0xd68] ss:$16 sps:$4 sm:$0xff]  }
 0x178   :  { %5178 = vmatprep.subr.bf16.mxu0 %v7912_v30  ;;  %5711 = vmatprep.subr.bf16.mxu1 %v7915_v31  ;;  %v7996_v30 = vld [vmem:[%s11225_s1 + $0xd84] ss:$16 sps:$4 sm:$0xff]   ;;  %v7999_v31 = vld [vmem:[%s11225_s1 + $0xd8c] ss:$16 sps:$4 sm:$0xff]  }
 0x17b   :  { %5179 = vmatpush1.bf16.msra.mxu0 %v7910_v33  ;;  %5712 = vmatpush1.bf16.msra.mxu1 %v7913_v26  ;;  %v8002_v33 = vld [vmem:[%s11225_s1 + $0xda4] ss:$16 sps:$4 sm:$0xff]   ;;  %v8005_v26 = vld [vmem:[%s11225_s1 + $0xdac] ss:$16 sps:$4 sm:$0xff]  }
 0x17c   :  { %5180 = vmatprep.subr.bf16.mxu0 %v7918_v36  ;;  %5713 = vmatprep.subr.bf16.mxu1 %v7921_v37  ;;  %v8000_v36 = vld [vmem:[%s11225_s1 + $0xda0] ss:$16 sps:$4 sm:$0xff]   ;;  %v8003_v37 = vld [vmem:[%s11225_s1 + $0xda8] ss:$16 sps:$4 sm:$0xff]  }
 0x17f   :  { %5181 = vmatpush1.bf16.msra.mxu0 %v7916_v21  ;;  %5714 = vmatpush1.bf16.msra.mxu1 %v7919_v39  ;;  %v8008_v21 = vld [vmem:[%s11225_s1 + $0xdc4] ss:$16 sps:$4 sm:$0xff]   ;;  %v8011_v39 = vld [vmem:[%s11225_s1 + $0xdcc] ss:$16 sps:$4 sm:$0xff]  }
 0x180   :  { %5191 = vmatprep.subr.bf16.mxu0 %v7924_v40  ;;  %5724 = vmatprep.subr.bf16.mxu1 %v7927_v41  ;;  %v8006_v40 = vld [vmem:[%s11225_s1 + $0xdc0] ss:$16 sps:$4 sm:$0xff]   ;;  %v8009_v41 = vld [vmem:[%s11225_s1 + $0xdc8] ss:$16 sps:$4 sm:$0xff]  }
 0x182   :  { %5183 = vmatmul.mubr.bf16.vlgmr.msra.gmra.mrb[0].mxu0 %v930_v43  ;;  %5716 = vmatmul.mubr.bf16.vlgmr.msra.gmra.mrb[0].mxu1 %v930_v43  ;;  %v8017_v43 = vld [vmem:[%s11225_s1 + $0xdec] ss:$16 sps:$4 sm:$0xff]  }
 0x183   :  { %5192 = vmatpush1.bf16.msra.mxu0 %v7922_v44  ;;  %5725 = vmatpush1.bf16.msra.mxu1 %v7925_v45  ;;  %v8012_v44 = vld [vmem:[%s11225_s1 + $0xde0] ss:$16 sps:$4 sm:$0xff]   ;;  %v8015_v45 = vld [vmem:[%s11225_s1 + $0xde8] ss:$16 sps:$4 sm:$0xff]  }
 0x184   :  { %5193 = vmatprep.subr.bf16.mxu0 %v7930_v46  ;;  %5726 = vmatprep.subr.bf16.mxu1 %v7933_v35  ;;  %v8021_v46 = vld [vmem:[%s11225_s1 + $0xe04] ss:$16 sps:$4 sm:$0xff]   ;;  %v8024_v35 = vld [vmem:[%s11225_s1 + $0xe0c] ss:$16 sps:$4 sm:$0xff]  }
 0x185   :  { %5223 = vmatprep.mubr.bf16.mxu0 %v9858_v47  ;;  %5756 = vmatprep.mubr.bf16.mxu1 %v9858_v47 }
 0x187   :  { %5194 = vmatpush1.bf16.msra.mxu0 %v7928_v48  ;;  %5727 = vmatpush1.bf16.msra.mxu1 %v7931_v50  ;;  %v10044_v48 = vrot.slane %v9827_v38, %v8750_v49  ;;  %v8019_v50 = vld [vmem:[%s11225_s1 + $0xe00] ss:$16 sps:$4 sm:$0xff]   ;;  %v8030_v38 = vld [vmem:[%s11225_s1 + $0xe2c] ss:$16 sps:$4 sm:$0xff]  }
 0x188   :  { %5195 = vmatprep.subr.bf16.mxu0 %v7936_v51  ;;  %5728 = vmatprep.subr.bf16.mxu1 %v7939_v53  ;;  %v8022_v51 = vld [vmem:[%s11225_s1 + $0xe08] ss:$16 sps:$4 sm:$0xff]   ;;  %v8027_v53 = vld [vmem:[%s11225_s1 + $0xe24] ss:$16 sps:$4 sm:$0xff]  }
 0x18b   :  { %5196 = vmatpush1.bf16.msra.mxu0 %v7934_v54  ;;  %5729 = vmatpush1.bf16.msra.mxu1 %v7937_v55  ;;  %v933_v54 = vcombine.high %v9858_v47, %v9858_v47  ;;  %v8025_v55 = vld [vmem:[%s11225_s1 + $0xe20] ss:$16 sps:$4 sm:$0xff]   ;;  %v8033_v47 = vld [vmem:[%s11225_s1 + $0xe44] ss:$16 sps:$4 sm:$0xff]  }
 0x18c   :  { %5197 = vmatprep.subr.bf16.mxu0 %v7942_v56  ;;  %5730 = vmatprep.subr.bf16.mxu1 %v7945_v57  ;;  %v8028_v56 = vld [vmem:[%s11225_s1 + $0xe28] ss:$16 sps:$4 sm:$0xff]   ;;  %v8036_v57 = vld [vmem:[%s11225_s1 + $0xe4c] ss:$16 sps:$4 sm:$0xff]  }
 0x18f   :  { %5198 = vmatpush1.bf16.msra.mxu0 %v7940_v58  ;;  %5731 = vmatpush1.bf16.msra.mxu1 %v7943_v59  ;;  %v8031_v58 = vld [vmem:[%s11225_s1 + $0xe40] ss:$16 sps:$4 sm:$0xff]   ;;  %v8034_v59 = vld [vmem:[%s11225_s1 + $0xe48] ss:$16 sps:$4 sm:$0xff]  }
 0x190   :  { %5199 = vmatprep.subr.bf16.mxu0 %v7948_v60  ;;  %5732 = vmatprep.subr.bf16.mxu1 %v7951_v61  ;;  %v8039_v60 = vld [vmem:[%s11225_s1 + $0xe64] ss:$16 sps:$4 sm:$0xff]   ;;  %v8042_v61 = vld [vmem:[%s11225_s1 + $0xe6c] ss:$16 sps:$4 sm:$0xff]  }
 0x193   :  { %5200 = vmatpush1.bf16.msra.mxu0 %v7946_v62  ;;  %5733 = vmatpush1.bf16.msra.mxu1 %v7949_v63  ;;  %v8037_v62 = vld [vmem:[%s11225_s1 + $0xe60] ss:$16 sps:$4 sm:$0xff]   ;;  %v8040_v63 = vld [vmem:[%s11225_s1 + $0xe68] ss:$16 sps:$4 sm:$0xff]  }
 0x194   :  { %5201 = vmatprep.subr.bf16.mxu0 %v7954_v0  ;;  %5734 = vmatprep.subr.bf16.mxu1 %v7957_v1  ;;  %v8045_v0 = vld [vmem:[%s11225_s1 + $0xe84] ss:$16 sps:$4 sm:$0xff]   ;;  %v8048_v1 = vld [vmem:[%s11225_s1 + $0xe8c] ss:$16 sps:$4 sm:$0xff]  }
 0x197   :  { %5202 = vmatpush1.bf16.msra.mxu0 %v7952_v2  ;;  %5735 = vmatpush1.bf16.msra.mxu1 %v7955_v3  ;;  %v8043_v2 = vld [vmem:[%s11225_s1 + $0xe80] ss:$16 sps:$4 sm:$0xff]   ;;  %v8046_v3 = vld [vmem:[%s11225_s1 + $0xe88] ss:$16 sps:$4 sm:$0xff]  }
 0x198   :  { %5203 = vmatprep.subr.bf16.mxu0 %v7960_v4  ;;  %5736 = vmatprep.subr.bf16.mxu1 %v7963_v5  ;;  %v8051_v4 = vld [vmem:[%s11225_s1 + $0xea4] ss:$16 sps:$4 sm:$0xff]   ;;  %v8054_v5 = vld [vmem:[%s11225_s1 + $0xeac] ss:$16 sps:$4 sm:$0xff]  }
 0x19b   :  { %5204 = vmatpush1.bf16.msra.mxu0 %v7958_v6  ;;  %5737 = vmatpush1.bf16.msra.mxu1 %v7961_v7  ;;  %v8049_v6 = vld [vmem:[%s11225_s1 + $0xea0] ss:$16 sps:$4 sm:$0xff]   ;;  %v8052_v7 = vld [vmem:[%s11225_s1 + $0xea8] ss:$16 sps:$4 sm:$0xff]  }
 0x19c   :  { %5205 = vmatprep.subr.bf16.mxu0 %v7966_v8  ;;  %5738 = vmatprep.subr.bf16.mxu1 %v7969_v9  ;;  %v8057_v8 = vld [vmem:[%s11225_s1 + $0xec4] ss:$16 sps:$4 sm:$0xff]   ;;  %v8060_v9 = vld [vmem:[%s11225_s1 + $0xecc] ss:$16 sps:$4 sm:$0xff]  }
 0x19f   :  { %5206 = vmatpush1.bf16.msra.mxu0 %v7964_v10  ;;  %5739 = vmatpush1.bf16.msra.mxu1 %v7967_v11  ;;  %v8055_v10 = vld [vmem:[%s11225_s1 + $0xec0] ss:$16 sps:$4 sm:$0xff]   ;;  %v8058_v11 = vld [vmem:[%s11225_s1 + $0xec8] ss:$16 sps:$4 sm:$0xff]  }
 0x1a0   :  { %5207 = vmatprep.subr.bf16.mxu0 %v7972_v12  ;;  %5740 = vmatprep.subr.bf16.mxu1 %v7975_v52  ;;  %v8063_v12 = vld [vmem:[%s11225_s1 + $0xee4] ss:$16 sps:$4 sm:$0xff]   ;;  %v8066_v52 = vld [vmem:[%s11225_s1 + $0xeec] ss:$16 sps:$4 sm:$0xff]  }
 0x1a3   :  { %5208 = vmatpush1.bf16.msra.mxu0 %v7970_v15  ;;  %5741 = vmatpush1.bf16.msra.mxu1 %v7973_v16  ;;  %v8061_v15 = vld [vmem:[%s11225_s1 + $0xee0] ss:$16 sps:$4 sm:$0xff]   ;;  %v8064_v16 = vld [vmem:[%s11225_s1 + $0xee8] ss:$16 sps:$4 sm:$0xff]  }
 0x1a4   :  { %5209 = vmatprep.subr.bf16.mxu0 %v7978_v17  ;;  %5742 = vmatprep.subr.bf16.mxu1 %v7981_v18  ;;  %v8069_v17 = vld [vmem:[%s11225_s1 + $0xf04] ss:$16 sps:$4 sm:$0xff]   ;;  %v8072_v18 = vld [vmem:[%s11225_s1 + $0xf0c] ss:$16 sps:$4 sm:$0xff]  }
 0x1a7   :  { %5210 = vmatpush1.bf16.msra.mxu0 %v7976_v19  ;;  %5743 = vmatpush1.bf16.msra.mxu1 %v7979_v20  ;;  %v8067_v19 = vld [vmem:[%s11225_s1 + $0xf00] ss:$16 sps:$4 sm:$0xff]   ;;  %v8070_v20 = vld [vmem:[%s11225_s1 + $0xf08] ss:$16 sps:$4 sm:$0xff]  }
 0x1a8   :  { %5211 = vmatprep.subr.bf16.mxu0 %v7984_v22  ;;  %5744 = vmatprep.subr.bf16.mxu1 %v7987_v23  ;;  %v8075_v22 = vld [vmem:[%s11225_s1 + $0xf24] ss:$16 sps:$4 sm:$0xff]   ;;  %v8078_v23 = vld [vmem:[%s11225_s1 + $0xf2c] ss:$16 sps:$4 sm:$0xff]  }
 0x1ab   :  { %5212 = vmatpush1.bf16.msra.mxu0 %v7982_v24  ;;  %5745 = vmatpush1.bf16.msra.mxu1 %v7985_v13  ;;  %v8073_v24 = vld [vmem:[%s11225_s1 + $0xf20] ss:$16 sps:$4 sm:$0xff]   ;;  %v8076_v13 = vld [vmem:[%s11225_s1 + $0xf28] ss:$16 sps:$4 sm:$0xff]  }
 0x1ac   :  { %5213 = vmatprep.subr.bf16.mxu0 %v7990_v27  ;;  %5746 = vmatprep.subr.bf16.mxu1 %v7993_v28  ;;  %v8081_v27 = vld [vmem:[%s11225_s1 + $0xf44] ss:$16 sps:$4 sm:$0xff]   ;;  %v8084_v28 = vld [vmem:[%s11225_s1 + $0xf4c] ss:$16 sps:$4 sm:$0xff]  }
 0x1af   :  { %5214 = vmatpush1.bf16.msra.mxu0 %v7988_v29  ;;  %5747 = vmatpush1.bf16.msra.mxu1 %v7991_v14  ;;  %v8079_v29 = vld [vmem:[%s11225_s1 + $0xf40] ss:$16 sps:$4 sm:$0xff]   ;;  %v8082_v14 = vld [vmem:[%s11225_s1 + $0xf48] ss:$16 sps:$4 sm:$0xff]  }
 0x1b0   :  { %5215 = vmatprep.subr.bf16.mxu0 %v7996_v30  ;;  %5748 = vmatprep.subr.bf16.mxu1 %v7999_v31  ;;  %v8087_v30 = vld [vmem:[%s11225_s1 + $0xf64] ss:$16 sps:$4 sm:$0xff]   ;;  %v8090_v31 = vld [vmem:[%s11225_s1 + $0xf6c] ss:$16 sps:$4 sm:$0xff]  }
 0x1b3   :  { %5216 = vmatpush1.bf16.msra.mxu0 %v7994_v25  ;;  %5749 = vmatpush1.bf16.msra.mxu1 %v7997_v32 }
 0x1b4   :  { %5217 = vmatprep.subr.bf16.mxu0 %v8002_v33  ;;  %5750 = vmatprep.subr.bf16.mxu1 %v8005_v26 }
 0x1b7   :  { %5218 = vmatpush1.bf16.msra.mxu0 %v8000_v36  ;;  %5751 = vmatpush1.bf16.msra.mxu1 %v8003_v37 }
 0x1b8   :  { %5219 = vmatprep.subr.bf16.mxu0 %v8008_v21  ;;  %5752 = vmatprep.subr.bf16.mxu1 %v8011_v39 }
 0x1bb   :  { %5220 = vmatpush1.bf16.msra.mxu0 %v8006_v40  ;;  %5753 = vmatpush1.bf16.msra.mxu1 %v8009_v41 }
 0x1bc   :  { %5221 = vmatprep.subr.bf16.mxu0 %v8014_v34  ;;  %5754 = vmatprep.subr.bf16.mxu1 %v8017_v43 }
 0x1bf   :  { %5222 = vmatpush1.bf16.msra.mxu0 %v8012_v44  ;;  %5755 = vmatpush1.bf16.msra.mxu1 %v8015_v45 }
 0x1c0   :  { %5232 = vmatprep.subr.bf16.mxu0 %v8021_v46  ;;  %5765 = vmatprep.subr.bf16.mxu1 %v8024_v35 }
 0x1c2   :  { %5224 = vmatmul.mubr.bf16.vlgmr.msra.gmra.mrb[0].mxu0 %v10044_v48  ;;  %5757 = vmatmul.mubr.bf16.vlgmr.msra.gmra.mrb[0].mxu1 %v10044_v48 }
 0x1c3   :  { %5233 = vmatpush1.bf16.msra.mxu0 %v8019_v50  ;;  %5766 = vmatpush1.bf16.msra.mxu1 %v8022_v51 }
 0x1c4   :  { %5234 = vmatprep.subr.bf16.mxu0 %v8027_v53  ;;  %5767 = vmatprep.subr.bf16.mxu1 %v8030_v38 }
 0x1c5   :  { %5264 = vmatprep.mubr.bf16.mxu0 %v933_v54  ;;  %5797 = vmatprep.mubr.bf16.mxu1 %v933_v54 }
 0x1c7   :  { %5235 = vmatpush1.bf16.msra.mxu0 %v8025_v55  ;;  %5768 = vmatpush1.bf16.msra.mxu1 %v8028_v56 }
 0x1c8   :  { %5236 = vmatprep.subr.bf16.mxu0 %v8033_v47  ;;  %5769 = vmatprep.subr.bf16.mxu1 %v8036_v57 }
 0x1cb   :  { %5237 = vmatpush1.bf16.msra.mxu0 %v8031_v58  ;;  %5770 = vmatpush1.bf16.msra.mxu1 %v8034_v59 }
 0x1cc   :  { %5238 = vmatprep.subr.bf16.mxu0 %v8039_v60  ;;  %5771 = vmatprep.subr.bf16.mxu1 %v8042_v61 }
 0x1cf   :  { %5239 = vmatpush1.bf16.msra.mxu0 %v8037_v62  ;;  %5772 = vmatpush1.bf16.msra.mxu1 %v8040_v63 }
 0x1d0   :  { %5240 = vmatprep.subr.bf16.mxu0 %v8045_v0  ;;  %5773 = vmatprep.subr.bf16.mxu1 %v8048_v1 }
 0x1d3   :  { %5241 = vmatpush1.bf16.msra.mxu0 %v8043_v2  ;;  %5774 = vmatpush1.bf16.msra.mxu1 %v8046_v3 }
 0x1d4   :  { %5242 = vmatprep.subr.bf16.mxu0 %v8051_v4  ;;  %5775 = vmatprep.subr.bf16.mxu1 %v8054_v5 }
 0x1d7   :  { %5243 = vmatpush1.bf16.msra.mxu0 %v8049_v6  ;;  %5776 = vmatpush1.bf16.msra.mxu1 %v8052_v7 }
 0x1d8   :  { %5244 = vmatprep.subr.bf16.mxu0 %v8057_v8  ;;  %5777 = vmatprep.subr.bf16.mxu1 %v8060_v9 }
 0x1db   :  { %5245 = vmatpush1.bf16.msra.mxu0 %v8055_v10  ;;  %5778 = vmatpush1.bf16.msra.mxu1 %v8058_v11 }
 0x1dc   :  { %5246 = vmatprep.subr.bf16.mxu0 %v8063_v12  ;;  %5779 = vmatprep.subr.bf16.mxu1 %v8066_v52 }
 0x1df   :  { %5247 = vmatpush1.bf16.msra.mxu0 %v8061_v15  ;;  %5780 = vmatpush1.bf16.msra.mxu1 %v8064_v16 }
 0x1e0   :  { %5248 = vmatprep.subr.bf16.mxu0 %v8069_v17  ;;  %5781 = vmatprep.subr.bf16.mxu1 %v8072_v18 }
 0x1e3   :  { %5249 = vmatpush1.bf16.msra.mxu0 %v8067_v19  ;;  %5782 = vmatpush1.bf16.msra.mxu1 %v8070_v20 }
 0x1e4   :  { %5250 = vmatprep.subr.bf16.mxu0 %v8075_v22  ;;  %5783 = vmatprep.subr.bf16.mxu1 %v8078_v23 }
 0x1e7   :  { %5251 = vmatpush1.bf16.msra.mxu0 %v8073_v24  ;;  %5784 = vmatpush1.bf16.msra.mxu1 %v8076_v13 }
 0x1e8   :  { %5252 = vmatprep.subr.bf16.mxu0 %v8081_v27  ;;  %5785 = vmatprep.subr.bf16.mxu1 %v8084_v28 }
 0x1e9   :  { %10 = vsyncpa [#allocation3], 0  ;;  %v8085_v25 = vld [vmem:[%s11225_s1 + $0xf60] ss:$16 sps:$4 sm:$0xff]   ;;  %v8088_v32 = vld [vmem:[%s11225_s1 + $0xf68] ss:$16 sps:$4 sm:$0xff]   ;;  %v931_v47 = vcombine.high %v10044_v48, %v10044_v48 }
 0x1ea   :  { %v8093_v33 = vld [vmem:[%s11225_s1 + $0xf84] ss:$16 sps:$4 sm:$0xff]   ;;  %v8096_v26 = vld [vmem:[%s11225_s1 + $0xf8c] ss:$16 sps:$4 sm:$0xff]   ;;  %v8091_v36 = vld [vmem:[%s11225_s1 + $0xf80] ss:$16 sps:$4 sm:$0xff]  }
 0x1eb   :  { %5253 = vmatpush1.bf16.msra.mxu0 %v8079_v29  ;;  %5786 = vmatpush1.bf16.msra.mxu1 %v8082_v14  ;;  %v8094_v37 = vld [vmem:[%s11225_s1 + $0xf88] ss:$16 sps:$4 sm:$0xff]   ;;  %v8099_v21 = vld [vmem:[%s11225_s1 + $0xfa4] ss:$16 sps:$4 sm:$0xff]   ;;  %v8102_v39 = vld [vmem:[%s11225_s1 + $0xfac] ss:$16 sps:$4 sm:$0xff]  }
 0x1ec   :  { %5254 = vmatprep.subr.bf16.mxu0 %v8087_v30  ;;  %5787 = vmatprep.subr.bf16.mxu1 %v8090_v31  ;;  %v8097_v40 = vld [vmem:[%s11225_s1 + $0xfa0] ss:$16 sps:$4 sm:$0xff]   ;;  %v8100_v41 = vld [vmem:[%s11225_s1 + $0xfa8] ss:$16 sps:$4 sm:$0xff]   ;;  %v8105_v34 = vld [vmem:[%s11225_s1 + $0xfc4] ss:$16 sps:$4 sm:$0xff]  }
 0x1ed   :  { %v8108_v43 = vld [vmem:[%s11225_s1 + $0xfcc] ss:$16 sps:$4 sm:$0xff]   ;;  %v10221_v44 = vld [vmem:[%s11224_s0 + $0x10] sm:$0xff]  ;;  %v8106_v46 = vld [vmem:[%s11225_s1 + $0xfc8] ss:$16 sps:$4 sm:$0xff]   ;;  %vm4941_vm0 = vcmask 523264  }
 0x1ee   :  { %v8103_v45 = vld [vmem:[%s11225_s1 + $0xfc0] ss:$16 sps:$4 sm:$0xff]   ;;  %v8111_v35 = vld [vmem:[%s11225_s1 + $0xfe4] ss:$16 sps:$4 sm:$0xff]   ;;  %v8114_v50 = vld [vmem:[%s11225_s1 + $0xfec] ss:$16 sps:$4 sm:$0xff]   ;;  %v10237_v51 = vrot.slane %v10221_v44, %v8750_v49 }
 0x1ef   :  { %5255 = vmatpush1.bf16.msra.mxu0 %v8085_v25  ;;  %5788 = vmatpush1.bf16.msra.mxu1 %v8088_v32  ;;  %v8109_v53 = vld [vmem:[%s11225_s1 + $0xfe0] ss:$16 sps:$4 sm:$0xff]   ;;  %v8112_v38 = vld [vmem:[%s11225_s1 + $0xfe8] ss:$16 sps:$4 sm:$0xff]   ;;  %v8117_v54 = vld [vmem:[%s11225_s1 + $0x1004] ss:$16 sps:$4 sm:$0xff]  }
 0x1f0   :  { %5256 = vmatprep.subr.bf16.mxu0 %v8093_v33  ;;  %5789 = vmatprep.subr.bf16.mxu1 %v8096_v26  ;;  %v8120_v55 = vld [vmem:[%s11225_s1 + $0x100c] ss:$16 sps:$4 sm:$0xff]   ;;  %v949_v56 = vcombine.high %v10237_v51, %v10237_v51  ;;  %v8115_v57 = vld [vmem:[%s11225_s1 + $0x1000] ss:$16 sps:$4 sm:$0xff]   ;;  %v8118_v58 = vld [vmem:[%s11225_s1 + $0x1008] ss:$16 sps:$4 sm:$0xff]  }
 0x1f1   :  { %v8123_v59 = vld [vmem:[%s11225_s1 + $0x1024] ss:$16 sps:$4 sm:$0xff]   ;;  %v8126_v48 = vld [vmem:[%s11225_s1 + $0x102c] ss:$16 sps:$4 sm:$0xff]   ;;  %v8121_v61 = vld [vmem:[%s11225_s1 + $0x1020] ss:$16 sps:$4 sm:$0xff]  }
 0x1f2   :  { %v10268_v60 = vrot.slane %v949_v56, %v8750_v49  ;;  %v8124_v62 = vld [vmem:[%s11225_s1 + $0x1028] ss:$16 sps:$4 sm:$0xff]   ;;  %v8129_v63 = vld [vmem:[%s11225_s1 + $0x1044] ss:$16 sps:$4 sm:$0xff]   ;;  %v8132_v0 = vld [vmem:[%s11225_s1 + $0x104c] ss:$16 sps:$4 sm:$0xff]  }
 0x1f3   :  { %5257 = vmatpush1.bf16.msra.mxu0 %v8091_v36  ;;  %5790 = vmatpush1.bf16.msra.mxu1 %v8094_v37  ;;  %v8127_v1 = vld [vmem:[%s11225_s1 + $0x1040] ss:$16 sps:$4 sm:$0xff]   ;;  %v8130_v2 = vld [vmem:[%s11225_s1 + $0x1048] ss:$16 sps:$4 sm:$0xff]   ;;  %v8135_v3 = vld [vmem:[%s11225_s1 + $0x1064] ss:$16 sps:$4 sm:$0xff]  }
 0x1f4   :  { %5258 = vmatprep.subr.bf16.mxu0 %v8099_v21  ;;  %5791 = vmatprep.subr.bf16.mxu1 %v8102_v39  ;;  %v8138_v4 = vld [vmem:[%s11225_s1 + $0x106c] ss:$16 sps:$4 sm:$0xff]   ;;  %v8133_v5 = vld [vmem:[%s11225_s1 + $0x1060] ss:$16 sps:$4 sm:$0xff]   ;;  %v8136_v6 = vld [vmem:[%s11225_s1 + $0x1068] ss:$16 sps:$4 sm:$0xff]  }
 0x1f5   :  { %v8141_v7 = vld [vmem:[%s11225_s1 + $0x1084] ss:$16 sps:$4 sm:$0xff]   ;;  %v8144_v8 = vld [vmem:[%s11225_s1 + $0x108c] ss:$16 sps:$4 sm:$0xff]   ;;  %v8139_v9 = vld [vmem:[%s11225_s1 + $0x1080] ss:$16 sps:$4 sm:$0xff]  }
 0x1f6   :  { %v8142_v10 = vld [vmem:[%s11225_s1 + $0x1088] ss:$16 sps:$4 sm:$0xff]   ;;  %v8147_v11 = vld [vmem:[%s11225_s1 + $0x10a4] ss:$16 sps:$4 sm:$0xff]   ;;  %v8150_v12 = vld [vmem:[%s11225_s1 + $0x10ac] ss:$16 sps:$4 sm:$0xff]  }
 0x1f7   :  { %5259 = vmatpush1.bf16.msra.mxu0 %v8097_v40  ;;  %5792 = vmatpush1.bf16.msra.mxu1 %v8100_v41  ;;  %v8145_v52 = vld [vmem:[%s11225_s1 + $0x10a0] ss:$16 sps:$4 sm:$0xff]   ;;  %v8148_v15 = vld [vmem:[%s11225_s1 + $0x10a8] ss:$16 sps:$4 sm:$0xff]   ;;  %v8153_v16 = vld [vmem:[%s11225_s1 + $0x10c4] ss:$16 sps:$4 sm:$0xff]  }
 0x1f8   :  { %5260 = vmatprep.subr.bf16.mxu0 %v8105_v34  ;;  %5793 = vmatprep.subr.bf16.mxu1 %v8108_v43  ;;  %v8156_v17 = vld [vmem:[%s11225_s1 + $0x10cc] ss:$16 sps:$4 sm:$0xff]   ;;  %v8151_v18 = vld [vmem:[%s11225_s1 + $0x10c0] ss:$16 sps:$4 sm:$0xff]   ;;  %v8154_v19 = vld [vmem:[%s11225_s1 + $0x10c8] ss:$16 sps:$4 sm:$0xff]  }
 0x1f9   :  { %v8159_v20 = vld [vmem:[%s11225_s1 + $0x10e4] ss:$16 sps:$4 sm:$0xff]   ;;  %v8162_v22 = vld [vmem:[%s11225_s1 + $0x10ec] ss:$16 sps:$4 sm:$0xff]   ;;  %v8157_v23 = vld [vmem:[%s11225_s1 + $0x10e0] ss:$16 sps:$4 sm:$0xff]  }
 0x1fa   :  { %v8160_v24 = vld [vmem:[%s11225_s1 + $0x10e8] ss:$16 sps:$4 sm:$0xff]   ;;  %v8165_v13 = vld [vmem:[%s11225_s1 + $0x1104] ss:$16 sps:$4 sm:$0xff]   ;;  %v8168_v27 = vld [vmem:[%s11225_s1 + $0x110c] ss:$16 sps:$4 sm:$0xff]  }
 0x1fb   :  { %5261 = vmatpush1.bf16.msra.mxu0 %v8103_v45  ;;  %5794 = vmatpush1.bf16.msra.mxu1 %v8106_v46  ;;  %v8163_v28 = vld [vmem:[%s11225_s1 + $0x1100] ss:$16 sps:$4 sm:$0xff]   ;;  %v8166_v29 = vld [vmem:[%s11225_s1 + $0x1108] ss:$16 sps:$4 sm:$0xff]   ;;  %v8171_v14 = vld [vmem:[%s11225_s1 + $0x1124] ss:$16 sps:$4 sm:$0xff]  }
 0x1fc   :  { %5262 = vmatprep.subr.bf16.mxu0 %v8111_v35  ;;  %5795 = vmatprep.subr.bf16.mxu1 %v8114_v50  ;;  %v8174_v30 = vld [vmem:[%s11225_s1 + $0x112c] ss:$16 sps:$4 sm:$0xff]   ;;  %v8169_v31 = vld [vmem:[%s11225_s1 + $0x1120] ss:$16 sps:$4 sm:$0xff]   ;;  %v8172_v25 = vld [vmem:[%s11225_s1 + $0x1128] ss:$16 sps:$4 sm:$0xff]  }
 0x1fd   :  { %v8177_v32 = vld [vmem:[%s11225_s1 + $0x1144] ss:$16 sps:$4 sm:$0xff]   ;;  %v8180_v33 = vld [vmem:[%s11225_s1 + $0x114c] ss:$16 sps:$4 sm:$0xff]   ;;  %v8175_v26 = vld [vmem:[%s11225_s1 + $0x1140] ss:$16 sps:$4 sm:$0xff]  }
 0x1fe   :  { %v8178_v36 = vld [vmem:[%s11225_s1 + $0x1148] ss:$16 sps:$4 sm:$0xff]   ;;  %v8183_v37 = vld [vmem:[%s11225_s1 + $0x1164] ss:$16 sps:$4 sm:$0xff]   ;;  %v8186_v21 = vld [vmem:[%s11225_s1 + $0x116c] ss:$16 sps:$4 sm:$0xff]  }
 0x1ff   :  { %5263 = vmatpush1.bf16.msra.mxu0 %v8109_v53  ;;  %5796 = vmatpush1.bf16.msra.mxu1 %v8112_v38  ;;  %v8181_v39 = vld [vmem:[%s11225_s1 + $0x1160] ss:$16 sps:$4 sm:$0xff]   ;;  %v8184_v40 = vld [vmem:[%s11225_s1 + $0x1168] ss:$16 sps:$4 sm:$0xff]   ;;  %v8189_v41 = vld [vmem:[%s11225_s1 + $0x1184] ss:$16 sps:$4 sm:$0xff]  }
 0x200   :  { %5273 = vmatprep.subr.bf16.mxu0 %v8117_v54  ;;  %5806 = vmatprep.subr.bf16.mxu1 %v8120_v55  ;;  %v8192_v34 = vld [vmem:[%s11225_s1 + $0x118c] ss:$16 sps:$4 sm:$0xff]   ;;  %v8187_v43 = vld [vmem:[%s11225_s1 + $0x1180] ss:$16 sps:$4 sm:$0xff]   ;;  %v8190_v45 = vld [vmem:[%s11225_s1 + $0x1188] ss:$16 sps:$4 sm:$0xff]  }
 0x201   :  { %v8195_v46 = vld [vmem:[%s11225_s1 + $0x11a4] ss:$16 sps:$4 sm:$0xff]   ;;  %v8198_v35 = vld [vmem:[%s11225_s1 + $0x11ac] ss:$16 sps:$4 sm:$0xff]   ;;  %v8193_v50 = vld [vmem:[%s11225_s1 + $0x11a0] ss:$16 sps:$4 sm:$0xff]  }
 0x202   :  { %5265 = vmatmul.mubr.bf16.vlgmr.msra.gmra.mrb[0].mxu0 %v931_v47  ;;  %5798 = vmatmul.mubr.bf16.vlgmr.msra.gmra.mrb[0].mxu1 %v931_v47  ;;  %v8196_v53 = vld [vmem:[%s11225_s1 + $0x11a8] ss:$16 sps:$4 sm:$0xff]   ;;  %v8201_v38 = vld [vmem:[%s11225_s1 + $0x11c4] ss:$16 sps:$4 sm:$0xff]   ;;  %v8204_v54 = vld [vmem:[%s11225_s1 + $0x11cc] ss:$16 sps:$4 sm:$0xff]  }
 0x203   :  { %5274 = vmatpush1.bf16.msra.mxu0 %v8115_v57  ;;  %5807 = vmatpush1.bf16.msra.mxu1 %v8118_v58  ;;  %v8199_v55 = vld [vmem:[%s11225_s1 + $0x11c0] ss:$16 sps:$4 sm:$0xff]   ;;  %v8202_v56 = vld [vmem:[%s11225_s1 + $0x11c8] ss:$16 sps:$4 sm:$0xff]   ;;  %v8207_v47 = vld [vmem:[%s11225_s1 + $0x11e4] ss:$16 sps:$4 sm:$0xff]  }
 0x204   :  { %5275 = vmatprep.subr.bf16.mxu0 %v8123_v59  ;;  %5808 = vmatprep.subr.bf16.mxu1 %v8126_v48  ;;  %v8210_v57 = vld [vmem:[%s11225_s1 + $0x11ec] ss:$16 sps:$4 sm:$0xff]   ;;  %v8205_v58 = vld [vmem:[%s11225_s1 + $0x11e0] ss:$16 sps:$4 sm:$0xff]   ;;  %v8208_v59 = vld [vmem:[%s11225_s1 + $0x11e8] ss:$16 sps:$4 sm:$0xff]  }
 0x205   :  { %5305 = vmatprep.mubr.bf16.mxu0 %v10268_v60  ;;  %5838 = vmatprep.mubr.bf16.mxu1 %v10268_v60  ;;  %v8213_v48 = vld [vmem:[%s11225_s1 + $0x1204] ss:$16 sps:$4 sm:$0xff]   ;;  %s8584_s6 = smov [#allocation2]   ;;  %vm6362_vm1 = vcmask 91136  }
 0x206   :  { %s6370_s7 = sshll.u32 %s8584_s6, 4  ;;  %s6371_s7 = int_to_ptr.vmem [resolvable:$true] %s6370_s7 }
 0x207   :  { %5276 = vmatpush1.bf16.msra.mxu0 %v8121_v61  ;;  %5809 = vmatpush1.bf16.msra.mxu1 %v8124_v62  ;;  %v8216_v61 = vld [vmem:[%s11225_s1 + $0x120c] ss:$16 sps:$4 sm:$0xff]   ;;  %v10454_v62 = vrot.slane %v10237_v51, %v8750_v49  ;;  %s8558_s8 = scalar_lea.vmem %s6371_s7, 32  ;;  %p8563_p1 = scmp.lt.s32.totalorder %s6371_s7, %s6371_s7 }
 0x208   :  { %5277 = vmatprep.subr.bf16.mxu0 %v8129_v63  ;;  %5810 = vmatprep.subr.bf16.mxu1 %v8132_v0  ;;  %v8211_v63 = vld [vmem:[%s11225_s1 + $0x1200] ss:$16 sps:$4 sm:$0xff]   ;;  %v8214_v0 = vld [vmem:[%s11225_s1 + $0x1208] ss:$16 sps:$4 sm:$0xff]   ;;  %v8222_v51 = vld [vmem:[%s11225_s1 + $0x122c] ss:$16 sps:$4 sm:$0xff]   ;;  %p8559_p0 = scmp.ne.s32.totalorder %s6371_s7, %s8558_s8  ;;  %p8564_p2 = scmp.lt.s32.totalorder %s8558_s8, %s8558_s8 }
 0x20a   :  { %p8565_p3 = por %p8564_p2, %p8563_p1 }
 0x20b   :  { %5278 = vmatpush1.bf16.msra.mxu0 %v8127_v1  ;;  %5811 = vmatpush1.bf16.msra.mxu1 %v8130_v2  ;;  %v8219_v1 = vld [vmem:[%s11225_s1 + $0x1224] ss:$16 sps:$4 sm:$0xff]   ;;  %v981_v2 = vcombine.high %v10268_v60, %v10268_v60 }
 0x20c   :  { %5279 = vmatprep.subr.bf16.mxu0 %v8135_v3  ;;  %5812 = vmatprep.subr.bf16.mxu1 %v8138_v4  ;;  %v8217_v3 = vld [vmem:[%s11225_s1 + $0x1220] ss:$16 sps:$4 sm:$0xff]   ;;  %v8220_v4 = vld [vmem:[%s11225_s1 + $0x1228] ss:$16 sps:$4 sm:$0xff]   ;;  %v8225_v60 = vld [vmem:[%s11225_s1 + $0x1244] ss:$16 sps:$4 sm:$0xff]   ;;  %p8566_p4 = pnand %p8565_p3, %p8559_p0 }
 0x20f   :  { %5280 = vmatpush1.bf16.msra.mxu0 %v8133_v5  ;;  %5813 = vmatpush1.bf16.msra.mxu1 %v8136_v6  ;;  %v8228_v5 = vld [vmem:[%s11225_s1 + $0x124c] ss:$16 sps:$4 sm:$0xff]   ;;  %v8223_v6 = vld [vmem:[%s11225_s1 + $0x1240] ss:$16 sps:$4 sm:$0xff]  }
 0x210   :  { %5281 = vmatprep.subr.bf16.mxu0 %v8141_v7  ;;  %5814 = vmatprep.subr.bf16.mxu1 %v8144_v8  ;;  %v8226_v7 = vld [vmem:[%s11225_s1 + $0x1248] ss:$16 sps:$4 sm:$0xff]   ;;  %v8231_v8 = vld [vmem:[%s11225_s1 + $0x1264] ss:$16 sps:$4 sm:$0xff]  }
 0x213   :  { %5282 = vmatpush1.bf16.msra.mxu0 %v8139_v9  ;;  %5815 = vmatpush1.bf16.msra.mxu1 %v8142_v10  ;;  %v8234_v9 = vld [vmem:[%s11225_s1 + $0x126c] ss:$16 sps:$4 sm:$0xff]   ;;  %v8229_v10 = vld [vmem:[%s11225_s1 + $0x1260] ss:$16 sps:$4 sm:$0xff]  }
 0x214   :  { %5283 = vmatprep.subr.bf16.mxu0 %v8147_v11  ;;  %5816 = vmatprep.subr.bf16.mxu1 %v8150_v12  ;;  %v8232_v11 = vld [vmem:[%s11225_s1 + $0x1268] ss:$16 sps:$4 sm:$0xff]   ;;  %v8237_v12 = vld [vmem:[%s11225_s1 + $0x1284] ss:$16 sps:$4 sm:$0xff]  }
 0x217   :  { %5284 = vmatpush1.bf16.msra.mxu0 %v8145_v52  ;;  %5817 = vmatpush1.bf16.msra.mxu1 %v8148_v15  ;;  %v8240_v52 = vld [vmem:[%s11225_s1 + $0x128c] ss:$16 sps:$4 sm:$0xff]   ;;  %v8235_v15 = vld [vmem:[%s11225_s1 + $0x1280] ss:$16 sps:$4 sm:$0xff]  }
 0x218   :  { %5285 = vmatprep.subr.bf16.mxu0 %v8153_v16  ;;  %5818 = vmatprep.subr.bf16.mxu1 %v8156_v17  ;;  %v8238_v16 = vld [vmem:[%s11225_s1 + $0x1288] ss:$16 sps:$4 sm:$0xff]   ;;  %v8243_v17 = vld [vmem:[%s11225_s1 + $0x12a4] ss:$16 sps:$4 sm:$0xff]  }
 0x21b   :  { %5286 = vmatpush1.bf16.msra.mxu0 %v8151_v18  ;;  %5819 = vmatpush1.bf16.msra.mxu1 %v8154_v19  ;;  %v8246_v18 = vld [vmem:[%s11225_s1 + $0x12ac] ss:$16 sps:$4 sm:$0xff]   ;;  %v8241_v19 = vld [vmem:[%s11225_s1 + $0x12a0] ss:$16 sps:$4 sm:$0xff]  }
 0x21c   :  { %5287 = vmatprep.subr.bf16.mxu0 %v8159_v20  ;;  %5820 = vmatprep.subr.bf16.mxu1 %v8162_v22  ;;  %v8244_v20 = vld [vmem:[%s11225_s1 + $0x12a8] ss:$16 sps:$4 sm:$0xff]   ;;  %v8249_v22 = vld [vmem:[%s11225_s1 + $0x12c4] ss:$16 sps:$4 sm:$0xff]  }
 0x21f   :  { %5288 = vmatpush1.bf16.msra.mxu0 %v8157_v23  ;;  %5821 = vmatpush1.bf16.msra.mxu1 %v8160_v24  ;;  %v8252_v23 = vld [vmem:[%s11225_s1 + $0x12cc] ss:$16 sps:$4 sm:$0xff]   ;;  %v8247_v24 = vld [vmem:[%s11225_s1 + $0x12c0] ss:$16 sps:$4 sm:$0xff]  }
 0x220   :  { %5289 = vmatprep.subr.bf16.mxu0 %v8165_v13  ;;  %5822 = vmatprep.subr.bf16.mxu1 %v8168_v27  ;;  %v8250_v13 = vld [vmem:[%s11225_s1 + $0x12c8] ss:$16 sps:$4 sm:$0xff]   ;;  %v8255_v27 = vld [vmem:[%s11225_s1 + $0x12e4] ss:$16 sps:$4 sm:$0xff]  }
 0x223   :  { %5290 = vmatpush1.bf16.msra.mxu0 %v8163_v28  ;;  %5823 = vmatpush1.bf16.msra.mxu1 %v8166_v29  ;;  %v8258_v28 = vld [vmem:[%s11225_s1 + $0x12ec] ss:$16 sps:$4 sm:$0xff]   ;;  %v8253_v29 = vld [vmem:[%s11225_s1 + $0x12e0] ss:$16 sps:$4 sm:$0xff]  }
 0x224   :  { %5291 = vmatprep.subr.bf16.mxu0 %v8171_v14  ;;  %5824 = vmatprep.subr.bf16.mxu1 %v8174_v30  ;;  %v8256_v14 = vld [vmem:[%s11225_s1 + $0x12e8] ss:$16 sps:$4 sm:$0xff]   ;;  %v8261_v30 = vld [vmem:[%s11225_s1 + $0x1304] ss:$16 sps:$4 sm:$0xff]  }
 0x227   :  { %5292 = vmatpush1.bf16.msra.mxu0 %v8169_v31  ;;  %5825 = vmatpush1.bf16.msra.mxu1 %v8172_v25  ;;  %v8264_v31 = vld [vmem:[%s11225_s1 + $0x130c] ss:$16 sps:$4 sm:$0xff]   ;;  %v8259_v25 = vld [vmem:[%s11225_s1 + $0x1300] ss:$16 sps:$4 sm:$0xff]  }
 0x228   :  { %5293 = vmatprep.subr.bf16.mxu0 %v8177_v32  ;;  %5826 = vmatprep.subr.bf16.mxu1 %v8180_v33  ;;  %v8262_v32 = vld [vmem:[%s11225_s1 + $0x1308] ss:$16 sps:$4 sm:$0xff]   ;;  %v8267_v33 = vld [vmem:[%s11225_s1 + $0x1324] ss:$16 sps:$4 sm:$0xff]  }
 0x22b   :  { %5294 = vmatpush1.bf16.msra.mxu0 %v8175_v26  ;;  %5827 = vmatpush1.bf16.msra.mxu1 %v8178_v36  ;;  %v8270_v26 = vld [vmem:[%s11225_s1 + $0x132c] ss:$16 sps:$4 sm:$0xff]   ;;  %v8265_v36 = vld [vmem:[%s11225_s1 + $0x1320] ss:$16 sps:$4 sm:$0xff]  }
 0x22c   :  { %5295 = vmatprep.subr.bf16.mxu0 %v8183_v37  ;;  %5828 = vmatprep.subr.bf16.mxu1 %v8186_v21  ;;  %v8268_v37 = vld [vmem:[%s11225_s1 + $0x1328] ss:$16 sps:$4 sm:$0xff]   ;;  %v8273_v21 = vld [vmem:[%s11225_s1 + $0x1344] ss:$16 sps:$4 sm:$0xff]  }
 0x22f   :  { %5296 = vmatpush1.bf16.msra.mxu0 %v8181_v39  ;;  %5829 = vmatpush1.bf16.msra.mxu1 %v8184_v40  ;;  %v8276_v39 = vld [vmem:[%s11225_s1 + $0x134c] ss:$16 sps:$4 sm:$0xff]   ;;  %v8271_v40 = vld [vmem:[%s11225_s1 + $0x1340] ss:$16 sps:$4 sm:$0xff]  }
 0x230   :  { %5297 = vmatprep.subr.bf16.mxu0 %v8189_v41  ;;  %5830 = vmatprep.subr.bf16.mxu1 %v8192_v34  ;;  %v8274_v41 = vld [vmem:[%s11225_s1 + $0x1348] ss:$16 sps:$4 sm:$0xff]   ;;  %v8279_v34 = vld [vmem:[%s11225_s1 + $0x1364] ss:$16 sps:$4 sm:$0xff]  }
 0x233   :  { %5298 = vmatpush1.bf16.msra.mxu0 %v8187_v43  ;;  %5831 = vmatpush1.bf16.msra.mxu1 %v8190_v45  ;;  %v8282_v43 = vld [vmem:[%s11225_s1 + $0x136c] ss:$16 sps:$4 sm:$0xff]   ;;  %v8277_v45 = vld [vmem:[%s11225_s1 + $0x1360] ss:$16 sps:$4 sm:$0xff]  }
 0x234   :  { %5299 = vmatprep.subr.bf16.mxu0 %v8195_v46  ;;  %5832 = vmatprep.subr.bf16.mxu1 %v8198_v35  ;;  %v8280_v46 = vld [vmem:[%s11225_s1 + $0x1368] ss:$16 sps:$4 sm:$0xff]   ;;  %v8285_v35 = vld [vmem:[%s11225_s1 + $0x1384] ss:$16 sps:$4 sm:$0xff]  }
 0x237   :  { %5300 = vmatpush1.bf16.msra.mxu0 %v8193_v50  ;;  %5833 = vmatpush1.bf16.msra.mxu1 %v8196_v53  ;;  %v8288_v50 = vld [vmem:[%s11225_s1 + $0x138c] ss:$16 sps:$4 sm:$0xff]   ;;  %v8283_v53 = vld [vmem:[%s11225_s1 + $0x1380] ss:$16 sps:$4 sm:$0xff]  }
 0x238   :  { %5301 = vmatprep.subr.bf16.mxu0 %v8201_v38  ;;  %5834 = vmatprep.subr.bf16.mxu1 %v8204_v54  ;;  %v8286_v38 = vld [vmem:[%s11225_s1 + $0x1388] ss:$16 sps:$4 sm:$0xff]   ;;  %v8291_v54 = vld [vmem:[%s11225_s1 + $0x13a4] ss:$16 sps:$4 sm:$0xff]  }
 0x23b   :  { %5302 = vmatpush1.bf16.msra.mxu0 %v8199_v55  ;;  %5835 = vmatpush1.bf16.msra.mxu1 %v8202_v56  ;;  %v8294_v55 = vld [vmem:[%s11225_s1 + $0x13ac] ss:$16 sps:$4 sm:$0xff]   ;;  %v8289_v56 = vld [vmem:[%s11225_s1 + $0x13a0] ss:$16 sps:$4 sm:$0xff]  }
 0x23c   :  { %5303 = vmatprep.subr.bf16.mxu0 %v8207_v47  ;;  %5836 = vmatprep.subr.bf16.mxu1 %v8210_v57  ;;  %v8292_v47 = vld [vmem:[%s11225_s1 + $0x13a8] ss:$16 sps:$4 sm:$0xff]   ;;  %v8297_v57 = vld [vmem:[%s11225_s1 + $0x13c4] ss:$16 sps:$4 sm:$0xff]  }
 0x23f   :  { %5304 = vmatpush1.bf16.msra.mxu0 %v8205_v58  ;;  %5837 = vmatpush1.bf16.msra.mxu1 %v8208_v59  ;;  %v8300_v58 = vld [vmem:[%s11225_s1 + $0x13cc] ss:$16 sps:$4 sm:$0xff]   ;;  %v934_v59 = vcombine.high %v10221_v44, %v10221_v44 }
 0x240   :  { %5314 = vmatprep.subr.bf16.mxu0 %v8213_v48  ;;  %5847 = vmatprep.subr.bf16.mxu1 %v8216_v61  ;;  %v8295_v48 = vld [vmem:[%s11225_s1 + $0x13c0] ss:$16 sps:$4 sm:$0xff]   ;;  %v8298_v61 = vld [vmem:[%s11225_s1 + $0x13c8] ss:$16 sps:$4 sm:$0xff]   ;;  %v8306_v44 = vld [vmem:[%s11225_s1 + $0x13ec] ss:$16 sps:$4 sm:$0xff]  }
 0x242   :  { %5306 = vmatmul.mubr.bf16.vlgmr.msra.gmra.mrb[0].mxu0 %v10454_v62  ;;  %5839 = vmatmul.mubr.bf16.vlgmr.msra.gmra.mrb[0].mxu1 %v10454_v62 }
 0x243   :  { %5315 = vmatpush1.bf16.msra.mxu0 %v8211_v63  ;;  %5848 = vmatpush1.bf16.msra.mxu1 %v8214_v0  ;;  %v8303_v63 = vld [vmem:[%s11225_s1 + $0x13e4] ss:$16 sps:$4 sm:$0xff]   ;;  %v10643_v0 = vrot.slane %v934_v59, %v8750_v49  ;;  %v8382_v59 = vld [vmem:[%s11225_s1 + $0x1588] ss:$16 sps:$4 sm:$0xff]  }
 0x244   :  { %5316 = vmatprep.subr.bf16.mxu0 %v8219_v1  ;;  %5849 = vmatprep.subr.bf16.mxu1 %v8222_v51  ;;  %v8301_v1 = vld [vmem:[%s11225_s1 + $0x13e0] ss:$16 sps:$4 sm:$0xff]   ;;  %v8304_v51 = vld [vmem:[%s11225_s1 + $0x13e8] ss:$16 sps:$4 sm:$0xff]  }
 0x245   :  { %5346 = vmatprep.mubr.bf16.mxu0 %v981_v2  ;;  %5879 = vmatprep.mubr.bf16.mxu1 %v981_v2  ;;  %v8309_v2 = vld [vmem:[%s11225_s1 + $0x1404] ss:$16 sps:$4 sm:$0xff]  }
 0x247   :  { %5317 = vmatpush1.bf16.msra.mxu0 %v8217_v3  ;;  %5850 = vmatpush1.bf16.msra.mxu1 %v8220_v4  ;;  %v8312_v3 = vld [vmem:[%s11225_s1 + $0x140c] ss:$16 sps:$4 sm:$0xff]   ;;  %v950_v4 = vcombine.high %v10643_v0, %v10643_v0 }
 0x248   :  { %5318 = vmatprep.subr.bf16.mxu0 %v8225_v60  ;;  %5851 = vmatprep.subr.bf16.mxu1 %v8228_v5  ;;  %v979_v60 = vcombine.high %v10454_v62, %v10454_v62  ;;  %v8307_v5 = vld [vmem:[%s11225_s1 + $0x1400] ss:$16 sps:$4 sm:$0xff]   ;;  %v8318_v62 = vld [vmem:[%s11225_s1 + $0x142c] ss:$16 sps:$4 sm:$0xff]  }
 0x24b   :  { %5319 = vmatpush1.bf16.msra.mxu0 %v8223_v6  ;;  %5852 = vmatpush1.bf16.msra.mxu1 %v8226_v7  ;;  %v8310_v6 = vld [vmem:[%s11225_s1 + $0x1408] ss:$16 sps:$4 sm:$0xff]   ;;  %v8315_v7 = vld [vmem:[%s11225_s1 + $0x1424] ss:$16 sps:$4 sm:$0xff]  }
 0x24c   :  { %5320 = vmatprep.subr.bf16.mxu0 %v8231_v8  ;;  %5853 = vmatprep.subr.bf16.mxu1 %v8234_v9  ;;  %v10674_v8 = vrot.slane %v950_v4, %v8750_v49  ;;  %v8313_v9 = vld [vmem:[%s11225_s1 + $0x1420] ss:$16 sps:$4 sm:$0xff]   ;;  %v8399_v4 = vld [vmem:[%s11225_s1 + $0x15e4] ss:$16 sps:$4 sm:$0xff]  }
 0x24f   :  { %5321 = vmatpush1.bf16.msra.mxu0 %v8229_v10  ;;  %5854 = vmatpush1.bf16.msra.mxu1 %v8232_v11  ;;  %v8316_v10 = vld [vmem:[%s11225_s1 + $0x1428] ss:$16 sps:$4 sm:$0xff]   ;;  %v8321_v11 = vld [vmem:[%s11225_s1 + $0x1444] ss:$16 sps:$4 sm:$0xff]  }
 0x250   :  { %5322 = vmatprep.subr.bf16.mxu0 %v8237_v12  ;;  %5855 = vmatprep.subr.bf16.mxu1 %v8240_v52  ;;  %v8324_v12 = vld [vmem:[%s11225_s1 + $0x144c] ss:$16 sps:$4 sm:$0xff]   ;;  %v8319_v52 = vld [vmem:[%s11225_s1 + $0x1440] ss:$16 sps:$4 sm:$0xff]  }
 0x253   :  { %5323 = vmatpush1.bf16.msra.mxu0 %v8235_v15  ;;  %5856 = vmatpush1.bf16.msra.mxu1 %v8238_v16  ;;  %v8322_v15 = vld [vmem:[%s11225_s1 + $0x1448] ss:$16 sps:$4 sm:$0xff]   ;;  %v8327_v16 = vld [vmem:[%s11225_s1 + $0x1464] ss:$16 sps:$4 sm:$0xff]  }
 0x254   :  { %5324 = vmatprep.subr.bf16.mxu0 %v8243_v17  ;;  %5857 = vmatprep.subr.bf16.mxu1 %v8246_v18  ;;  %v8330_v17 = vld [vmem:[%s11225_s1 + $0x146c] ss:$16 sps:$4 sm:$0xff]   ;;  %v8325_v18 = vld [vmem:[%s11225_s1 + $0x1460] ss:$16 sps:$4 sm:$0xff]  }
 0x257   :  { %5325 = vmatpush1.bf16.msra.mxu0 %v8241_v19  ;;  %5858 = vmatpush1.bf16.msra.mxu1 %v8244_v20  ;;  %v8328_v19 = vld [vmem:[%s11225_s1 + $0x1468] ss:$16 sps:$4 sm:$0xff]   ;;  %v8333_v20 = vld [vmem:[%s11225_s1 + $0x1484] ss:$16 sps:$4 sm:$0xff]  }
 0x258   :  { %5326 = vmatprep.subr.bf16.mxu0 %v8249_v22  ;;  %5859 = vmatprep.subr.bf16.mxu1 %v8252_v23  ;;  %v8336_v22 = vld [vmem:[%s11225_s1 + $0x148c] ss:$16 sps:$4 sm:$0xff]   ;;  %v8331_v23 = vld [vmem:[%s11225_s1 + $0x1480] ss:$16 sps:$4 sm:$0xff]  }
 0x25b   :  { %5327 = vmatpush1.bf16.msra.mxu0 %v8247_v24  ;;  %5860 = vmatpush1.bf16.msra.mxu1 %v8250_v13  ;;  %v8334_v24 = vld [vmem:[%s11225_s1 + $0x1488] ss:$16 sps:$4 sm:$0xff]   ;;  %v8339_v13 = vld [vmem:[%s11225_s1 + $0x14a4] ss:$16 sps:$4 sm:$0xff]  }
 0x25c   :  { %5328 = vmatprep.subr.bf16.mxu0 %v8255_v27  ;;  %5861 = vmatprep.subr.bf16.mxu1 %v8258_v28  ;;  %v8342_v27 = vld [vmem:[%s11225_s1 + $0x14ac] ss:$16 sps:$4 sm:$0xff]   ;;  %v8337_v28 = vld [vmem:[%s11225_s1 + $0x14a0] ss:$16 sps:$4 sm:$0xff]  }
 0x25f   :  { %5329 = vmatpush1.bf16.msra.mxu0 %v8253_v29  ;;  %5862 = vmatpush1.bf16.msra.mxu1 %v8256_v14  ;;  %v8340_v29 = vld [vmem:[%s11225_s1 + $0x14a8] ss:$16 sps:$4 sm:$0xff]   ;;  %v8345_v14 = vld [vmem:[%s11225_s1 + $0x14c4] ss:$16 sps:$4 sm:$0xff]  }
 0x260   :  { %5330 = vmatprep.subr.bf16.mxu0 %v8261_v30  ;;  %5863 = vmatprep.subr.bf16.mxu1 %v8264_v31  ;;  %v8348_v30 = vld [vmem:[%s11225_s1 + $0x14cc] ss:$16 sps:$4 sm:$0xff]   ;;  %v8343_v31 = vld [vmem:[%s11225_s1 + $0x14c0] ss:$16 sps:$4 sm:$0xff]  }
 0x263   :  { %5331 = vmatpush1.bf16.msra.mxu0 %v8259_v25  ;;  %5864 = vmatpush1.bf16.msra.mxu1 %v8262_v32  ;;  %v8346_v25 = vld [vmem:[%s11225_s1 + $0x14c8] ss:$16 sps:$4 sm:$0xff]   ;;  %v8351_v32 = vld [vmem:[%s11225_s1 + $0x14e4] ss:$16 sps:$4 sm:$0xff]  }
 0x264   :  { %5332 = vmatprep.subr.bf16.mxu0 %v8267_v33  ;;  %5865 = vmatprep.subr.bf16.mxu1 %v8270_v26  ;;  %v8354_v33 = vld [vmem:[%s11225_s1 + $0x14ec] ss:$16 sps:$4 sm:$0xff]   ;;  %v8349_v26 = vld [vmem:[%s11225_s1 + $0x14e0] ss:$16 sps:$4 sm:$0xff]  }
 0x267   :  { %5333 = vmatpush1.bf16.msra.mxu0 %v8265_v36  ;;  %5866 = vmatpush1.bf16.msra.mxu1 %v8268_v37  ;;  %v8352_v36 = vld [vmem:[%s11225_s1 + $0x14e8] ss:$16 sps:$4 sm:$0xff]   ;;  %v8357_v37 = vld [vmem:[%s11225_s1 + $0x1504] ss:$16 sps:$4 sm:$0xff]  }
 0x268   :  { %5334 = vmatprep.subr.bf16.mxu0 %v8273_v21  ;;  %5867 = vmatprep.subr.bf16.mxu1 %v8276_v39  ;;  %v8360_v21 = vld [vmem:[%s11225_s1 + $0x150c] ss:$16 sps:$4 sm:$0xff]   ;;  %v8355_v39 = vld [vmem:[%s11225_s1 + $0x1500] ss:$16 sps:$4 sm:$0xff]  }
 0x26b   :  { %5335 = vmatpush1.bf16.msra.mxu0 %v8271_v40  ;;  %5868 = vmatpush1.bf16.msra.mxu1 %v8274_v41  ;;  %v8358_v40 = vld [vmem:[%s11225_s1 + $0x1508] ss:$16 sps:$4 sm:$0xff]   ;;  %v8363_v41 = vld [vmem:[%s11225_s1 + $0x1524] ss:$16 sps:$4 sm:$0xff]  }
 0x26c   :  { %5336 = vmatprep.subr.bf16.mxu0 %v8279_v34  ;;  %5869 = vmatprep.subr.bf16.mxu1 %v8282_v43  ;;  %v8366_v34 = vld [vmem:[%s11225_s1 + $0x152c] ss:$16 sps:$4 sm:$0xff]   ;;  %v8361_v43 = vld [vmem:[%s11225_s1 + $0x1520] ss:$16 sps:$4 sm:$0xff]  }
 0x26f   :  { %5337 = vmatpush1.bf16.msra.mxu0 %v8277_v45  ;;  %5870 = vmatpush1.bf16.msra.mxu1 %v8280_v46  ;;  %v8364_v45 = vld [vmem:[%s11225_s1 + $0x1528] ss:$16 sps:$4 sm:$0xff]   ;;  %v8369_v46 = vld [vmem:[%s11225_s1 + $0x1544] ss:$16 sps:$4 sm:$0xff]  }
 0x270   :  { %5338 = vmatprep.subr.bf16.mxu0 %v8285_v35  ;;  %5871 = vmatprep.subr.bf16.mxu1 %v8288_v50  ;;  %v8372_v35 = vld [vmem:[%s11225_s1 + $0x154c] ss:$16 sps:$4 sm:$0xff]   ;;  %v8367_v50 = vld [vmem:[%s11225_s1 + $0x1540] ss:$16 sps:$4 sm:$0xff]  }
 0x273   :  { %5339 = vmatpush1.bf16.msra.mxu0 %v8283_v53  ;;  %5872 = vmatpush1.bf16.msra.mxu1 %v8286_v38  ;;  %v8370_v53 = vld [vmem:[%s11225_s1 + $0x1548] ss:$16 sps:$4 sm:$0xff]   ;;  %v8375_v38 = vld [vmem:[%s11225_s1 + $0x1564] ss:$16 sps:$4 sm:$0xff]  }
 0x274   :  { %5340 = vmatprep.subr.bf16.mxu0 %v8291_v54  ;;  %5873 = vmatprep.subr.bf16.mxu1 %v8294_v55  ;;  %v8378_v54 = vld [vmem:[%s11225_s1 + $0x156c] ss:$16 sps:$4 sm:$0xff]   ;;  %v8373_v55 = vld [vmem:[%s11225_s1 + $0x1560] ss:$16 sps:$4 sm:$0xff]  }
 0x277   :  { %5341 = vmatpush1.bf16.msra.mxu0 %v8289_v56  ;;  %5874 = vmatpush1.bf16.msra.mxu1 %v8292_v47  ;;  %v8376_v56 = vld [vmem:[%s11225_s1 + $0x1568] ss:$16 sps:$4 sm:$0xff]   ;;  %v8381_v47 = vld [vmem:[%s11225_s1 + $0x1584] ss:$16 sps:$4 sm:$0xff]  }
 0x278   :  { %5342 = vmatprep.subr.bf16.mxu0 %v8297_v57  ;;  %5875 = vmatprep.subr.bf16.mxu1 %v8300_v58  ;;  %v8384_v57 = vld [vmem:[%s11225_s1 + $0x158c] ss:$16 sps:$4 sm:$0xff]   ;;  %v8379_v58 = vld [vmem:[%s11225_s1 + $0x1580] ss:$16 sps:$4 sm:$0xff]  }
 0x27b   :  { %5343 = vmatpush1.bf16.msra.mxu0 %v8295_v48  ;;  %5876 = vmatpush1.bf16.msra.mxu1 %v8298_v61  ;;  %v8387_v48 = vld [vmem:[%s11225_s1 + $0x15a4] ss:$16 sps:$4 sm:$0xff]   ;;  %v8390_v61 = vld [vmem:[%s11225_s1 + $0x15ac] ss:$16 sps:$4 sm:$0xff]  }
 0x27c   :  { %5344 = vmatprep.subr.bf16.mxu0 %v8303_v63  ;;  %5877 = vmatprep.subr.bf16.mxu1 %v8306_v44  ;;  %v8385_v63 = vld [vmem:[%s11225_s1 + $0x15a0] ss:$16 sps:$4 sm:$0xff]   ;;  %v8388_v44 = vld [vmem:[%s11225_s1 + $0x15a8] ss:$16 sps:$4 sm:$0xff]  }
 0x27f   :  { %5345 = vmatpush1.bf16.msra.mxu0 %v8301_v1  ;;  %5878 = vmatpush1.bf16.msra.mxu1 %v8304_v51  ;;  %v8393_v1 = vld [vmem:[%s11225_s1 + $0x15c4] ss:$16 sps:$4 sm:$0xff]   ;;  %v8396_v51 = vld [vmem:[%s11225_s1 + $0x15cc] ss:$16 sps:$4 sm:$0xff]  }
 0x280   :  { %5355 = vmatprep.subr.bf16.mxu0 %v8309_v2  ;;  %5888 = vmatprep.subr.bf16.mxu1 %v8312_v3  ;;  %v8391_v2 = vld [vmem:[%s11225_s1 + $0x15c0] ss:$16 sps:$4 sm:$0xff]   ;;  %v8394_v3 = vld [vmem:[%s11225_s1 + $0x15c8] ss:$16 sps:$4 sm:$0xff]  }
 0x282   :  { %5347 = vmatmul.mubr.bf16.vlgmr.msra.gmra.mrb[0].mxu0 %v979_v60  ;;  %5880 = vmatmul.mubr.bf16.vlgmr.msra.gmra.mrb[0].mxu1 %v979_v60  ;;  %v8402_v60 = vld [vmem:[%s11225_s1 + $0x15ec] ss:$16 sps:$4 sm:$0xff]  }
 0x283   :  { %5356 = vmatpush1.bf16.msra.mxu0 %v8307_v5  ;;  %5889 = vmatpush1.bf16.msra.mxu1 %v8310_v6  ;;  %v8397_v5 = vld [vmem:[%s11225_s1 + $0x15e0] ss:$16 sps:$4 sm:$0xff]   ;;  %v8400_v6 = vld [vmem:[%s11225_s1 + $0x15e8] ss:$16 sps:$4 sm:$0xff]  }
 0x284   :  { %5357 = vmatprep.subr.bf16.mxu0 %v8315_v7  ;;  %5890 = vmatprep.subr.bf16.mxu1 %v8318_v62  ;;  %v8406_v7 = vld [vmem:[%s11225_s1 + $0x1604] ss:$16 sps:$4 sm:$0xff]   ;;  %v8409_v62 = vld [vmem:[%s11225_s1 + $0x160c] ss:$16 sps:$4 sm:$0xff]  }
 0x285   :  { %5387 = vmatprep.mubr.bf16.mxu0 %v10674_v8  ;;  %5920 = vmatprep.mubr.bf16.mxu1 %v10674_v8 }
 0x287   :  { %5358 = vmatpush1.bf16.msra.mxu0 %v8313_v9  ;;  %5891 = vmatpush1.bf16.msra.mxu1 %v8316_v10  ;;  %v10860_v9 = vrot.slane %v10643_v0, %v8750_v49  ;;  %v8404_v10 = vld [vmem:[%s11225_s1 + $0x1600] ss:$16 sps:$4 sm:$0xff]   ;;  %v8415_v0 = vld [vmem:[%s11225_s1 + $0x162c] ss:$16 sps:$4 sm:$0xff]  }
 0x288   :  { %5359 = vmatprep.subr.bf16.mxu0 %v8321_v11  ;;  %5892 = vmatprep.subr.bf16.mxu1 %v8324_v12  ;;  %v8407_v11 = vld [vmem:[%s11225_s1 + $0x1608] ss:$16 sps:$4 sm:$0xff]   ;;  %v8412_v12 = vld [vmem:[%s11225_s1 + $0x1624] ss:$16 sps:$4 sm:$0xff]  }
 0x28b   :  { %5360 = vmatpush1.bf16.msra.mxu0 %v8319_v52  ;;  %5893 = vmatpush1.bf16.msra.mxu1 %v8322_v15  ;;  %v982_v52 = vcombine.high %v10674_v8, %v10674_v8  ;;  %v8410_v15 = vld [vmem:[%s11225_s1 + $0x1620] ss:$16 sps:$4 sm:$0xff]   ;;  %v8418_v8 = vld [vmem:[%s11225_s1 + $0x1644] ss:$16 sps:$4 sm:$0xff]  }
 0x28c   :  { %5361 = vmatprep.subr.bf16.mxu0 %v8327_v16  ;;  %5894 = vmatprep.subr.bf16.mxu1 %v8330_v17  ;;  %v8413_v16 = vld [vmem:[%s11225_s1 + $0x1628] ss:$16 sps:$4 sm:$0xff]   ;;  %v8421_v17 = vld [vmem:[%s11225_s1 + $0x164c] ss:$16 sps:$4 sm:$0xff]  }
 0x28f   :  { %5362 = vmatpush1.bf16.msra.mxu0 %v8325_v18  ;;  %5895 = vmatpush1.bf16.msra.mxu1 %v8328_v19  ;;  %v8416_v18 = vld [vmem:[%s11225_s1 + $0x1640] ss:$16 sps:$4 sm:$0xff]   ;;  %v8419_v19 = vld [vmem:[%s11225_s1 + $0x1648] ss:$16 sps:$4 sm:$0xff]  }
 0x290   :  { %5363 = vmatprep.subr.bf16.mxu0 %v8333_v20  ;;  %5896 = vmatprep.subr.bf16.mxu1 %v8336_v22  ;;  %v8424_v20 = vld [vmem:[%s11225_s1 + $0x1664] ss:$16 sps:$4 sm:$0xff]   ;;  %v8427_v22 = vld [vmem:[%s11225_s1 + $0x166c] ss:$16 sps:$4 sm:$0xff]  }
 0x293   :  { %5364 = vmatpush1.bf16.msra.mxu0 %v8331_v23  ;;  %5897 = vmatpush1.bf16.msra.mxu1 %v8334_v24  ;;  %v8422_v23 = vld [vmem:[%s11225_s1 + $0x1660] ss:$16 sps:$4 sm:$0xff]   ;;  %v8425_v24 = vld [vmem:[%s11225_s1 + $0x1668] ss:$16 sps:$4 sm:$0xff]  }
 0x294   :  { %5365 = vmatprep.subr.bf16.mxu0 %v8339_v13  ;;  %5898 = vmatprep.subr.bf16.mxu1 %v8342_v27  ;;  %v8430_v13 = vld [vmem:[%s11225_s1 + $0x1684] ss:$16 sps:$4 sm:$0xff]   ;;  %v8433_v27 = vld [vmem:[%s11225_s1 + $0x168c] ss:$16 sps:$4 sm:$0xff]  }
 0x297   :  { %5366 = vmatpush1.bf16.msra.mxu0 %v8337_v28  ;;  %5899 = vmatpush1.bf16.msra.mxu1 %v8340_v29  ;;  %v8428_v28 = vld [vmem:[%s11225_s1 + $0x1680] ss:$16 sps:$4 sm:$0xff]   ;;  %v8431_v29 = vld [vmem:[%s11225_s1 + $0x1688] ss:$16 sps:$4 sm:$0xff]  }
 0x298   :  { %5367 = vmatprep.subr.bf16.mxu0 %v8345_v14  ;;  %5900 = vmatprep.subr.bf16.mxu1 %v8348_v30  ;;  %v8436_v14 = vld [vmem:[%s11225_s1 + $0x16a4] ss:$16 sps:$4 sm:$0xff]   ;;  %v8439_v30 = vld [vmem:[%s11225_s1 + $0x16ac] ss:$16 sps:$4 sm:$0xff]  }
 0x29b   :  { %5368 = vmatpush1.bf16.msra.mxu0 %v8343_v31  ;;  %5901 = vmatpush1.bf16.msra.mxu1 %v8346_v25  ;;  %v8434_v31 = vld [vmem:[%s11225_s1 + $0x16a0] ss:$16 sps:$4 sm:$0xff]   ;;  %v8437_v25 = vld [vmem:[%s11225_s1 + $0x16a8] ss:$16 sps:$4 sm:$0xff]  }
 0x29c   :  { %5369 = vmatprep.subr.bf16.mxu0 %v8351_v32  ;;  %5902 = vmatprep.subr.bf16.mxu1 %v8354_v33  ;;  %v8442_v32 = vld [vmem:[%s11225_s1 + $0x16c4] ss:$16 sps:$4 sm:$0xff]   ;;  %v8445_v33 = vld [vmem:[%s11225_s1 + $0x16cc] ss:$16 sps:$4 sm:$0xff]  }
 0x29f   :  { %5370 = vmatpush1.bf16.msra.mxu0 %v8349_v26  ;;  %5903 = vmatpush1.bf16.msra.mxu1 %v8352_v36  ;;  %v8440_v26 = vld [vmem:[%s11225_s1 + $0x16c0] ss:$16 sps:$4 sm:$0xff]   ;;  %v8443_v36 = vld [vmem:[%s11225_s1 + $0x16c8] ss:$16 sps:$4 sm:$0xff]  }
 0x2a0   :  { %5371 = vmatprep.subr.bf16.mxu0 %v8357_v37  ;;  %5904 = vmatprep.subr.bf16.mxu1 %v8360_v21  ;;  %v8448_v37 = vld [vmem:[%s11225_s1 + $0x16e4] ss:$16 sps:$4 sm:$0xff]   ;;  %v8451_v21 = vld [vmem:[%s11225_s1 + $0x16ec] ss:$16 sps:$4 sm:$0xff]  }
 0x2a3   :  { %5372 = vmatpush1.bf16.msra.mxu0 %v8355_v39  ;;  %5905 = vmatpush1.bf16.msra.mxu1 %v8358_v40  ;;  %v8446_v39 = vld [vmem:[%s11225_s1 + $0x16e0] ss:$16 sps:$4 sm:$0xff]   ;;  %v8449_v40 = vld [vmem:[%s11225_s1 + $0x16e8] ss:$16 sps:$4 sm:$0xff]  }
 0x2a4   :  { %5373 = vmatprep.subr.bf16.mxu0 %v8363_v41  ;;  %5906 = vmatprep.subr.bf16.mxu1 %v8366_v34  ;;  %v8454_v41 = vld [vmem:[%s11225_s1 + $0x1704] ss:$16 sps:$4 sm:$0xff]   ;;  %v8457_v34 = vld [vmem:[%s11225_s1 + $0x170c] ss:$16 sps:$4 sm:$0xff]  }
 0x2a7   :  { %5374 = vmatpush1.bf16.msra.mxu0 %v8361_v43  ;;  %5907 = vmatpush1.bf16.msra.mxu1 %v8364_v45  ;;  %v8452_v43 = vld [vmem:[%s11225_s1 + $0x1700] ss:$16 sps:$4 sm:$0xff]   ;;  %v8455_v45 = vld [vmem:[%s11225_s1 + $0x1708] ss:$16 sps:$4 sm:$0xff]  }
 0x2a8   :  { %5375 = vmatprep.subr.bf16.mxu0 %v8369_v46  ;;  %5908 = vmatprep.subr.bf16.mxu1 %v8372_v35  ;;  %v8460_v46 = vld [vmem:[%s11225_s1 + $0x1724] ss:$16 sps:$4 sm:$0xff]   ;;  %v8463_v35 = vld [vmem:[%s11225_s1 + $0x172c] ss:$16 sps:$4 sm:$0xff]  }
 0x2ab   :  { %5376 = vmatpush1.bf16.msra.mxu0 %v8367_v50  ;;  %5909 = vmatpush1.bf16.msra.mxu1 %v8370_v53  ;;  %v8458_v50 = vld [vmem:[%s11225_s1 + $0x1720] ss:$16 sps:$4 sm:$0xff]   ;;  %v8461_v53 = vld [vmem:[%s11225_s1 + $0x1728] ss:$16 sps:$4 sm:$0xff]  }
 0x2ac   :  { %5377 = vmatprep.subr.bf16.mxu0 %v8375_v38  ;;  %5910 = vmatprep.subr.bf16.mxu1 %v8378_v54  ;;  %v8466_v38 = vld [vmem:[%s11225_s1 + $0x1744] ss:$16 sps:$4 sm:$0xff]   ;;  %v8469_v54 = vld [vmem:[%s11225_s1 + $0x174c] ss:$16 sps:$4 sm:$0xff]  }
 0x2af   :  { %5378 = vmatpush1.bf16.msra.mxu0 %v8373_v55  ;;  %5911 = vmatpush1.bf16.msra.mxu1 %v8376_v56  ;;  %v8464_v55 = vld [vmem:[%s11225_s1 + $0x1740] ss:$16 sps:$4 sm:$0xff]   ;;  %v8467_v56 = vld [vmem:[%s11225_s1 + $0x1748] ss:$16 sps:$4 sm:$0xff]  }
 0x2b0   :  { %5379 = vmatprep.subr.bf16.mxu0 %v8381_v47  ;;  %5912 = vmatprep.subr.bf16.mxu1 %v8384_v57  ;;  %v8472_v47 = vld [vmem:[%s11225_s1 + $0x1764] ss:$16 sps:$4 sm:$0xff]   ;;  %v8475_v57 = vld [vmem:[%s11225_s1 + $0x176c] ss:$16 sps:$4 sm:$0xff]  }
 0x2b3   :  { %5380 = vmatpush1.bf16.msra.mxu0 %v8379_v58  ;;  %5913 = vmatpush1.bf16.msra.mxu1 %v8382_v59  ;;  %v8470_v58 = vld [vmem:[%s11225_s1 + $0x1760] ss:$16 sps:$4 sm:$0xff]   ;;  %v8473_v59 = vld [vmem:[%s11225_s1 + $0x1768] ss:$16 sps:$4 sm:$0xff]  }
 0x2b4   :  { %5381 = vmatprep.subr.bf16.mxu0 %v8387_v48  ;;  %5914 = vmatprep.subr.bf16.mxu1 %v8390_v61  ;;  %v8478_v48 = vld [vmem:[%s11225_s1 + $0x1784] ss:$16 sps:$4 sm:$0xff]   ;;  %v8481_v61 = vld [vmem:[%s11225_s1 + $0x178c] ss:$16 sps:$4 sm:$0xff]  }
 0x2b7   :  { %5382 = vmatpush1.bf16.msra.mxu0 %v8385_v63  ;;  %5915 = vmatpush1.bf16.msra.mxu1 %v8388_v44  ;;  %v8476_v63 = vld [vmem:[%s11225_s1 + $0x1780] ss:$16 sps:$4 sm:$0xff]   ;;  %v8479_v44 = vld [vmem:[%s11225_s1 + $0x1788] ss:$16 sps:$4 sm:$0xff]  }
 0x2b8   :  { %5383 = vmatprep.subr.bf16.mxu0 %v8393_v1  ;;  %5916 = vmatprep.subr.bf16.mxu1 %v8396_v51  ;;  %v8484_v1 = vld [vmem:[%s11225_s1 + $0x17a4] ss:$16 sps:$4 sm:$0xff]   ;;  %v8487_v51 = vld [vmem:[%s11225_s1 + $0x17ac] ss:$16 sps:$4 sm:$0xff]  }
 0x2bb   :  { %5384 = vmatpush1.bf16.msra.mxu0 %v8391_v2  ;;  %5917 = vmatpush1.bf16.msra.mxu1 %v8394_v3  ;;  %v8482_v2 = vld [vmem:[%s11225_s1 + $0x17a0] ss:$16 sps:$4 sm:$0xff]   ;;  %v8485_v3 = vld [vmem:[%s11225_s1 + $0x17a8] ss:$16 sps:$4 sm:$0xff]  }
 0x2bc   :  { %5385 = vmatprep.subr.bf16.mxu0 %v8399_v4  ;;  %5918 = vmatprep.subr.bf16.mxu1 %v8402_v60  ;;  %v8490_v4 = vld [vmem:[%s11225_s1 + $0x17c4] ss:$16 sps:$4 sm:$0xff]   ;;  %v8493_v60 = vld [vmem:[%s11225_s1 + $0x17cc] ss:$16 sps:$4 sm:$0xff]  }
 0x2bf   :  { %5386 = vmatpush1.bf16.msra.mxu0 %v8397_v5  ;;  %5919 = vmatpush1.bf16.msra.mxu1 %v8400_v6  ;;  %v8488_v5 = vld [vmem:[%s11225_s1 + $0x17c0] ss:$16 sps:$4 sm:$0xff]   ;;  %v8491_v6 = vld [vmem:[%s11225_s1 + $0x17c8] ss:$16 sps:$4 sm:$0xff]  }
 0x2c0   :  { %5396 = vmatprep.subr.bf16.mxu0 %v8406_v7  ;;  %5929 = vmatprep.subr.bf16.mxu1 %v8409_v62  ;;  %v8496_v7 = vld [vmem:[%s11225_s1 + $0x17e4] ss:$16 sps:$4 sm:$0xff]   ;;  %v8499_v62 = vld [vmem:[%s11225_s1 + $0x17ec] ss:$16 sps:$4 sm:$0xff]  }
 0x2c2   :  { %5388 = vmatmul.mubr.bf16.vlgmr.msra.gmra.mrb[0].mxu0 %v10860_v9  ;;  %5921 = vmatmul.mubr.bf16.vlgmr.msra.gmra.mrb[0].mxu1 %v10860_v9 }
 0x2c3   :  { %5397 = vmatpush1.bf16.msra.mxu0 %v8404_v10  ;;  %5930 = vmatpush1.bf16.msra.mxu1 %v8407_v11  ;;  %v8494_v10 = vld [vmem:[%s11225_s1 + $0x17e0] ss:$16 sps:$4 sm:$0xff]   ;;  %v8497_v11 = vld [vmem:[%s11225_s1 + $0x17e8] ss:$16 sps:$4 sm:$0xff]  }
 0x2c4   :  { %5398 = vmatprep.subr.bf16.mxu0 %v8412_v12  ;;  %5931 = vmatprep.subr.bf16.mxu1 %v8415_v0  ;;  %v8502_v12 = vld [vmem:[%s11225_s1 + $0x1804] ss:$16 sps:$4 sm:$0xff]   ;;  %v8505_v0 = vld [vmem:[%s11225_s1 + $0x180c] ss:$16 sps:$4 sm:$0xff]  }
 0x2c5   :  { %5428 = vmatprep.mubr.bf16.mxu0 %v982_v52  ;;  %5961 = vmatprep.mubr.bf16.mxu1 %v982_v52  ;;  %v980_v52 = vcombine.high %v10860_v9, %v10860_v9  ;;  %v8511_v9 = vld [vmem:[%s11225_s1 + $0x182c] ss:$16 sps:$4 sm:$0xff]  }
 0x2c7   :  { %5399 = vmatpush1.bf16.msra.mxu0 %v8410_v15  ;;  %5932 = vmatpush1.bf16.msra.mxu1 %v8413_v16  ;;  %v8500_v15 = vld [vmem:[%s11225_s1 + $0x1800] ss:$16 sps:$4 sm:$0xff]   ;;  %v8503_v16 = vld [vmem:[%s11225_s1 + $0x1808] ss:$16 sps:$4 sm:$0xff]  }
 0x2c8   :  { %5400 = vmatprep.subr.bf16.mxu0 %v8418_v8  ;;  %5933 = vmatprep.subr.bf16.mxu1 %v8421_v17  ;;  %v8508_v8 = vld [vmem:[%s11225_s1 + $0x1824] ss:$16 sps:$4 sm:$0xff]   ;;  %v8506_v17 = vld [vmem:[%s11225_s1 + $0x1820] ss:$16 sps:$4 sm:$0xff]  }
 0x2cb   :  { %5401 = vmatpush1.bf16.msra.mxu0 %v8416_v18  ;;  %5934 = vmatpush1.bf16.msra.mxu1 %v8419_v19  ;;  %v8509_v18 = vld [vmem:[%s11225_s1 + $0x1828] ss:$16 sps:$4 sm:$0xff]   ;;  %v8514_v19 = vld [vmem:[%s11225_s1 + $0x1844] ss:$16 sps:$4 sm:$0xff]  }
 0x2cc   :  { %5402 = vmatprep.subr.bf16.mxu0 %v8424_v20  ;;  %5935 = vmatprep.subr.bf16.mxu1 %v8427_v22  ;;  %v8517_v20 = vld [vmem:[%s11225_s1 + $0x184c] ss:$16 sps:$4 sm:$0xff]   ;;  %v8583_v22 = vmov 0  }
 0x2cf   :  { %5403 = vmatpush1.bf16.msra.mxu0 %v8422_v23  ;;  %5936 = vmatpush1.bf16.msra.mxu1 %v8425_v24  ;;  %v8512_v23 = vld [vmem:[%s11225_s1 + $0x1840] ss:$16 sps:$4 sm:$0xff]   ;;  %v8515_v24 = vld [vmem:[%s11225_s1 + $0x1848] ss:$16 sps:$4 sm:$0xff]  }
 0x2d0   :  { %5404 = vmatprep.subr.bf16.mxu0 %v8430_v13  ;;  %5937 = vmatprep.subr.bf16.mxu1 %v8433_v27  ;;  %v8520_v13 = vld [vmem:[%s11225_s1 + $0x1864] ss:$16 sps:$4 sm:$0xff]   ;;  %v8523_v27 = vld [vmem:[%s11225_s1 + $0x186c] ss:$16 sps:$4 sm:$0xff]  }
 0x2d3   :  { %5405 = vmatpush1.bf16.msra.mxu0 %v8428_v28  ;;  %5938 = vmatpush1.bf16.msra.mxu1 %v8431_v29  ;;  %v8518_v28 = vld [vmem:[%s11225_s1 + $0x1860] ss:$16 sps:$4 sm:$0xff]   ;;  %v8521_v29 = vld [vmem:[%s11225_s1 + $0x1868] ss:$16 sps:$4 sm:$0xff]  }
 0x2d4   :  { %5406 = vmatprep.subr.bf16.mxu0 %v8436_v14  ;;  %5939 = vmatprep.subr.bf16.mxu1 %v8439_v30  ;;  %v6378_v14 = vld.sshfl [vmem:[%s11224_s0 + $0x18] sm:$0x1 pattern:$0x75316420]  ;;  %v8524_v30 = vld [vmem:[%s11227_s3 + $0x40] sm:$0xff]  }
 0x2d7   :  { %5407 = vmatpush1.bf16.msra.mxu0 %v8434_v31  ;;  %5940 = vmatpush1.bf16.msra.mxu1 %v8437_v25  ;;  %v8525_v31 = vld [vmem:[%s11227_s3 + $0xc0] sm:$0xff]   ;;  %v996_v25 = vrot.slane %v6378_v14, %v8750_v49  ;;  %v8529_v49 = vld [vmem:[%s11227_s3 + $0xc8] sm:$0xff]  }
 0x2d8   :  { %5408 = vmatprep.subr.bf16.mxu0 %v8442_v32  ;;  %5941 = vmatprep.subr.bf16.mxu1 %v8445_v33  ;;  %v8526_v32 = vld [vmem:[%s11227_s3] sm:$0xff]  }
 0x2d9   :  { %v8527_v33 = vld [vmem:[%s11227_s3 + $0x80] sm:$0xff]  }
 0x2db   :  { %5409 = vmatpush1.bf16.msra.mxu0 %v8440_v26  ;;  %5942 = vmatpush1.bf16.msra.mxu1 %v8443_v36  ;;  %v8528_v26 = vld [vmem:[%s11227_s3 + $0x48] sm:$0xff]  }
 0x2dc   :  { %5410 = vmatprep.subr.bf16.mxu0 %v8448_v37  ;;  %5943 = vmatprep.subr.bf16.mxu1 %v8451_v21  ;;  %v8530_v36 = vld [vmem:[%s11227_s3 + $0x8] sm:$0xff]   ;;  %v8532_v21 = vld [vmem:[%s11227_s3 + $0x50] sm:$0xff]  }
 0x2dd   :  { %v8531_v37 = vld [vmem:[%s11227_s3 + $0x88] sm:$0xff]  }
 0x2df   :  { %5411 = vmatpush1.bf16.msra.mxu0 %v8446_v39  ;;  %5944 = vmatpush1.bf16.msra.mxu1 %v8449_v40  ;;  %v8533_v39 = vld [vmem:[%s11227_s3 + $0xd0] sm:$0xff]  }
 0x2e0   :  { %5412 = vmatprep.subr.bf16.mxu0 %v8454_v41  ;;  %5945 = vmatprep.subr.bf16.mxu1 %v8457_v34  ;;  %v8534_v40 = vld [vmem:[%s11227_s3 + $0x10] sm:$0xff]   ;;  %v8536_v34 = vld [vmem:[%s11227_s3 + $0x58] sm:$0xff]  }
 0x2e1   :  { %v8535_v41 = vld [vmem:[%s11227_s3 + $0x90] sm:$0xff]  }
 0x2e3   :  { %5413 = vmatpush1.bf16.msra.mxu0 %v8452_v43  ;;  %5946 = vmatpush1.bf16.msra.mxu1 %v8455_v45  ;;  %v8537_v43 = vld [vmem:[%s11227_s3 + $0xd8] sm:$0xff]  }
 0x2e4   :  { %5414 = vmatprep.subr.bf16.mxu0 %v8460_v46  ;;  %5947 = vmatprep.subr.bf16.mxu1 %v8463_v35  ;;  %v8538_v45 = vld [vmem:[%s11227_s3 + $0x18] sm:$0xff]   ;;  %v8540_v35 = vld [vmem:[%s11227_s3 + $0x60] sm:$0xff]  }
 0x2e5   :  { %v8539_v46 = vld [vmem:[%s11227_s3 + $0x98] sm:$0xff]  }
 0x2e7   :  { %5415 = vmatpush1.bf16.msra.mxu0 %v8458_v50  ;;  %5948 = vmatpush1.bf16.msra.mxu1 %v8461_v53  ;;  %v8541_v50 = vld [vmem:[%s11227_s3 + $0xe0] sm:$0xff]  }
 0x2e8   :  { %5416 = vmatprep.subr.bf16.mxu0 %v8466_v38  ;;  %5949 = vmatprep.subr.bf16.mxu1 %v8469_v54  ;;  %v8542_v53 = vld [vmem:[%s11227_s3 + $0x20] sm:$0xff]   ;;  %v8544_v54 = vld [vmem:[%s11227_s3 + $0x68] sm:$0xff]  }
 0x2e9   :  { %v8543_v38 = vld [vmem:[%s11227_s3 + $0xa0] sm:$0xff]  }
 0x2eb   :  { %5417 = vmatpush1.bf16.msra.mxu0 %v8464_v55  ;;  %5950 = vmatpush1.bf16.msra.mxu1 %v8467_v56  ;;  %v8545_v55 = vld [vmem:[%s11227_s3 + $0xe8] sm:$0xff]  }
 0x2ec   :  { %5418 = vmatprep.subr.bf16.mxu0 %v8472_v47  ;;  %5951 = vmatprep.subr.bf16.mxu1 %v8475_v57  ;;  %v8546_v56 = vld [vmem:[%s11227_s3 + $0x28] sm:$0xff]   ;;  %v8548_v57 = vld [vmem:[%s11227_s3 + $0x70] sm:$0xff]  }
 0x2ed   :  { %v8547_v47 = vld [vmem:[%s11227_s3 + $0xa8] sm:$0xff]  }
 0x2ef   :  { %5419 = vmatpush1.bf16.msra.mxu0 %v8470_v58  ;;  %5952 = vmatpush1.bf16.msra.mxu1 %v8473_v59  ;;  %v8549_v58 = vld [vmem:[%s11227_s3 + $0xf0] sm:$0xff]  }
 0x2f0   :  { %5420 = vmatprep.subr.bf16.mxu0 %v8478_v48  ;;  %5953 = vmatprep.subr.bf16.mxu1 %v8481_v61  ;;  %v8550_v59 = vld [vmem:[%s11227_s3 + $0x30] sm:$0xff]   ;;  %v8552_v61 = vld [vmem:[%s11227_s3 + $0x78] sm:$0xff]  }
 0x2f1   :  { %v8551_v48 = vld [vmem:[%s11227_s3 + $0xb0] sm:$0xff]  }
 0x2f3   :  { %5421 = vmatpush1.bf16.msra.mxu0 %v8476_v63  ;;  %5954 = vmatpush1.bf16.msra.mxu1 %v8479_v44  ;;  %v8553_v63 = vld [vmem:[%s11227_s3 + $0xf8] sm:$0xff]  }
 0x2f4   :  { %5422 = vmatprep.subr.bf16.mxu0 %v8484_v1  ;;  %5955 = vmatprep.subr.bf16.mxu1 %v8487_v51  ;;  %v8554_v44 = vld [vmem:[%s11227_s3 + $0x38] sm:$0xff]   ;;  %v814_v51 = vsub.s32 0, %v8732_v42 }
 0x2f5   :  { %v8555_v1 = vld [vmem:[%s11227_s3 + $0xb8] sm:$0xff]  }
 0x2f7   :  { %5423 = vmatpush1.bf16.msra.mxu0 %v8482_v2  ;;  %5956 = vmatpush1.bf16.msra.mxu1 %v8485_v3  ;;  %v822_v2 = vsub.s32 2, %v8732_v42  ;;  %v810_v3 = vld [vmem:[%s11226_s2] sm:$0xf] }
 0x2f8   :  { %5424 = vmatprep.subr.bf16.mxu0 %v8490_v4  ;;  %5957 = vmatprep.subr.bf16.mxu1 %v8493_v60  ;;  %v818_v4 = vsub.s32 1, %v8732_v42  ;;  %v826_v60 = vsub.s32 3, %v8732_v42 }
 0x2fb   :  { %5425 = vmatpush1.bf16.msra.mxu0 %v8488_v5  ;;  %5958 = vmatpush1.bf16.msra.mxu1 %v8491_v6  ;;  %v815_v5 = vrot.slane %v810_v3, %v814_v51  ;;  %v823_v6 = vrot.slane %v810_v3, %v822_v2 }
 0x2fc   :  { %5426 = vmatprep.subr.bf16.mxu0 %v8496_v7  ;;  %5959 = vmatprep.subr.bf16.mxu1 %v8499_v62  ;;  %v819_v7 = vrot.slane %v810_v3, %v818_v4  ;;  %v827_v62 = vrot.slane %v810_v3, %v826_v60 }
 0x2ff   :  { %5427 = vmatpush1.bf16.msra.mxu0 %v8494_v10  ;;  %5960 = vmatpush1.bf16.msra.mxu1 %v8497_v11 }
 0x300   :  { %5437 = vmatprep.subr.bf16.mxu0 %v8502_v12  ;;  %5970 = vmatprep.subr.bf16.mxu1 %v8505_v0 }
 0x302   :  { %5429 = vmatmul.mubr.bf16.vlgmr.msra.gmra.mrb[0].mxu0 %v980_v52  ;;  %5962 = vmatmul.mubr.bf16.vlgmr.msra.gmra.mrb[0].mxu1 %v980_v52 }
 0x303   :  { %5438 = vmatpush1.bf16.msra.mxu0 %v8500_v15  ;;  %5971 = vmatpush1.bf16.msra.mxu1 %v8503_v16 }
 0x304   :  { %5439 = vmatprep.subr.bf16.mxu0 %v8508_v8  ;;  %5972 = vmatprep.subr.bf16.mxu1 %v8511_v9 }
 0x305   :  { %5469 = vmatprep.mubr.bf16.mxu0 %v8583_v22  ;;  %6002 = vmatprep.mubr.bf16.mxu1 %v8583_v22 }
 0x307   :  { %5440 = vmatpush1.bf16.msra.mxu0 %v8506_v17  ;;  %5973 = vmatpush1.bf16.msra.mxu1 %v8509_v18 }
 0x308   :  { %5441 = vmatprep.subr.bf16.mxu0 %v8514_v19  ;;  %5974 = vmatprep.subr.bf16.mxu1 %v8517_v20 }
 0x30b   :  { %5442 = vmatpush1.bf16.msra.mxu0 %v8512_v23  ;;  %5975 = vmatpush1.bf16.msra.mxu1 %v8515_v24 }
 0x30c   :  { %5443 = vmatprep.subr.bf16.mxu0 %v8520_v13  ;;  %5976 = vmatprep.subr.bf16.mxu1 %v8523_v27 }
 0x30f   :  { %5444 = vmatpush1.bf16.msra.mxu0 %v8518_v28  ;;  %5977 = vmatpush1.bf16.msra.mxu1 %v8521_v29 }
 0x310   :  { %7198 = vmatprep.subr.bf16.mxu0 %v8524_v30  ;;  %7220 = vmatprep.subr.bf16.mxu1 %v8525_v31  ;;  %v7165_v30 = vld [vmem:[%s11228_s4] ss:$0 sm:$0xff] }
 0x312   :  { %7163 = vmatmul.mubr.msk.bf16.vlgmr.msra.gmra.mrb[0].mxu0 %vm4941_vm0, %v996_v25  ;;  %7164 = vmatmul.mubr.msk.bf16.vlgmr.msra.gmra.mrb[0].mxu1 %vm4941_vm0, %v996_v25 }
 0x313   :  { %7199 = vmatpush3.bf16.msra.mxu0 %v8526_v32  ;;  %7221 = vmatpush3.bf16.msra.mxu1 %v8527_v33 }
 0x314   :  { %7200 = vmatprep.subr.bf16.mxu0 %v8528_v26  ;;  %7222 = vmatprep.subr.bf16.mxu1 %v8529_v49 }
 0x317   :  { %7201 = vmatpush3.bf16.msra.mxu0 %v8530_v36  ;;  %7223 = vmatpush3.bf16.msra.mxu1 %v8531_v37 }
 0x318   :  { %7202 = vmatprep.subr.bf16.mxu0 %v8532_v21  ;;  %7224 = vmatprep.subr.bf16.mxu1 %v8533_v39 }
 0x31b   :  { %7203 = vmatpush3.bf16.msra.mxu0 %v8534_v40  ;;  %7225 = vmatpush3.bf16.msra.mxu1 %v8535_v41 }
 0x31c   :  { %7204 = vmatprep.subr.bf16.mxu0 %v8536_v34  ;;  %7226 = vmatprep.subr.bf16.mxu1 %v8537_v43 }
 0x31f   :  { %7205 = vmatpush3.bf16.msra.mxu0 %v8538_v45  ;;  %7227 = vmatpush3.bf16.msra.mxu1 %v8539_v46 }
 0x320   :  { %7206 = vmatprep.subr.bf16.mxu0 %v8540_v35  ;;  %7228 = vmatprep.subr.bf16.mxu1 %v8541_v50 }
 0x323   :  { %7207 = vmatpush3.bf16.msra.mxu0 %v8542_v53  ;;  %7229 = vmatpush3.bf16.msra.mxu1 %v8543_v38 }
 0x324   :  { %7208 = vmatprep.subr.bf16.mxu0 %v8544_v54  ;;  %7230 = vmatprep.subr.bf16.mxu1 %v8545_v55 }
 0x327   :  { %7209 = vmatpush3.bf16.msra.mxu0 %v8546_v56  ;;  %7231 = vmatpush3.bf16.msra.mxu1 %v8547_v47 }
 0x328   :  { %7210 = vmatprep.subr.bf16.mxu0 %v8548_v57  ;;  %7232 = vmatprep.subr.bf16.mxu1 %v8549_v58 }
 0x32b   :  { %7211 = vmatpush3.bf16.msra.mxu0 %v8550_v59  ;;  %7233 = vmatpush3.bf16.msra.mxu1 %v8551_v48 }
 0x32c   :  { %7212 = vmatprep.subr.bf16.mxu0 %v8552_v61  ;;  %7234 = vmatprep.subr.bf16.mxu1 %v8553_v63 }
 0x32f   :  { %7213 = vmatpush3.bf16.msra.mxu0 %v8554_v44  ;;  %7235 = vmatpush3.bf16.msra.mxu1 %v8555_v1 }
 0x3e5   :  { %v5471_v10 = vpop.f32.mrb[0].mxu0  ;;  %v6004_v11 = vpop.f32.mrb[0].mxu1 }
 0x3e6   :  { %v7242_v12 = vadd.f32 %v5471_v10, %v815_v5  ;;  %v7244_v0 = vadd.f32 %v6004_v11, %v823_v6  ;;  %v5473_v52 = vpop.f32.mrb[1].mxu0  ;;  %v6006_v15 = vpop.f32.mrb[1].mxu1 }
 0x3e7   :  { %v7243_v16 = vadd.f32 %v5473_v52, %v819_v7  ;;  %v7245_v8 = vadd.f32 %v6006_v15, %v827_v62  ;;  %v5475_v9 = vpop.f32.mrb[2].mxu0  ;;  %v6008_v17 = vpop.f32.mrb[2].mxu1 }
 0x3e8   :  { %v6011_v18 = vmax.f32 %v7242_v12, 0.0  ;;  %v6013_v19 = vmax.f32 %v7244_v0, 0.0  ;;  %v5476_v20 = vpop.f32.mrb[3].mxu0  ;;  %v6009_v22 = vpop.f32.mrb[3].mxu1 }
 0x3e9   :  { %v6012_v23 = vmax.f32 %v7243_v16, 0.0  ;;  %v6014_v42 = vmax.f32 %v7245_v8, 0.0 }
 0x3ea   :  { %v6015_v27 = vpack.c.bf16 %v6011_v18, %v6011_v18  ;;  %v6017_v28 = vpack.c.bf16 %v6013_v19, %v6013_v19 }
 0x3eb   :  { %v6016_v24 = vpack.c.bf16 %v6012_v23, %v6012_v23  ;;  %v6018_v13 = vpack.c.bf16 %v6014_v42, %v6014_v42 }
 0x3ed   :  { %6314 = vmatprep.mubr.bf16.mxu0 %v6016_v24  ;;  %6354 = vmatprep.mubr.bf16.mxu1 %v6018_v13 }
 0x3ee   :  { %6315 = vmatmul.mubr.bf16.vlgmr.msra.gmra.mrb[4].mxu0 %v6015_v27  ;;  %6355 = vmatmul.mubr.bf16.vlgmr.msra.gmra.mrb[4].mxu1 %v6017_v28 }
 0x4c1   :  { %v7214_v29 = vpop.f32.mrb[4].mxu0  ;;  %v7236_v14 = vpop.f32.mrb[4].mxu1 }
 0x4c2   :  { %v7215_v31 = vpop.f32.mrb[5].mxu0  ;;  %v7237_v25 = vpop.f32.mrb[5].mxu1 }
 0x4c3   :  { %v7216_v32 = vadd.f32 %v7215_v31, %v7214_v29  ;;  %v7238_v33 = vadd.f32 %v7237_v25, %v7236_v14  ;;  %v7217_v26 = vpop.f32.mrb[6].mxu0  ;;  %v7239_v49 = vpop.f32.mrb[6].mxu1 }
 0x4c4   :  { %v7218_v36 = vpop.f32.mrb[7].mxu0  ;;  %v7240_v37 = vpop.f32.mrb[7].mxu1 }
 0x4c5   :  { %v6317_v21 = vadd.f32 %v7216_v32, %v7165_v30 }
 0x4c7   :  { %v6357_v39 = vadd.f32 %v7238_v33, %v6317_v21 }
 0x4c9   :  { %6363 = vst.msk [vmem:[#allocation2] sm:$0x3] %vm6362_vm1, %v6357_v39 }
 0x4ca   :  { %8569 = shalt.err (!%p8566_p4)
}
 0x4cb   :  { %s8570_s10 = scalar_lea.hbm %s11229_s5, 32 }
 0x4cc   :  { %p8571_p5 = scmp.ne.s32.totalorder %s11229_s5, %s8570_s10  ;;  %p8574_p6 = scmp.lt.u32.totalorder %s8570_s10, %s11229_s5 }
 0x4ce   :  { %p8576_p7 = pnand %p8574_p6, %p8571_p5 }
 0x4d0   :  { %8579 = shalt.err (!%p8576_p7)
}
 0x4d1   :  { %6373 = dma.vmem_to_hbm [thread:$0]  %s6371_s7, 32, %s11229_s5, [#allocation3]  }
 0x4d2   :  { %8580 = dma.done.wait [#allocation3], 32  }
 0x4d3   :  { %8581 = vsyncadd [#allocation3], 4294967264 }
 0x4d4   :  { %6377 = vsyncpa [#allocation3], 1 }

</bundles_post_ra>
